<compile_context>
chip_gen: v7x
topology: tpu7x:2x2x1
jax: 0.10.0
libtpu: 0.0.40
codegen_flags: <defaults>
</compile_context>

<pallas_src>
import jax
import jax.numpy as jnp
from jax.experimental import pallas as pl
from jax.experimental.pallas import tpu as pltpu


def _decoder_kernel(sos_oh_ref, enc_ref,
                    wx_ref, wh_ref, bx_ref, bh_ref,
                    wam_ref, wah_ref, ba_ref, wfc_ref, bfc_ref,
                    out_ref):
    B, V = sos_oh_ref.shape
    _, T, E = enc_ref.shape
    GP = wx_ref.shape[1] // 3          # per-gate lane-padded width (multiple of 128)
    max_len = out_ref.shape[0]

    # Hoist only the cheap, repeatedly-broadcast loads; weight matrices are loaded
    # at point of use inside the loop body (keeps live vregs low in the unrolled body).
    enc = enc_ref[...]                               # (B, T, E)
    bx, bh = bx_ref[...], bh_ref[...]                # (1, 3*GP) each
    b_att, b_fc = ba_ref[...], bfc_ref[...]          # (1, E), (1, V)
    iota_v = jax.lax.broadcasted_iota(jnp.int32, (B, V), 1)

    def step_fn(step, carry):
        h, onehot = carry                            # (B, E), (B, V)

        # ---- GRU cell (PyTorch gate order r, z, n); embedding folded into Wx ----
        # Two fused gate matmuls; gate blocks are padded to GP lanes -> slices below
        # fall on full-vreg boundaries (no lane shuffles on the serial chain).
        gx = jnp.dot(onehot, wx_ref[...], preferred_element_type=jnp.float32) + bx
        gh = jnp.dot(h, wh_ref[...], preferred_element_type=jnp.float32) + bh
        r = jax.nn.sigmoid(gx[:, 0:GP] + gh[:, 0:GP])                    # (B, GP)
        z = jax.nn.sigmoid(gx[:, GP:2 * GP] + gh[:, GP:2 * GP])[:, :E]   # (B, E)
        n = jnp.tanh(gx[:, 2 * GP:3 * GP] + r * gh[:, 2 * GP:3 * GP])[:, :E]
        h_new = (1.0 - z) * n + z * h                # (B, E)

        # ---- dot-product attention over encoder outputs (VPU mul + reductions) ----
        scores = jnp.sum(h_new[:, None, :] * enc, axis=-1)        # (B, T)
        m = jnp.max(scores, axis=-1, keepdims=True)
        ex = jnp.exp(scores - m)
        attn = ex * pl.reciprocal(jnp.sum(ex, axis=-1, keepdims=True), approx=True)
        mix = jnp.sum(attn[:, :, None] * enc, axis=1)              # (B, E)

        # linear_out(cat(mix, output)) without the lane concat: split-weight matmuls.
        att_out = jnp.tanh(
            jnp.dot(mix, wam_ref[...], preferred_element_type=jnp.float32)
            + jnp.dot(h_new, wah_ref[...], preferred_element_type=jnp.float32)
            + b_att)                                               # (B, E)

        # ---- output projection + exact f32 log_softmax ----
        logits = jnp.dot(att_out, wfc_ref[...],
                         preferred_element_type=jnp.float32) + b_fc   # (B, V)
        lmax = jnp.max(logits, axis=-1, keepdims=True)
        lse = jnp.log(jnp.sum(jnp.exp(logits - lmax), axis=-1, keepdims=True)) + lmax
        out_ref[step] = logits - lse

        # ---- greedy symbol = argmax (first occurrence, like torch.topk(1)) ----
        idx = jnp.min(jnp.where(logits == lmax, iota_v, V), axis=-1, keepdims=True)
        onehot_new = (iota_v == idx).astype(jnp.float32)
        return h_new, onehot_new

    h0 = jnp.zeros((B, E), jnp.float32)
    # unroll=True only because max_len is tiny; roll / partially unroll for long decodes.
    jax.lax.fori_loop(0, max_len, step_fn, (h0, sos_oh_ref[...]), unroll=True)


def pallas_greedy_decode(sos_tokens, encoder_outputs, params, max_len):
    B, T, E = encoder_outputs.shape
    V, H = params['emb'].shape
    f32 = jnp.float32

    sos_onehot = jax.nn.one_hot(sos_tokens, V, dtype=f32)          # (B, V)

    # --- one-time wrapper-side weight fusion / padding (XLA does it once) ---
    emb_wih = params['emb'] @ params['w_ih'].T                     # (V, 3E)
    whh_t = params['w_hh'].T                                       # (E, 3E)

    GP = ((E + 127) // 128) * 128                                  # per-gate lane pad
    pad = GP - E

    def pad_gate_weights(w):          # (rows, 3E) -> (rows, 3*GP)
        blocks = [jnp.pad(w[:, g * E:(g + 1) * E], ((0, 0), (0, pad)))
                  for g in range(3)]
        return jnp.concatenate(blocks, axis=1)

    def pad_gate_bias(b):             # (3E,) -> (1, 3*GP)
        blocks = [jnp.pad(b[g * E:(g + 1) * E], (0, pad)) for g in range(3)]
        return jnp.concatenate(blocks).reshape(1, 3 * GP)

    wx_pad = pad_gate_weights(emb_wih)                             # (V, 3*GP)
    wh_pad = pad_gate_weights(whh_t)                               # (E, 3*GP)
    bx_pad = pad_gate_bias(params['b_ih'])                         # (1, 3*GP)
    bh_pad = pad_gate_bias(params['b_hh'])                         # (1, 3*GP)

    w_att_t = params['w_att'].T                                    # (2E, E)
    w_att_mix = w_att_t[:E]                                        # (E, E)  mix part
    w_att_h = w_att_t[E:]                                          # (E, E)  h part
    b_att = params['b_att'].reshape(1, E)
    w_fc_t = params['w_fc'].T                                      # (E, V)
    b_fc = params['b_fc'].reshape(1, V)

    n_inputs = 11
    vmem_specs = [pl.BlockSpec(memory_space=pltpu.MemorySpace.VMEM)
                  for _ in range(n_inputs)]

    return pl.pallas_call(
        _decoder_kernel,
        out_shape=jax.ShapeDtypeStruct((max_len, B, V), f32),
        in_specs=vmem_specs,
        out_specs=pl.BlockSpec(memory_space=pltpu.MemorySpace.VMEM),
    )(sos_onehot, encoder_outputs,
      wx_pad, wh_pad, bx_pad, bh_pad,
      w_att_mix, w_att_h, b_att, w_fc_t, b_fc)


# ----------------------------- pure-JAX reference -----------------------------
def reference_greedy_decode(sos_tokens, enc, params, max_len):
    emb, w_ih, b_ih = params['emb'], params['w_ih'], params['b_ih']
    w_hh, b_hh = params['w_hh'], params['b_hh']
    w_att, b_att = params['w_att'], params['b_att']
    w_fc, b_fc = params['w_fc'], params['b_fc']
    B = sos_tokens.shape[0]
    E = w_hh.shape[1]
    h = jnp.zeros((B, E), jnp.float32)
    sym = sos_tokens
    outs = []
    for _ in range(max_len):
        x = emb[sym]
        gx = x @ w_ih.T + b_ih
        gh = h @ w_hh.T + b_hh
        r = jax.nn.sigmoid(gx[:, :E] + gh[:, :E])
        z = jax.nn.sigmoid(gx[:, E:2 * E] + gh[:, E:2 * E])
        n = jnp.tanh(gx[:, 2 * E:] + r * gh[:, 2 * E:])
        h = (1.0 - z) * n + z * h
        scores = jnp.einsum('be,bte->bt', h, enc)
        attn = jax.nn.softmax(scores, axis=-1)
        mix = jnp.einsum('bt,bte->be', attn, enc)
        att_out = jnp.tanh(jnp.concatenate([mix, h], axis=-1) @ w_att.T + b_att)
        logits = att_out @ w_fc.T + b_fc
        outs.append(jax.nn.log_softmax(logits, axis=-1))
        sym = jnp.argmax(logits, axis=-1)
    return jnp.stack(outs)


if __name__ == "__main__":
    # Small shapes consistent with the module's forward:
    B, T, E = 4, 8, 32       # batch, encoder length, encoder_size (= GRU hidden)
    V, H = 32, 32            # vocab_size, hidden_size (= embedding dim / GRU input)
    DEC_T = 7                # inputs shape (B, DEC_T) -> max_length = DEC_T - 1
    SOS_ID, EOS_ID = 1, 2
    MAX_LEN = DEC_T - 1

    key = jax.random.PRNGKey(0)
    ks = jax.random.split(key, 12)
    params = {
        'emb':   0.3 * jax.random.normal(ks[0], (V, H), jnp.float32),
        'w_ih':  0.2 * jax.random.normal(ks[1], (3 * E, H), jnp.float32),
        'b_ih':  0.1 * jax.random.normal(ks[2], (3 * E,), jnp.float32),
        'w_hh':  0.2 * jax.random.normal(ks[3], (3 * E, E), jnp.float32),
        'b_hh':  0.1 * jax.random.normal(ks[4], (3 * E,), jnp.float32),
        'w_att': 0.2 * jax.random.normal(ks[5], (E, 2 * E), jnp.float32),
        'b_att': 0.1 * jax.random.normal(ks[6], (E,), jnp.float32),
        'w_fc':  0.2 * jax.random.normal(ks[7], (V, E), jnp.float32),
        'b_fc':  0.1 * jax.random.normal(ks[8], (V,), jnp.float32),
    }

    # forward(inputs, encoder_outputs, ..., teacher_forcing_ratio=0):
    # only inputs[:, 0] (the SOS column) is consumed in the greedy path.
    inputs = jnp.concatenate(
        [jnp.full((B, 1), SOS_ID, jnp.int32),
         jax.random.randint(ks[9], (B, DEC_T - 1), 0, V, jnp.int32)], axis=1)
    encoder_outputs = jax.random.normal(ks[10], (B, T, E), jnp.float32)

    sos_tokens = inputs[:, 0]

    out = pallas_greedy_decode(sos_tokens, encoder_outputs, params, MAX_LEN)
    out = jax.block_until_ready(out)

    ref = reference_greedy_decode(sos_tokens, encoder_outputs, params, MAX_LEN)
    assert out.shape == (MAX_LEN, B, V)
    # approx=True reciprocal (attention softmax only) + weight-fusion reassociation
    # introduce ~1e-4..1e-3 level differences in the log-probs; well below anything
    # that changes the greedy decode path at these shapes.
    assert jnp.allclose(out, ref, atol=5e-3, rtol=5e-3), \
        f"max abs diff {jnp.max(jnp.abs(out - ref))}"

    print("KERNEL_OK")
</pallas_src>

<mosaic_0001>
module attributes {stable_mosaic.version = 11 : i64} {
  func.func @_decoder_kernel(%arg0: memref<4x32xf32, #tpu.memory_space<vmem>>, %arg1: memref<4x8x32xf32, #tpu.memory_space<vmem>>, %arg2: memref<32x384xf32, #tpu.memory_space<vmem>>, %arg3: memref<32x384xf32, #tpu.memory_space<vmem>>, %arg4: memref<1x384xf32, #tpu.memory_space<vmem>>, %arg5: memref<1x384xf32, #tpu.memory_space<vmem>>, %arg6: memref<32x32xf32, #tpu.memory_space<vmem>>, %arg7: memref<32x32xf32, #tpu.memory_space<vmem>>, %arg8: memref<1x32xf32, #tpu.memory_space<vmem>>, %arg9: memref<32x32xf32, #tpu.memory_space<vmem>>, %arg10: memref<1x32xf32, #tpu.memory_space<vmem>>, %arg11: memref<6x4x32xf32, #tpu.memory_space<vmem>>) attributes {dimension_semantics = [], scalar_prefetch = 0 : i64, scratch_operands = 0 : i64, tpu.core_type = #tpu.core_type<tc>} {
    %c0 = arith.constant 0 : index
    %c0_0 = arith.constant 0 : index
    %c0_1 = arith.constant 0 : index
    %0 = vector.load %arg1[%c0, %c0_0, %c0_1] : memref<4x8x32xf32, #tpu.memory_space<vmem>>, vector<4x8x32xf32>
    %c0_2 = arith.constant 0 : index
    %c0_3 = arith.constant 0 : index
    %1 = vector.load %arg4[%c0_2, %c0_3] : memref<1x384xf32, #tpu.memory_space<vmem>>, vector<1x384xf32>
    %c0_4 = arith.constant 0 : index
    %c0_5 = arith.constant 0 : index
    %2 = vector.load %arg5[%c0_4, %c0_5] : memref<1x384xf32, #tpu.memory_space<vmem>>, vector<1x384xf32>
    %c0_6 = arith.constant 0 : index
    %c0_7 = arith.constant 0 : index
    %3 = vector.load %arg8[%c0_6, %c0_7] : memref<1x32xf32, #tpu.memory_space<vmem>>, vector<1x32xf32>
    %c0_8 = arith.constant 0 : index
    %c0_9 = arith.constant 0 : index
    %4 = vector.load %arg10[%c0_8, %c0_9] : memref<1x32xf32, #tpu.memory_space<vmem>>, vector<1x32xf32>
    %5 = tpu.iota {dimensions = array<i32: 1>} : vector<4x32xi32>
    %cst = arith.constant 0.000000e+00 : f32
    %6 = vector.broadcast %cst : f32 to vector<4x32xf32>
    %c0_10 = arith.constant 0 : index
    %c0_11 = arith.constant 0 : index
    %7 = vector.load %arg0[%c0_10, %c0_11] : memref<4x32xf32, #tpu.memory_space<vmem>>, vector<4x32xf32>
    %c0_i32 = arith.constant 0 : i32
    %c0_12 = arith.constant 0 : index
    %c0_13 = arith.constant 0 : index
    %8 = vector.load %arg2[%c0_12, %c0_13] : memref<32x384xf32, #tpu.memory_space<vmem>>, vector<32x384xf32>
    %cst_14 = arith.constant dense<0.000000e+00> : vector<4x384xf32>
    %9 = tpu.matmul %7, %8, %cst_14 {dimension_numbers = #tpu.dot_dimension_numbers<[1], [0], [0], [1], [0, 0, 1, 1], [], []>} : vector<4x32xf32>, vector<32x384xf32>, vector<4x384xf32> -> vector<4x384xf32>
    %10 = vector.broadcast %1 : vector<1x384xf32> to vector<4x384xf32>
    %11 = arith.addf %9, %10 : vector<4x384xf32>
    %c0_15 = arith.constant 0 : index
    %c0_16 = arith.constant 0 : index
    %12 = vector.load %arg3[%c0_15, %c0_16] : memref<32x384xf32, #tpu.memory_space<vmem>>, vector<32x384xf32>
    %cst_17 = arith.constant dense<0.000000e+00> : vector<4x384xf32>
    %13 = tpu.matmul %6, %12, %cst_17 {dimension_numbers = #tpu.dot_dimension_numbers<[1], [0], [0], [1], [0, 0, 1, 1], [], []>} : vector<4x32xf32>, vector<32x384xf32>, vector<4x384xf32> -> vector<4x384xf32>
    %14 = vector.broadcast %2 : vector<1x384xf32> to vector<4x384xf32>
    %15 = arith.addf %13, %14 : vector<4x384xf32>
    %16 = vector.extract_strided_slice %11 {offsets = [0, 0], sizes = [4, 128], strides = [1, 1]} : vector<4x384xf32> to vector<4x128xf32>
    %17 = vector.extract_strided_slice %15 {offsets = [0, 0], sizes = [4, 128], strides = [1, 1]} : vector<4x384xf32> to vector<4x128xf32>
    %18 = arith.addf %16, %17 : vector<4x128xf32>
    %19 = arith.negf %18 : vector<4x128xf32>
    %20 = math.exp %19 : vector<4x128xf32>
    %cst_18 = arith.constant 1.000000e+00 : f32
    %21 = vector.broadcast %cst_18 : f32 to vector<4x128xf32>
    %22 = arith.addf %21, %20 : vector<4x128xf32>
    %23 = arith.divf %21, %22 : vector<4x128xf32>
    %24 = vector.extract_strided_slice %11 {offsets = [0, 128], sizes = [4, 128], strides = [1, 1]} : vector<4x384xf32> to vector<4x128xf32>
    %25 = vector.extract_strided_slice %15 {offsets = [0, 128], sizes = [4, 128], strides = [1, 1]} : vector<4x384xf32> to vector<4x128xf32>
    %26 = arith.addf %24, %25 : vector<4x128xf32>
    %27 = arith.negf %26 : vector<4x128xf32>
    %28 = math.exp %27 : vector<4x128xf32>
    %cst_19 = arith.constant 1.000000e+00 : f32
    %29 = vector.broadcast %cst_19 : f32 to vector<4x128xf32>
    %30 = arith.addf %29, %28 : vector<4x128xf32>
    %31 = arith.divf %29, %30 : vector<4x128xf32>
    %32 = vector.extract_strided_slice %31 {offsets = [0, 0], sizes = [4, 32], strides = [1, 1]} : vector<4x128xf32> to vector<4x32xf32>
    %33 = vector.extract_strided_slice %11 {offsets = [0, 256], sizes = [4, 128], strides = [1, 1]} : vector<4x384xf32> to vector<4x128xf32>
    %34 = vector.extract_strided_slice %15 {offsets = [0, 256], sizes = [4, 128], strides = [1, 1]} : vector<4x384xf32> to vector<4x128xf32>
    %35 = arith.mulf %23, %34 : vector<4x128xf32>
    %36 = arith.addf %33, %35 : vector<4x128xf32>
    %37 = math.tanh %36 : vector<4x128xf32>
    %38 = vector.extract_strided_slice %37 {offsets = [0, 0], sizes = [4, 32], strides = [1, 1]} : vector<4x128xf32> to vector<4x32xf32>
    %cst_20 = arith.constant 1.000000e+00 : f32
    %39 = vector.broadcast %cst_20 : f32 to vector<4x32xf32>
    %40 = arith.subf %39, %32 : vector<4x32xf32>
    %41 = arith.mulf %40, %38 : vector<4x32xf32>
    %42 = arith.mulf %32, %6 : vector<4x32xf32>
    %43 = arith.addf %41, %42 : vector<4x32xf32>
    %44 = vector.shape_cast %43 : vector<4x32xf32> to vector<4x1x32xf32>
    %45 = vector.broadcast %44 : vector<4x1x32xf32> to vector<4x8x32xf32>
    %46 = arith.mulf %45, %0 : vector<4x8x32xf32>
    %cst_21 = arith.constant dense<0.000000e+00> : vector<4x8xf32>
    %47 = vector.multi_reduction <add>, %46, %cst_21 [2] : vector<4x8x32xf32> to vector<4x8xf32>
    %cst_22 = arith.constant dense<0xFF800000> : vector<4xf32>
    %48 = vector.multi_reduction <maximumf>, %47, %cst_22 [1] : vector<4x8xf32> to vector<4xf32>
    %49 = vector.shape_cast %48 : vector<4xf32> to vector<4x1xf32>
    %50 = vector.broadcast %49 : vector<4x1xf32> to vector<4x8xf32>
    %51 = arith.subf %47, %50 : vector<4x8xf32>
    %52 = math.exp %51 : vector<4x8xf32>
    %cst_23 = arith.constant dense<0.000000e+00> : vector<4xf32>
    %53 = vector.multi_reduction <add>, %52, %cst_23 [1] : vector<4x8xf32> to vector<4xf32>
    %54 = vector.shape_cast %53 : vector<4xf32> to vector<4x1xf32>
    %55 = tpu.reciprocal %54 {approx = true} : vector<4x1xf32> -> vector<4x1xf32>
    %56 = vector.broadcast %55 : vector<4x1xf32> to vector<4x8xf32>
    %57 = arith.mulf %52, %56 : vector<4x8xf32>
    %58 = vector.shape_cast %57 : vector<4x8xf32> to vector<4x8x1xf32>
    %59 = vector.broadcast %58 : vector<4x8x1xf32> to vector<4x8x32xf32>
    %60 = arith.mulf %59, %0 : vector<4x8x32xf32>
    %cst_24 = arith.constant dense<0.000000e+00> : vector<4x32xf32>
    %61 = vector.multi_reduction <add>, %60, %cst_24 [1] : vector<4x8x32xf32> to vector<4x32xf32>
    %c0_25 = arith.constant 0 : index
    %c0_26 = arith.constant 0 : index
    %62 = vector.load %arg6[%c0_25, %c0_26] : memref<32x32xf32, #tpu.memory_space<vmem>>, vector<32x32xf32>
    %cst_27 = arith.constant dense<0.000000e+00> : vector<4x32xf32>
    %63 = tpu.matmul %61, %62, %cst_27 {dimension_numbers = #tpu.dot_dimension_numbers<[1], [0], [0], [1], [0, 0, 1, 1], [], []>} : vector<4x32xf32>, vector<32x32xf32>, vector<4x32xf32> -> vector<4x32xf32>
    %c0_28 = arith.constant 0 : index
    %c0_29 = arith.constant 0 : index
    %64 = vector.load %arg7[%c0_28, %c0_29] : memref<32x32xf32, #tpu.memory_space<vmem>>, vector<32x32xf32>
    %cst_30 = arith.constant dense<0.000000e+00> : vector<4x32xf32>
    %65 = tpu.matmul %43, %64, %cst_30 {dimension_numbers = #tpu.dot_dimension_numbers<[1], [0], [0], [1], [0, 0, 1, 1], [], []>} : vector<4x32xf32>, vector<32x32xf32>, vector<4x32xf32> -> vector<4x32xf32>
    %66 = arith.addf %63, %65 : vector<4x32xf32>
    %67 = vector.broadcast %3 : vector<1x32xf32> to vector<4x32xf32>
    %68 = arith.addf %66, %67 : vector<4x32xf32>
    %69 = math.tanh %68 : vector<4x32xf32>
    %c0_31 = arith.constant 0 : index
    %c0_32 = arith.constant 0 : index
    %70 = vector.load %arg9[%c0_31, %c0_32] : memref<32x32xf32, #tpu.memory_space<vmem>>, vector<32x32xf32>
    %cst_33 = arith.constant dense<0.000000e+00> : vector<4x32xf32>
    %71 = tpu.matmul %69, %70, %cst_33 {dimension_numbers = #tpu.dot_dimension_numbers<[1], [0], [0], [1], [0, 0, 1, 1], [], []>} : vector<4x32xf32>, vector<32x32xf32>, vector<4x32xf32> -> vector<4x32xf32>
    %72 = vector.broadcast %4 : vector<1x32xf32> to vector<4x32xf32>
    %73 = arith.addf %71, %72 : vector<4x32xf32>
    %cst_34 = arith.constant dense<0xFF800000> : vector<4xf32>
    %74 = vector.multi_reduction <maximumf>, %73, %cst_34 [1] : vector<4x32xf32> to vector<4xf32>
    %75 = vector.shape_cast %74 : vector<4xf32> to vector<4x1xf32>
    %76 = vector.broadcast %75 : vector<4x1xf32> to vector<4x32xf32>
    %77 = arith.subf %73, %76 : vector<4x32xf32>
    %78 = math.exp %77 : vector<4x32xf32>
    %cst_35 = arith.constant dense<0.000000e+00> : vector<4xf32>
    %79 = vector.multi_reduction <add>, %78, %cst_35 [1] : vector<4x32xf32> to vector<4xf32>
    %80 = vector.shape_cast %79 : vector<4xf32> to vector<4x1xf32>
    %81 = math.log %80 : vector<4x1xf32>
    %82 = arith.addf %81, %75 : vector<4x1xf32>
    %83 = vector.broadcast %82 : vector<4x1xf32> to vector<4x32xf32>
    %84 = arith.subf %73, %83 : vector<4x32xf32>
    %85 = arith.index_cast %c0_i32 : i32 to index
    %c0_36 = arith.constant 0 : index
    %c0_37 = arith.constant 0 : index
    %86 = vector.load %arg11[%85, %c0_36, %c0_37] : memref<6x4x32xf32, #tpu.memory_space<vmem>>, vector<1x4x32xf32>
    %87 = vector.shape_cast %86 : vector<1x4x32xf32> to vector<4x32xf32>
    %88 = vector.shape_cast %84 : vector<4x32xf32> to vector<1x4x32xf32>
    tpu.vector_store %arg11[%85, %c0_36, %c0_37], %88 {strides = array<i32>} : memref<6x4x32xf32, #tpu.memory_space<vmem>>, vector<1x4x32xf32>,
    %89 = vector.broadcast %75 : vector<4x1xf32> to vector<4x32xf32>
    %90 = arith.cmpf oeq, %73, %89 : vector<4x32xf32>
    %c32_i32 = arith.constant 32 : i32
    %91 = vector.broadcast %c32_i32 : i32 to vector<4x32xi32>
    %92 = arith.select %90, %5, %91 : vector<4x32xi1>, vector<4x32xi32>
    %cst_38 = arith.constant dense<2147483647> : vector<4xi32>
    %93 = vector.multi_reduction <minsi>, %92, %cst_38 [1] : vector<4x32xi32> to vector<4xi32>
    %94 = vector.shape_cast %93 : vector<4xi32> to vector<4x1xi32>
    %95 = vector.broadcast %94 : vector<4x1xi32> to vector<4x32xi32>
    %96 = arith.cmpi eq, %5, %95 : vector<4x32xi32>
    %97 = arith.extui %96 : vector<4x32xi1> to vector<4x32xi32>
    %98 = arith.sitofp %97 : vector<4x32xi32> to vector<4x32xf32>
    %c1_i32 = arith.constant 1 : i32
    %c0_39 = arith.constant 0 : index
    %c0_40 = arith.constant 0 : index
    %99 = vector.load %arg2[%c0_39, %c0_40] : memref<32x384xf32, #tpu.memory_space<vmem>>, vector<32x384xf32>
    %cst_41 = arith.constant dense<0.000000e+00> : vector<4x384xf32>
    %100 = tpu.matmul %98, %99, %cst_41 {dimension_numbers = #tpu.dot_dimension_numbers<[1], [0], [0], [1], [0, 0, 1, 1], [], []>} : vector<4x32xf32>, vector<32x384xf32>, vector<4x384xf32> -> vector<4x384xf32>
    %101 = vector.broadcast %1 : vector<1x384xf32> to vector<4x384xf32>
    %102 = arith.addf %100, %101 : vector<4x384xf32>
    %c0_42 = arith.constant 0 : index
    %c0_43 = arith.constant 0 : index
    %103 = vector.load %arg3[%c0_42, %c0_43] : memref<32x384xf32, #tpu.memory_space<vmem>>, vector<32x384xf32>
    %cst_44 = arith.constant dense<0.000000e+00> : vector<4x384xf32>
    %104 = tpu.matmul %43, %103, %cst_44 {dimension_numbers = #tpu.dot_dimension_numbers<[1], [0], [0], [1], [0, 0, 1, 1], [], []>} : vector<4x32xf32>, vector<32x384xf32>, vector<4x384xf32> -> vector<4x384xf32>
    %105 = vector.broadcast %2 : vector<1x384xf32> to vector<4x384xf32>
    %106 = arith.addf %104, %105 : vector<4x384xf32>
    %107 = vector.extract_strided_slice %102 {offsets = [0, 0], sizes = [4, 128], strides = [1, 1]} : vector<4x384xf32> to vector<4x128xf32>
    %108 = vector.extract_strided_slice %106 {offsets = [0, 0], sizes = [4, 128], strides = [1, 1]} : vector<4x384xf32> to vector<4x128xf32>
    %109 = arith.addf %107, %108 : vector<4x128xf32>
    %110 = arith.negf %109 : vector<4x128xf32>
    %111 = math.exp %110 : vector<4x128xf32>
    %cst_45 = arith.constant 1.000000e+00 : f32
    %112 = vector.broadcast %cst_45 : f32 to vector<4x128xf32>
    %113 = arith.addf %112, %111 : vector<4x128xf32>
    %114 = arith.divf %112, %113 : vector<4x128xf32>
    %115 = vector.extract_strided_slice %102 {offsets = [0, 128], sizes = [4, 128], strides = [1, 1]} : vector<4x384xf32> to vector<4x128xf32>
    %116 = vector.extract_strided_slice %106 {offsets = [0, 128], sizes = [4, 128], strides = [1, 1]} : vector<4x384xf32> to vector<4x128xf32>
    %117 = arith.addf %115, %116 : vector<4x128xf32>
    %118 = arith.negf %117 : vector<4x128xf32>
    %119 = math.exp %118 : vector<4x128xf32>
    %cst_46 = arith.constant 1.000000e+00 : f32
    %120 = vector.broadcast %cst_46 : f32 to vector<4x128xf32>
    %121 = arith.addf %120, %119 : vector<4x128xf32>
    %122 = arith.divf %120, %121 : vector<4x128xf32>
    %123 = vector.extract_strided_slice %122 {offsets = [0, 0], sizes = [4, 32], strides = [1, 1]} : vector<4x128xf32> to vector<4x32xf32>
    %124 = vector.extract_strided_slice %102 {offsets = [0, 256], sizes = [4, 128], strides = [1, 1]} : vector<4x384xf32> to vector<4x128xf32>
    %125 = vector.extract_strided_slice %106 {offsets = [0, 256], sizes = [4, 128], strides = [1, 1]} : vector<4x384xf32> to vector<4x128xf32>
    %126 = arith.mulf %114, %125 : vector<4x128xf32>
    %127 = arith.addf %124, %126 : vector<4x128xf32>
    %128 = math.tanh %127 : vector<4x128xf32>
    %129 = vector.extract_strided_slice %128 {offsets = [0, 0], sizes = [4, 32], strides = [1, 1]} : vector<4x128xf32> to vector<4x32xf32>
    %cst_47 = arith.constant 1.000000e+00 : f32
    %130 = vector.broadcast %cst_47 : f32 to vector<4x32xf32>
    %131 = arith.subf %130, %123 : vector<4x32xf32>
    %132 = arith.mulf %131, %129 : vector<4x32xf32>
    %133 = arith.mulf %123, %43 : vector<4x32xf32>
    %134 = arith.addf %132, %133 : vector<4x32xf32>
    %135 = vector.shape_cast %134 : vector<4x32xf32> to vector<4x1x32xf32>
    %136 = vector.broadcast %135 : vector<4x1x32xf32> to vector<4x8x32xf32>
    %137 = arith.mulf %136, %0 : vector<4x8x32xf32>
    %cst_48 = arith.constant dense<0.000000e+00> : vector<4x8xf32>
    %138 = vector.multi_reduction <add>, %137, %cst_48 [2] : vector<4x8x32xf32> to vector<4x8xf32>
    %cst_49 = arith.constant dense<0xFF800000> : vector<4xf32>
    %139 = vector.multi_reduction <maximumf>, %138, %cst_49 [1] : vector<4x8xf32> to vector<4xf32>
    %140 = vector.shape_cast %139 : vector<4xf32> to vector<4x1xf32>
    %141 = vector.broadcast %140 : vector<4x1xf32> to vector<4x8xf32>
    %142 = arith.subf %138, %141 : vector<4x8xf32>
    %143 = math.exp %142 : vector<4x8xf32>
    %cst_50 = arith.constant dense<0.000000e+00> : vector<4xf32>
    %144 = vector.multi_reduction <add>, %143, %cst_50 [1] : vector<4x8xf32> to vector<4xf32>
    %145 = vector.shape_cast %144 : vector<4xf32> to vector<4x1xf32>
    %146 = tpu.reciprocal %145 {approx = true} : vector<4x1xf32> -> vector<4x1xf32>
    %147 = vector.broadcast %146 : vector<4x1xf32> to vector<4x8xf32>
    %148 = arith.mulf %143, %147 : vector<4x8xf32>
    %149 = vector.shape_cast %148 : vector<4x8xf32> to vector<4x8x1xf32>
    %150 = vector.broadcast %149 : vector<4x8x1xf32> to vector<4x8x32xf32>
    %151 = arith.mulf %150, %0 : vector<4x8x32xf32>
    %cst_51 = arith.constant dense<0.000000e+00> : vector<4x32xf32>
    %152 = vector.multi_reduction <add>, %151, %cst_51 [1] : vector<4x8x32xf32> to vector<4x32xf32>
    %c0_52 = arith.constant 0 : index
    %c0_53 = arith.constant 0 : index
    %153 = vector.load %arg6[%c0_52, %c0_53] : memref<32x32xf32, #tpu.memory_space<vmem>>, vector<32x32xf32>
    %cst_54 = arith.constant dense<0.000000e+00> : vector<4x32xf32>
    %154 = tpu.matmul %152, %153, %cst_54 {dimension_numbers = #tpu.dot_dimension_numbers<[1], [0], [0], [1], [0, 0, 1, 1], [], []>} : vector<4x32xf32>, vector<32x32xf32>, vector<4x32xf32> -> vector<4x32xf32>
    %c0_55 = arith.constant 0 : index
    %c0_56 = arith.constant 0 : index
    %155 = vector.load %arg7[%c0_55, %c0_56] : memref<32x32xf32, #tpu.memory_space<vmem>>, vector<32x32xf32>
    %cst_57 = arith.constant dense<0.000000e+00> : vector<4x32xf32>
    %156 = tpu.matmul %134, %155, %cst_57 {dimension_numbers = #tpu.dot_dimension_numbers<[1], [0], [0], [1], [0, 0, 1, 1], [], []>} : vector<4x32xf32>, vector<32x32xf32>, vector<4x32xf32> -> vector<4x32xf32>
    %157 = arith.addf %154, %156 : vector<4x32xf32>
    %158 = vector.broadcast %3 : vector<1x32xf32> to vector<4x32xf32>
    %159 = arith.addf %157, %158 : vector<4x32xf32>
    %160 = math.tanh %159 : vector<4x32xf32>
    %c0_58 = arith.constant 0 : index
    %c0_59 = arith.constant 0 : index
    %161 = vector.load %arg9[%c0_58, %c0_59] : memref<32x32xf32, #tpu.memory_space<vmem>>, vector<32x32xf32>
    %cst_60 = arith.constant dense<0.000000e+00> : vector<4x32xf32>
    %162 = tpu.matmul %160, %161, %cst_60 {dimension_numbers = #tpu.dot_dimension_numbers<[1], [0], [0], [1], [0, 0, 1, 1], [], []>} : vector<4x32xf32>, vector<32x32xf32>, vector<4x32xf32> -> vector<4x32xf32>
    %163 = vector.broadcast %4 : vector<1x32xf32> to vector<4x32xf32>
    %164 = arith.addf %162, %163 : vector<4x32xf32>
    %cst_61 = arith.constant dense<0xFF800000> : vector<4xf32>
    %165 = vector.multi_reduction <maximumf>, %164, %cst_61 [1] : vector<4x32xf32> to vector<4xf32>
    %166 = vector.shape_cast %165 : vector<4xf32> to vector<4x1xf32>
    %167 = vector.broadcast %166 : vector<4x1xf32> to vector<4x32xf32>
    %168 = arith.subf %164, %167 : vector<4x32xf32>
    %169 = math.exp %168 : vector<4x32xf32>
    %cst_62 = arith.constant dense<0.000000e+00> : vector<4xf32>
    %170 = vector.multi_reduction <add>, %169, %cst_62 [1] : vector<4x32xf32> to vector<4xf32>
    %171 = vector.shape_cast %170 : vector<4xf32> to vector<4x1xf32>
    %172 = math.log %171 : vector<4x1xf32>
    %173 = arith.addf %172, %166 : vector<4x1xf32>
    %174 = vector.broadcast %173 : vector<4x1xf32> to vector<4x32xf32>
    %175 = arith.subf %164, %174 : vector<4x32xf32>
    %176 = arith.index_cast %c1_i32 : i32 to index
    %c0_63 = arith.constant 0 : index
    %c0_64 = arith.constant 0 : index
    %177 = vector.load %arg11[%176, %c0_63, %c0_64] : memref<6x4x32xf32, #tpu.memory_space<vmem>>, vector<1x4x32xf32>
    %178 = vector.shape_cast %177 : vector<1x4x32xf32> to vector<4x32xf32>
    %179 = vector.shape_cast %175 : vector<4x32xf32> to vector<1x4x32xf32>
    tpu.vector_store %arg11[%176, %c0_63, %c0_64], %179 {strides = array<i32>} : memref<6x4x32xf32, #tpu.memory_space<vmem>>, vector<1x4x32xf32>,
    %180 = vector.broadcast %166 : vector<4x1xf32> to vector<4x32xf32>
    %181 = arith.cmpf oeq, %164, %180 : vector<4x32xf32>
    %c32_i32_65 = arith.constant 32 : i32
    %182 = vector.broadcast %c32_i32_65 : i32 to vector<4x32xi32>
    %183 = arith.select %181, %5, %182 : vector<4x32xi1>, vector<4x32xi32>
    %cst_66 = arith.constant dense<2147483647> : vector<4xi32>
    %184 = vector.multi_reduction <minsi>, %183, %cst_66 [1] : vector<4x32xi32> to vector<4xi32>
    %185 = vector.shape_cast %184 : vector<4xi32> to vector<4x1xi32>
    %186 = vector.broadcast %185 : vector<4x1xi32> to vector<4x32xi32>
    %187 = arith.cmpi eq, %5, %186 : vector<4x32xi32>
    %188 = arith.extui %187 : vector<4x32xi1> to vector<4x32xi32>
    %189 = arith.sitofp %188 : vector<4x32xi32> to vector<4x32xf32>
    %c2_i32 = arith.constant 2 : i32
    %c0_67 = arith.constant 0 : index
    %c0_68 = arith.constant 0 : index
    %190 = vector.load %arg2[%c0_67, %c0_68] : memref<32x384xf32, #tpu.memory_space<vmem>>, vector<32x384xf32>
    %cst_69 = arith.constant dense<0.000000e+00> : vector<4x384xf32>
    %191 = tpu.matmul %189, %190, %cst_69 {dimension_numbers = #tpu.dot_dimension_numbers<[1], [0], [0], [1], [0, 0, 1, 1], [], []>} : vector<4x32xf32>, vector<32x384xf32>, vector<4x384xf32> -> vector<4x384xf32>
    %192 = vector.broadcast %1 : vector<1x384xf32> to vector<4x384xf32>
    %193 = arith.addf %191, %192 : vector<4x384xf32>
    %c0_70 = arith.constant 0 : index
    %c0_71 = arith.constant 0 : index
    %194 = vector.load %arg3[%c0_70, %c0_71] : memref<32x384xf32, #tpu.memory_space<vmem>>, vector<32x384xf32>
    %cst_72 = arith.constant dense<0.000000e+00> : vector<4x384xf32>
    %195 = tpu.matmul %134, %194, %cst_72 {dimension_numbers = #tpu.dot_dimension_numbers<[1], [0], [0], [1], [0, 0, 1, 1], [], []>} : vector<4x32xf32>, vector<32x384xf32>, vector<4x384xf32> -> vector<4x384xf32>
    %196 = vector.broadcast %2 : vector<1x384xf32> to vector<4x384xf32>
    %197 = arith.addf %195, %196 : vector<4x384xf32>
    %198 = vector.extract_strided_slice %193 {offsets = [0, 0], sizes = [4, 128], strides = [1, 1]} : vector<4x384xf32> to vector<4x128xf32>
    %199 = vector.extract_strided_slice %197 {offsets = [0, 0], sizes = [4, 128], strides = [1, 1]} : vector<4x384xf32> to vector<4x128xf32>
    %200 = arith.addf %198, %199 : vector<4x128xf32>
    %201 = arith.negf %200 : vector<4x128xf32>
    %202 = math.exp %201 : vector<4x128xf32>
    %cst_73 = arith.constant 1.000000e+00 : f32
    %203 = vector.broadcast %cst_73 : f32 to vector<4x128xf32>
    %204 = arith.addf %203, %202 : vector<4x128xf32>
    %205 = arith.divf %203, %204 : vector<4x128xf32>
    %206 = vector.extract_strided_slice %193 {offsets = [0, 128], sizes = [4, 128], strides = [1, 1]} : vector<4x384xf32> to vector<4x128xf32>
    %207 = vector.extract_strided_slice %197 {offsets = [0, 128], sizes = [4, 128], strides = [1, 1]} : vector<4x384xf32> to vector<4x128xf32>
    %208 = arith.addf %206, %207 : vector<4x128xf32>
    %209 = arith.negf %208 : vector<4x128xf32>
    %210 = math.exp %209 : vector<4x128xf32>
    %cst_74 = arith.constant 1.000000e+00 : f32
    %211 = vector.broadcast %cst_74 : f32 to vector<4x128xf32>
    %212 = arith.addf %211, %210 : vector<4x128xf32>
    %213 = arith.divf %211, %212 : vector<4x128xf32>
    %214 = vector.extract_strided_slice %213 {offsets = [0, 0], sizes = [4, 32], strides = [1, 1]} : vector<4x128xf32> to vector<4x32xf32>
    %215 = vector.extract_strided_slice %193 {offsets = [0, 256], sizes = [4, 128], strides = [1, 1]} : vector<4x384xf32> to vector<4x128xf32>
    %216 = vector.extract_strided_slice %197 {offsets = [0, 256], sizes = [4, 128], strides = [1, 1]} : vector<4x384xf32> to vector<4x128xf32>
    %217 = arith.mulf %205, %216 : vector<4x128xf32>
    %218 = arith.addf %215, %217 : vector<4x128xf32>
    %219 = math.tanh %218 : vector<4x128xf32>
    %220 = vector.extract_strided_slice %219 {offsets = [0, 0], sizes = [4, 32], strides = [1, 1]} : vector<4x128xf32> to vector<4x32xf32>
    %cst_75 = arith.constant 1.000000e+00 : f32
    %221 = vector.broadcast %cst_75 : f32 to vector<4x32xf32>
    %222 = arith.subf %221, %214 : vector<4x32xf32>
    %223 = arith.mulf %222, %220 : vector<4x32xf32>
    %224 = arith.mulf %214, %134 : vector<4x32xf32>
    %225 = arith.addf %223, %224 : vector<4x32xf32>
    %226 = vector.shape_cast %225 : vector<4x32xf32> to vector<4x1x32xf32>
    %227 = vector.broadcast %226 : vector<4x1x32xf32> to vector<4x8x32xf32>
    %228 = arith.mulf %227, %0 : vector<4x8x32xf32>
    %cst_76 = arith.constant dense<0.000000e+00> : vector<4x8xf32>
    %229 = vector.multi_reduction <add>, %228, %cst_76 [2] : vector<4x8x32xf32> to vector<4x8xf32>
    %cst_77 = arith.constant dense<0xFF800000> : vector<4xf32>
    %230 = vector.multi_reduction <maximumf>, %229, %cst_77 [1] : vector<4x8xf32> to vector<4xf32>
    %231 = vector.shape_cast %230 : vector<4xf32> to vector<4x1xf32>
    %232 = vector.broadcast %231 : vector<4x1xf32> to vector<4x8xf32>
    %233 = arith.subf %229, %232 : vector<4x8xf32>
    %234 = math.exp %233 : vector<4x8xf32>
    %cst_78 = arith.constant dense<0.000000e+00> : vector<4xf32>
    %235 = vector.multi_reduction <add>, %234, %cst_78 [1] : vector<4x8xf32> to vector<4xf32>
    %236 = vector.shape_cast %235 : vector<4xf32> to vector<4x1xf32>
    %237 = tpu.reciprocal %236 {approx = true} : vector<4x1xf32> -> vector<4x1xf32>
    %238 = vector.broadcast %237 : vector<4x1xf32> to vector<4x8xf32>
    %239 = arith.mulf %234, %238 : vector<4x8xf32>
    %240 = vector.shape_cast %239 : vector<4x8xf32> to vector<4x8x1xf32>
    %241 = vector.broadcast %240 : vector<4x8x1xf32> to vector<4x8x32xf32>
    %242 = arith.mulf %241, %0 : vector<4x8x32xf32>
    %cst_79 = arith.constant dense<0.000000e+00> : vector<4x32xf32>
    %243 = vector.multi_reduction <add>, %242, %cst_79 [1] : vector<4x8x32xf32> to vector<4x32xf32>
    %c0_80 = arith.constant 0 : index
    %c0_81 = arith.constant 0 : index
    %244 = vector.load %arg6[%c0_80, %c0_81] : memref<32x32xf32, #tpu.memory_space<vmem>>, vector<32x32xf32>
    %cst_82 = arith.constant dense<0.000000e+00> : vector<4x32xf32>
    %245 = tpu.matmul %243, %244, %cst_82 {dimension_numbers = #tpu.dot_dimension_numbers<[1], [0], [0], [1], [0, 0, 1, 1], [], []>} : vector<4x32xf32>, vector<32x32xf32>, vector<4x32xf32> -> vector<4x32xf32>
    %c0_83 = arith.constant 0 : index
    %c0_84 = arith.constant 0 : index
    %246 = vector.load %arg7[%c0_83, %c0_84] : memref<32x32xf32, #tpu.memory_space<vmem>>, vector<32x32xf32>
    %cst_85 = arith.constant dense<0.000000e+00> : vector<4x32xf32>
    %247 = tpu.matmul %225, %246, %cst_85 {dimension_numbers = #tpu.dot_dimension_numbers<[1], [0], [0], [1], [0, 0, 1, 1], [], []>} : vector<4x32xf32>, vector<32x32xf32>, vector<4x32xf32> -> vector<4x32xf32>
    %248 = arith.addf %245, %247 : vector<4x32xf32>
    %249 = vector.broadcast %3 : vector<1x32xf32> to vector<4x32xf32>
    %250 = arith.addf %248, %249 : vector<4x32xf32>
    %251 = math.tanh %250 : vector<4x32xf32>
    %c0_86 = arith.constant 0 : index
    %c0_87 = arith.constant 0 : index
    %252 = vector.load %arg9[%c0_86, %c0_87] : memref<32x32xf32, #tpu.memory_space<vmem>>, vector<32x32xf32>
    %cst_88 = arith.constant dense<0.000000e+00> : vector<4x32xf32>
    %253 = tpu.matmul %251, %252, %cst_88 {dimension_numbers = #tpu.dot_dimension_numbers<[1], [0], [0], [1], [0, 0, 1, 1], [], []>} : vector<4x32xf32>, vector<32x32xf32>, vector<4x32xf32> -> vector<4x32xf32>
    %254 = vector.broadcast %4 : vector<1x32xf32> to vector<4x32xf32>
    %255 = arith.addf %253, %254 : vector<4x32xf32>
    %cst_89 = arith.constant dense<0xFF800000> : vector<4xf32>
    %256 = vector.multi_reduction <maximumf>, %255, %cst_89 [1] : vector<4x32xf32> to vector<4xf32>
    %257 = vector.shape_cast %256 : vector<4xf32> to vector<4x1xf32>
    %258 = vector.broadcast %257 : vector<4x1xf32> to vector<4x32xf32>
    %259 = arith.subf %255, %258 : vector<4x32xf32>
    %260 = math.exp %259 : vector<4x32xf32>
    %cst_90 = arith.constant dense<0.000000e+00> : vector<4xf32>
    %261 = vector.multi_reduction <add>, %260, %cst_90 [1] : vector<4x32xf32> to vector<4xf32>
    %262 = vector.shape_cast %261 : vector<4xf32> to vector<4x1xf32>
    %263 = math.log %262 : vector<4x1xf32>
    %264 = arith.addf %263, %257 : vector<4x1xf32>
    %265 = vector.broadcast %264 : vector<4x1xf32> to vector<4x32xf32>
    %266 = arith.subf %255, %265 : vector<4x32xf32>
    %267 = arith.index_cast %c2_i32 : i32 to index
    %c0_91 = arith.constant 0 : index
    %c0_92 = arith.constant 0 : index
    %268 = vector.load %arg11[%267, %c0_91, %c0_92] : memref<6x4x32xf32, #tpu.memory_space<vmem>>, vector<1x4x32xf32>
    %269 = vector.shape_cast %268 : vector<1x4x32xf32> to vector<4x32xf32>
    %270 = vector.shape_cast %266 : vector<4x32xf32> to vector<1x4x32xf32>
    tpu.vector_store %arg11[%267, %c0_91, %c0_92], %270 {strides = array<i32>} : memref<6x4x32xf32, #tpu.memory_space<vmem>>, vector<1x4x32xf32>,
    %271 = vector.broadcast %257 : vector<4x1xf32> to vector<4x32xf32>
    %272 = arith.cmpf oeq, %255, %271 : vector<4x32xf32>
    %c32_i32_93 = arith.constant 32 : i32
    %273 = vector.broadcast %c32_i32_93 : i32 to vector<4x32xi32>
    %274 = arith.select %272, %5, %273 : vector<4x32xi1>, vector<4x32xi32>
    %cst_94 = arith.constant dense<2147483647> : vector<4xi32>
    %275 = vector.multi_reduction <minsi>, %274, %cst_94 [1] : vector<4x32xi32> to vector<4xi32>
    %276 = vector.shape_cast %275 : vector<4xi32> to vector<4x1xi32>
    %277 = vector.broadcast %276 : vector<4x1xi32> to vector<4x32xi32>
    %278 = arith.cmpi eq, %5, %277 : vector<4x32xi32>
    %279 = arith.extui %278 : vector<4x32xi1> to vector<4x32xi32>
    %280 = arith.sitofp %279 : vector<4x32xi32> to vector<4x32xf32>
    %c3_i32 = arith.constant 3 : i32
    %c0_95 = arith.constant 0 : index
    %c0_96 = arith.constant 0 : index
    %281 = vector.load %arg2[%c0_95, %c0_96] : memref<32x384xf32, #tpu.memory_space<vmem>>, vector<32x384xf32>
    %cst_97 = arith.constant dense<0.000000e+00> : vector<4x384xf32>
    %282 = tpu.matmul %280, %281, %cst_97 {dimension_numbers = #tpu.dot_dimension_numbers<[1], [0], [0], [1], [0, 0, 1, 1], [], []>} : vector<4x32xf32>, vector<32x384xf32>, vector<4x384xf32> -> vector<4x384xf32>
    %283 = vector.broadcast %1 : vector<1x384xf32> to vector<4x384xf32>
    %284 = arith.addf %282, %283 : vector<4x384xf32>
    %c0_98 = arith.constant 0 : index
    %c0_99 = arith.constant 0 : index
    %285 = vector.load %arg3[%c0_98, %c0_99] : memref<32x384xf32, #tpu.memory_space<vmem>>, vector<32x384xf32>
    %cst_100 = arith.constant dense<0.000000e+00> : vector<4x384xf32>
    %286 = tpu.matmul %225, %285, %cst_100 {dimension_numbers = #tpu.dot_dimension_numbers<[1], [0], [0], [1], [0, 0, 1, 1], [], []>} : vector<4x32xf32>, vector<32x384xf32>, vector<4x384xf32> -> vector<4x384xf32>
    %287 = vector.broadcast %2 : vector<1x384xf32> to vector<4x384xf32>
    %288 = arith.addf %286, %287 : vector<4x384xf32>
    %289 = vector.extract_strided_slice %284 {offsets = [0, 0], sizes = [4, 128], strides = [1, 1]} : vector<4x384xf32> to vector<4x128xf32>
    %290 = vector.extract_strided_slice %288 {offsets = [0, 0], sizes = [4, 128], strides = [1, 1]} : vector<4x384xf32> to vector<4x128xf32>
    %291 = arith.addf %289, %290 : vector<4x128xf32>
    %292 = arith.negf %291 : vector<4x128xf32>
    %293 = math.exp %292 : vector<4x128xf32>
    %cst_101 = arith.constant 1.000000e+00 : f32
    %294 = vector.broadcast %cst_101 : f32 to vector<4x128xf32>
    %295 = arith.addf %294, %293 : vector<4x128xf32>
    %296 = arith.divf %294, %295 : vector<4x128xf32>
    %297 = vector.extract_strided_slice %284 {offsets = [0, 128], sizes = [4, 128], strides = [1, 1]} : vector<4x384xf32> to vector<4x128xf32>
    %298 = vector.extract_strided_slice %288 {offsets = [0, 128], sizes = [4, 128], strides = [1, 1]} : vector<4x384xf32> to vector<4x128xf32>
    %299 = arith.addf %297, %298 : vector<4x128xf32>
    %300 = arith.negf %299 : vector<4x128xf32>
    %301 = math.exp %300 : vector<4x128xf32>
    %cst_102 = arith.constant 1.000000e+00 : f32
    %302 = vector.broadcast %cst_102 : f32 to vector<4x128xf32>
    %303 = arith.addf %302, %301 : vector<4x128xf32>
    %304 = arith.divf %302, %303 : vector<4x128xf32>
    %305 = vector.extract_strided_slice %304 {offsets = [0, 0], sizes = [4, 32], strides = [1, 1]} : vector<4x128xf32> to vector<4x32xf32>
    %306 = vector.extract_strided_slice %284 {offsets = [0, 256], sizes = [4, 128], strides = [1, 1]} : vector<4x384xf32> to vector<4x128xf32>
    %307 = vector.extract_strided_slice %288 {offsets = [0, 256], sizes = [4, 128], strides = [1, 1]} : vector<4x384xf32> to vector<4x128xf32>
    %308 = arith.mulf %296, %307 : vector<4x128xf32>
    %309 = arith.addf %306, %308 : vector<4x128xf32>
    %310 = math.tanh %309 : vector<4x128xf32>
    %311 = vector.extract_strided_slice %310 {offsets = [0, 0], sizes = [4, 32], strides = [1, 1]} : vector<4x128xf32> to vector<4x32xf32>
    %cst_103 = arith.constant 1.000000e+00 : f32
    %312 = vector.broadcast %cst_103 : f32 to vector<4x32xf32>
    %313 = arith.subf %312, %305 : vector<4x32xf32>
    %314 = arith.mulf %313, %311 : vector<4x32xf32>
    %315 = arith.mulf %305, %225 : vector<4x32xf32>
    %316 = arith.addf %314, %315 : vector<4x32xf32>
    %317 = vector.shape_cast %316 : vector<4x32xf32> to vector<4x1x32xf32>
    %318 = vector.broadcast %317 : vector<4x1x32xf32> to vector<4x8x32xf32>
    %319 = arith.mulf %318, %0 : vector<4x8x32xf32>
    %cst_104 = arith.constant dense<0.000000e+00> : vector<4x8xf32>
    %320 = vector.multi_reduction <add>, %319, %cst_104 [2] : vector<4x8x32xf32> to vector<4x8xf32>
    %cst_105 = arith.constant dense<0xFF800000> : vector<4xf32>
    %321 = vector.multi_reduction <maximumf>, %320, %cst_105 [1] : vector<4x8xf32> to vector<4xf32>
    %322 = vector.shape_cast %321 : vector<4xf32> to vector<4x1xf32>
    %323 = vector.broadcast %322 : vector<4x1xf32> to vector<4x8xf32>
    %324 = arith.subf %320, %323 : vector<4x8xf32>
    %325 = math.exp %324 : vector<4x8xf32>
    %cst_106 = arith.constant dense<0.000000e+00> : vector<4xf32>
    %326 = vector.multi_reduction <add>, %325, %cst_106 [1] : vector<4x8xf32> to vector<4xf32>
    %327 = vector.shape_cast %326 : vector<4xf32> to vector<4x1xf32>
    %328 = tpu.reciprocal %327 {approx = true} : vector<4x1xf32> -> vector<4x1xf32>
    %329 = vector.broadcast %328 : vector<4x1xf32> to vector<4x8xf32>
    %330 = arith.mulf %325, %329 : vector<4x8xf32>
    %331 = vector.shape_cast %330 : vector<4x8xf32> to vector<4x8x1xf32>
    %332 = vector.broadcast %331 : vector<4x8x1xf32> to vector<4x8x32xf32>
    %333 = arith.mulf %332, %0 : vector<4x8x32xf32>
    %cst_107 = arith.constant dense<0.000000e+00> : vector<4x32xf32>
    %334 = vector.multi_reduction <add>, %333, %cst_107 [1] : vector<4x8x32xf32> to vector<4x32xf32>
    %c0_108 = arith.constant 0 : index
    %c0_109 = arith.constant 0 : index
    %335 = vector.load %arg6[%c0_108, %c0_109] : memref<32x32xf32, #tpu.memory_space<vmem>>, vector<32x32xf32>
    %cst_110 = arith.constant dense<0.000000e+00> : vector<4x32xf32>
    %336 = tpu.matmul %334, %335, %cst_110 {dimension_numbers = #tpu.dot_dimension_numbers<[1], [0], [0], [1], [0, 0, 1, 1], [], []>} : vector<4x32xf32>, vector<32x32xf32>, vector<4x32xf32> -> vector<4x32xf32>
    %c0_111 = arith.constant 0 : index
    %c0_112 = arith.constant 0 : index
    %337 = vector.load %arg7[%c0_111, %c0_112] : memref<32x32xf32, #tpu.memory_space<vmem>>, vector<32x32xf32>
    %cst_113 = arith.constant dense<0.000000e+00> : vector<4x32xf32>
    %338 = tpu.matmul %316, %337, %cst_113 {dimension_numbers = #tpu.dot_dimension_numbers<[1], [0], [0], [1], [0, 0, 1, 1], [], []>} : vector<4x32xf32>, vector<32x32xf32>, vector<4x32xf32> -> vector<4x32xf32>
    %339 = arith.addf %336, %338 : vector<4x32xf32>
    %340 = vector.broadcast %3 : vector<1x32xf32> to vector<4x32xf32>
    %341 = arith.addf %339, %340 : vector<4x32xf32>
    %342 = math.tanh %341 : vector<4x32xf32>
    %c0_114 = arith.constant 0 : index
    %c0_115 = arith.constant 0 : index
    %343 = vector.load %arg9[%c0_114, %c0_115] : memref<32x32xf32, #tpu.memory_space<vmem>>, vector<32x32xf32>
    %cst_116 = arith.constant dense<0.000000e+00> : vector<4x32xf32>
    %344 = tpu.matmul %342, %343, %cst_116 {dimension_numbers = #tpu.dot_dimension_numbers<[1], [0], [0], [1], [0, 0, 1, 1], [], []>} : vector<4x32xf32>, vector<32x32xf32>, vector<4x32xf32> -> vector<4x32xf32>
    %345 = vector.broadcast %4 : vector<1x32xf32> to vector<4x32xf32>
    %346 = arith.addf %344, %345 : vector<4x32xf32>
    %cst_117 = arith.constant dense<0xFF800000> : vector<4xf32>
    %347 = vector.multi_reduction <maximumf>, %346, %cst_117 [1] : vector<4x32xf32> to vector<4xf32>
    %348 = vector.shape_cast %347 : vector<4xf32> to vector<4x1xf32>
    %349 = vector.broadcast %348 : vector<4x1xf32> to vector<4x32xf32>
    %350 = arith.subf %346, %349 : vector<4x32xf32>
    %351 = math.exp %350 : vector<4x32xf32>
    %cst_118 = arith.constant dense<0.000000e+00> : vector<4xf32>
    %352 = vector.multi_reduction <add>, %351, %cst_118 [1] : vector<4x32xf32> to vector<4xf32>
    %353 = vector.shape_cast %352 : vector<4xf32> to vector<4x1xf32>
    %354 = math.log %353 : vector<4x1xf32>
    %355 = arith.addf %354, %348 : vector<4x1xf32>
    %356 = vector.broadcast %355 : vector<4x1xf32> to vector<4x32xf32>
    %357 = arith.subf %346, %356 : vector<4x32xf32>
    %358 = arith.index_cast %c3_i32 : i32 to index
    %c0_119 = arith.constant 0 : index
    %c0_120 = arith.constant 0 : index
    %359 = vector.load %arg11[%358, %c0_119, %c0_120] : memref<6x4x32xf32, #tpu.memory_space<vmem>>, vector<1x4x32xf32>
    %360 = vector.shape_cast %359 : vector<1x4x32xf32> to vector<4x32xf32>
    %361 = vector.shape_cast %357 : vector<4x32xf32> to vector<1x4x32xf32>
    tpu.vector_store %arg11[%358, %c0_119, %c0_120], %361 {strides = array<i32>} : memref<6x4x32xf32, #tpu.memory_space<vmem>>, vector<1x4x32xf32>,
    %362 = vector.broadcast %348 : vector<4x1xf32> to vector<4x32xf32>
    %363 = arith.cmpf oeq, %346, %362 : vector<4x32xf32>
    %c32_i32_121 = arith.constant 32 : i32
    %364 = vector.broadcast %c32_i32_121 : i32 to vector<4x32xi32>
    %365 = arith.select %363, %5, %364 : vector<4x32xi1>, vector<4x32xi32>
    %cst_122 = arith.constant dense<2147483647> : vector<4xi32>
    %366 = vector.multi_reduction <minsi>, %365, %cst_122 [1] : vector<4x32xi32> to vector<4xi32>
    %367 = vector.shape_cast %366 : vector<4xi32> to vector<4x1xi32>
    %368 = vector.broadcast %367 : vector<4x1xi32> to vector<4x32xi32>
    %369 = arith.cmpi eq, %5, %368 : vector<4x32xi32>
    %370 = arith.extui %369 : vector<4x32xi1> to vector<4x32xi32>
    %371 = arith.sitofp %370 : vector<4x32xi32> to vector<4x32xf32>
    %c4_i32 = arith.constant 4 : i32
    %c0_123 = arith.constant 0 : index
    %c0_124 = arith.constant 0 : index
    %372 = vector.load %arg2[%c0_123, %c0_124] : memref<32x384xf32, #tpu.memory_space<vmem>>, vector<32x384xf32>
    %cst_125 = arith.constant dense<0.000000e+00> : vector<4x384xf32>
    %373 = tpu.matmul %371, %372, %cst_125 {dimension_numbers = #tpu.dot_dimension_numbers<[1], [0], [0], [1], [0, 0, 1, 1], [], []>} : vector<4x32xf32>, vector<32x384xf32>, vector<4x384xf32> -> vector<4x384xf32>
    %374 = vector.broadcast %1 : vector<1x384xf32> to vector<4x384xf32>
    %375 = arith.addf %373, %374 : vector<4x384xf32>
    %c0_126 = arith.constant 0 : index
    %c0_127 = arith.constant 0 : index
    %376 = vector.load %arg3[%c0_126, %c0_127] : memref<32x384xf32, #tpu.memory_space<vmem>>, vector<32x384xf32>
    %cst_128 = arith.constant dense<0.000000e+00> : vector<4x384xf32>
    %377 = tpu.matmul %316, %376, %cst_128 {dimension_numbers = #tpu.dot_dimension_numbers<[1], [0], [0], [1], [0, 0, 1, 1], [], []>} : vector<4x32xf32>, vector<32x384xf32>, vector<4x384xf32> -> vector<4x384xf32>
    %378 = vector.broadcast %2 : vector<1x384xf32> to vector<4x384xf32>
    %379 = arith.addf %377, %378 : vector<4x384xf32>
    %380 = vector.extract_strided_slice %375 {offsets = [0, 0], sizes = [4, 128], strides = [1, 1]} : vector<4x384xf32> to vector<4x128xf32>
    %381 = vector.extract_strided_slice %379 {offsets = [0, 0], sizes = [4, 128], strides = [1, 1]} : vector<4x384xf32> to vector<4x128xf32>
    %382 = arith.addf %380, %381 : vector<4x128xf32>
    %383 = arith.negf %382 : vector<4x128xf32>
    %384 = math.exp %383 : vector<4x128xf32>
    %cst_129 = arith.constant 1.000000e+00 : f32
    %385 = vector.broadcast %cst_129 : f32 to vector<4x128xf32>
    %386 = arith.addf %385, %384 : vector<4x128xf32>
    %387 = arith.divf %385, %386 : vector<4x128xf32>
    %388 = vector.extract_strided_slice %375 {offsets = [0, 128], sizes = [4, 128], strides = [1, 1]} : vector<4x384xf32> to vector<4x128xf32>
    %389 = vector.extract_strided_slice %379 {offsets = [0, 128], sizes = [4, 128], strides = [1, 1]} : vector<4x384xf32> to vector<4x128xf32>
    %390 = arith.addf %388, %389 : vector<4x128xf32>
    %391 = arith.negf %390 : vector<4x128xf32>
    %392 = math.exp %391 : vector<4x128xf32>
    %cst_130 = arith.constant 1.000000e+00 : f32
    %393 = vector.broadcast %cst_130 : f32 to vector<4x128xf32>
    %394 = arith.addf %393, %392 : vector<4x128xf32>
    %395 = arith.divf %393, %394 : vector<4x128xf32>
    %396 = vector.extract_strided_slice %395 {offsets = [0, 0], sizes = [4, 32], strides = [1, 1]} : vector<4x128xf32> to vector<4x32xf32>
    %397 = vector.extract_strided_slice %375 {offsets = [0, 256], sizes = [4, 128], strides = [1, 1]} : vector<4x384xf32> to vector<4x128xf32>
    %398 = vector.extract_strided_slice %379 {offsets = [0, 256], sizes = [4, 128], strides = [1, 1]} : vector<4x384xf32> to vector<4x128xf32>
    %399 = arith.mulf %387, %398 : vector<4x128xf32>
    %400 = arith.addf %397, %399 : vector<4x128xf32>
    %401 = math.tanh %400 : vector<4x128xf32>
    %402 = vector.extract_strided_slice %401 {offsets = [0, 0], sizes = [4, 32], strides = [1, 1]} : vector<4x128xf32> to vector<4x32xf32>
    %cst_131 = arith.constant 1.000000e+00 : f32
    %403 = vector.broadcast %cst_131 : f32 to vector<4x32xf32>
    %404 = arith.subf %403, %396 : vector<4x32xf32>
    %405 = arith.mulf %404, %402 : vector<4x32xf32>
    %406 = arith.mulf %396, %316 : vector<4x32xf32>
    %407 = arith.addf %405, %406 : vector<4x32xf32>
    %408 = vector.shape_cast %407 : vector<4x32xf32> to vector<4x1x32xf32>
    %409 = vector.broadcast %408 : vector<4x1x32xf32> to vector<4x8x32xf32>
    %410 = arith.mulf %409, %0 : vector<4x8x32xf32>
    %cst_132 = arith.constant dense<0.000000e+00> : vector<4x8xf32>
    %411 = vector.multi_reduction <add>, %410, %cst_132 [2] : vector<4x8x32xf32> to vector<4x8xf32>
    %cst_133 = arith.constant dense<0xFF800000> : vector<4xf32>
    %412 = vector.multi_reduction <maximumf>, %411, %cst_133 [1] : vector<4x8xf32> to vector<4xf32>
    %413 = vector.shape_cast %412 : vector<4xf32> to vector<4x1xf32>
    %414 = vector.broadcast %413 : vector<4x1xf32> to vector<4x8xf32>
    %415 = arith.subf %411, %414 : vector<4x8xf32>
    %416 = math.exp %415 : vector<4x8xf32>
    %cst_134 = arith.constant dense<0.000000e+00> : vector<4xf32>
    %417 = vector.multi_reduction <add>, %416, %cst_134 [1] : vector<4x8xf32> to vector<4xf32>
    %418 = vector.shape_cast %417 : vector<4xf32> to vector<4x1xf32>
    %419 = tpu.reciprocal %418 {approx = true} : vector<4x1xf32> -> vector<4x1xf32>
    %420 = vector.broadcast %419 : vector<4x1xf32> to vector<4x8xf32>
    %421 = arith.mulf %416, %420 : vector<4x8xf32>
    %422 = vector.shape_cast %421 : vector<4x8xf32> to vector<4x8x1xf32>
    %423 = vector.broadcast %422 : vector<4x8x1xf32> to vector<4x8x32xf32>
    %424 = arith.mulf %423, %0 : vector<4x8x32xf32>
    %cst_135 = arith.constant dense<0.000000e+00> : vector<4x32xf32>
    %425 = vector.multi_reduction <add>, %424, %cst_135 [1] : vector<4x8x32xf32> to vector<4x32xf32>
    %c0_136 = arith.constant 0 : index
    %c0_137 = arith.constant 0 : index
    %426 = vector.load %arg6[%c0_136, %c0_137] : memref<32x32xf32, #tpu.memory_space<vmem>>, vector<32x32xf32>
    %cst_138 = arith.constant dense<0.000000e+00> : vector<4x32xf32>
    %427 = tpu.matmul %425, %426, %cst_138 {dimension_numbers = #tpu.dot_dimension_numbers<[1], [0], [0], [1], [0, 0, 1, 1], [], []>} : vector<4x32xf32>, vector<32x32xf32>, vector<4x32xf32> -> vector<4x32xf32>
    %c0_139 = arith.constant 0 : index
    %c0_140 = arith.constant 0 : index
    %428 = vector.load %arg7[%c0_139, %c0_140] : memref<32x32xf32, #tpu.memory_space<vmem>>, vector<32x32xf32>
    %cst_141 = arith.constant dense<0.000000e+00> : vector<4x32xf32>
    %429 = tpu.matmul %407, %428, %cst_141 {dimension_numbers = #tpu.dot_dimension_numbers<[1], [0], [0], [1], [0, 0, 1, 1], [], []>} : vector<4x32xf32>, vector<32x32xf32>, vector<4x32xf32> -> vector<4x32xf32>
    %430 = arith.addf %427, %429 : vector<4x32xf32>
    %431 = vector.broadcast %3 : vector<1x32xf32> to vector<4x32xf32>
    %432 = arith.addf %430, %431 : vector<4x32xf32>
    %433 = math.tanh %432 : vector<4x32xf32>
    %c0_142 = arith.constant 0 : index
    %c0_143 = arith.constant 0 : index
    %434 = vector.load %arg9[%c0_142, %c0_143] : memref<32x32xf32, #tpu.memory_space<vmem>>, vector<32x32xf32>
    %cst_144 = arith.constant dense<0.000000e+00> : vector<4x32xf32>
    %435 = tpu.matmul %433, %434, %cst_144 {dimension_numbers = #tpu.dot_dimension_numbers<[1], [0], [0], [1], [0, 0, 1, 1], [], []>} : vector<4x32xf32>, vector<32x32xf32>, vector<4x32xf32> -> vector<4x32xf32>
    %436 = vector.broadcast %4 : vector<1x32xf32> to vector<4x32xf32>
    %437 = arith.addf %435, %436 : vector<4x32xf32>
    %cst_145 = arith.constant dense<0xFF800000> : vector<4xf32>
    %438 = vector.multi_reduction <maximumf>, %437, %cst_145 [1] : vector<4x32xf32> to vector<4xf32>
    %439 = vector.shape_cast %438 : vector<4xf32> to vector<4x1xf32>
    %440 = vector.broadcast %439 : vector<4x1xf32> to vector<4x32xf32>
    %441 = arith.subf %437, %440 : vector<4x32xf32>
    %442 = math.exp %441 : vector<4x32xf32>
    %cst_146 = arith.constant dense<0.000000e+00> : vector<4xf32>
    %443 = vector.multi_reduction <add>, %442, %cst_146 [1] : vector<4x32xf32> to vector<4xf32>
    %444 = vector.shape_cast %443 : vector<4xf32> to vector<4x1xf32>
    %445 = math.log %444 : vector<4x1xf32>
    %446 = arith.addf %445, %439 : vector<4x1xf32>
    %447 = vector.broadcast %446 : vector<4x1xf32> to vector<4x32xf32>
    %448 = arith.subf %437, %447 : vector<4x32xf32>
    %449 = arith.index_cast %c4_i32 : i32 to index
    %c0_147 = arith.constant 0 : index
    %c0_148 = arith.constant 0 : index
    %450 = vector.load %arg11[%449, %c0_147, %c0_148] : memref<6x4x32xf32, #tpu.memory_space<vmem>>, vector<1x4x32xf32>
    %451 = vector.shape_cast %450 : vector<1x4x32xf32> to vector<4x32xf32>
    %452 = vector.shape_cast %448 : vector<4x32xf32> to vector<1x4x32xf32>
    tpu.vector_store %arg11[%449, %c0_147, %c0_148], %452 {strides = array<i32>} : memref<6x4x32xf32, #tpu.memory_space<vmem>>, vector<1x4x32xf32>,
    %453 = vector.broadcast %439 : vector<4x1xf32> to vector<4x32xf32>
    %454 = arith.cmpf oeq, %437, %453 : vector<4x32xf32>
    %c32_i32_149 = arith.constant 32 : i32
    %455 = vector.broadcast %c32_i32_149 : i32 to vector<4x32xi32>
    %456 = arith.select %454, %5, %455 : vector<4x32xi1>, vector<4x32xi32>
    %cst_150 = arith.constant dense<2147483647> : vector<4xi32>
    %457 = vector.multi_reduction <minsi>, %456, %cst_150 [1] : vector<4x32xi32> to vector<4xi32>
    %458 = vector.shape_cast %457 : vector<4xi32> to vector<4x1xi32>
    %459 = vector.broadcast %458 : vector<4x1xi32> to vector<4x32xi32>
    %460 = arith.cmpi eq, %5, %459 : vector<4x32xi32>
    %461 = arith.extui %460 : vector<4x32xi1> to vector<4x32xi32>
    %462 = arith.sitofp %461 : vector<4x32xi32> to vector<4x32xf32>
    %c5_i32 = arith.constant 5 : i32
    %c0_151 = arith.constant 0 : index
    %c0_152 = arith.constant 0 : index
    %463 = vector.load %arg2[%c0_151, %c0_152] : memref<32x384xf32, #tpu.memory_space<vmem>>, vector<32x384xf32>
    %cst_153 = arith.constant dense<0.000000e+00> : vector<4x384xf32>
    %464 = tpu.matmul %462, %463, %cst_153 {dimension_numbers = #tpu.dot_dimension_numbers<[1], [0], [0], [1], [0, 0, 1, 1], [], []>} : vector<4x32xf32>, vector<32x384xf32>, vector<4x384xf32> -> vector<4x384xf32>
    %465 = vector.broadcast %1 : vector<1x384xf32> to vector<4x384xf32>
    %466 = arith.addf %464, %465 : vector<4x384xf32>
    %c0_154 = arith.constant 0 : index
    %c0_155 = arith.constant 0 : index
    %467 = vector.load %arg3[%c0_154, %c0_155] : memref<32x384xf32, #tpu.memory_space<vmem>>, vector<32x384xf32>
    %cst_156 = arith.constant dense<0.000000e+00> : vector<4x384xf32>
    %468 = tpu.matmul %407, %467, %cst_156 {dimension_numbers = #tpu.dot_dimension_numbers<[1], [0], [0], [1], [0, 0, 1, 1], [], []>} : vector<4x32xf32>, vector<32x384xf32>, vector<4x384xf32> -> vector<4x384xf32>
    %469 = vector.broadcast %2 : vector<1x384xf32> to vector<4x384xf32>
    %470 = arith.addf %468, %469 : vector<4x384xf32>
    %471 = vector.extract_strided_slice %466 {offsets = [0, 0], sizes = [4, 128], strides = [1, 1]} : vector<4x384xf32> to vector<4x128xf32>
    %472 = vector.extract_strided_slice %470 {offsets = [0, 0], sizes = [4, 128], strides = [1, 1]} : vector<4x384xf32> to vector<4x128xf32>
    %473 = arith.addf %471, %472 : vector<4x128xf32>
    %474 = arith.negf %473 : vector<4x128xf32>
    %475 = math.exp %474 : vector<4x128xf32>
    %cst_157 = arith.constant 1.000000e+00 : f32
    %476 = vector.broadcast %cst_157 : f32 to vector<4x128xf32>
    %477 = arith.addf %476, %475 : vector<4x128xf32>
    %478 = arith.divf %476, %477 : vector<4x128xf32>
    %479 = vector.extract_strided_slice %466 {offsets = [0, 128], sizes = [4, 128], strides = [1, 1]} : vector<4x384xf32> to vector<4x128xf32>
    %480 = vector.extract_strided_slice %470 {offsets = [0, 128], sizes = [4, 128], strides = [1, 1]} : vector<4x384xf32> to vector<4x128xf32>
    %481 = arith.addf %479, %480 : vector<4x128xf32>
    %482 = arith.negf %481 : vector<4x128xf32>
    %483 = math.exp %482 : vector<4x128xf32>
    %cst_158 = arith.constant 1.000000e+00 : f32
    %484 = vector.broadcast %cst_158 : f32 to vector<4x128xf32>
    %485 = arith.addf %484, %483 : vector<4x128xf32>
    %486 = arith.divf %484, %485 : vector<4x128xf32>
    %487 = vector.extract_strided_slice %486 {offsets = [0, 0], sizes = [4, 32], strides = [1, 1]} : vector<4x128xf32> to vector<4x32xf32>
    %488 = vector.extract_strided_slice %466 {offsets = [0, 256], sizes = [4, 128], strides = [1, 1]} : vector<4x384xf32> to vector<4x128xf32>
    %489 = vector.extract_strided_slice %470 {offsets = [0, 256], sizes = [4, 128], strides = [1, 1]} : vector<4x384xf32> to vector<4x128xf32>
    %490 = arith.mulf %478, %489 : vector<4x128xf32>
    %491 = arith.addf %488, %490 : vector<4x128xf32>
    %492 = math.tanh %491 : vector<4x128xf32>
    %493 = vector.extract_strided_slice %492 {offsets = [0, 0], sizes = [4, 32], strides = [1, 1]} : vector<4x128xf32> to vector<4x32xf32>
    %cst_159 = arith.constant 1.000000e+00 : f32
    %494 = vector.broadcast %cst_159 : f32 to vector<4x32xf32>
    %495 = arith.subf %494, %487 : vector<4x32xf32>
    %496 = arith.mulf %495, %493 : vector<4x32xf32>
    %497 = arith.mulf %487, %407 : vector<4x32xf32>
    %498 = arith.addf %496, %497 : vector<4x32xf32>
    %499 = vector.shape_cast %498 : vector<4x32xf32> to vector<4x1x32xf32>
    %500 = vector.broadcast %499 : vector<4x1x32xf32> to vector<4x8x32xf32>
    %501 = arith.mulf %500, %0 : vector<4x8x32xf32>
    %cst_160 = arith.constant dense<0.000000e+00> : vector<4x8xf32>
    %502 = vector.multi_reduction <add>, %501, %cst_160 [2] : vector<4x8x32xf32> to vector<4x8xf32>
    %cst_161 = arith.constant dense<0xFF800000> : vector<4xf32>
    %503 = vector.multi_reduction <maximumf>, %502, %cst_161 [1] : vector<4x8xf32> to vector<4xf32>
    %504 = vector.shape_cast %503 : vector<4xf32> to vector<4x1xf32>
    %505 = vector.broadcast %504 : vector<4x1xf32> to vector<4x8xf32>
    %506 = arith.subf %502, %505 : vector<4x8xf32>
    %507 = math.exp %506 : vector<4x8xf32>
    %cst_162 = arith.constant dense<0.000000e+00> : vector<4xf32>
    %508 = vector.multi_reduction <add>, %507, %cst_162 [1] : vector<4x8xf32> to vector<4xf32>
    %509 = vector.shape_cast %508 : vector<4xf32> to vector<4x1xf32>
    %510 = tpu.reciprocal %509 {approx = true} : vector<4x1xf32> -> vector<4x1xf32>
    %511 = vector.broadcast %510 : vector<4x1xf32> to vector<4x8xf32>
    %512 = arith.mulf %507, %511 : vector<4x8xf32>
    %513 = vector.shape_cast %512 : vector<4x8xf32> to vector<4x8x1xf32>
    %514 = vector.broadcast %513 : vector<4x8x1xf32> to vector<4x8x32xf32>
    %515 = arith.mulf %514, %0 : vector<4x8x32xf32>
    %cst_163 = arith.constant dense<0.000000e+00> : vector<4x32xf32>
    %516 = vector.multi_reduction <add>, %515, %cst_163 [1] : vector<4x8x32xf32> to vector<4x32xf32>
    %c0_164 = arith.constant 0 : index
    %c0_165 = arith.constant 0 : index
    %517 = vector.load %arg6[%c0_164, %c0_165] : memref<32x32xf32, #tpu.memory_space<vmem>>, vector<32x32xf32>
    %cst_166 = arith.constant dense<0.000000e+00> : vector<4x32xf32>
    %518 = tpu.matmul %516, %517, %cst_166 {dimension_numbers = #tpu.dot_dimension_numbers<[1], [0], [0], [1], [0, 0, 1, 1], [], []>} : vector<4x32xf32>, vector<32x32xf32>, vector<4x32xf32> -> vector<4x32xf32>
    %c0_167 = arith.constant 0 : index
    %c0_168 = arith.constant 0 : index
    %519 = vector.load %arg7[%c0_167, %c0_168] : memref<32x32xf32, #tpu.memory_space<vmem>>, vector<32x32xf32>
    %cst_169 = arith.constant dense<0.000000e+00> : vector<4x32xf32>
    %520 = tpu.matmul %498, %519, %cst_169 {dimension_numbers = #tpu.dot_dimension_numbers<[1], [0], [0], [1], [0, 0, 1, 1], [], []>} : vector<4x32xf32>, vector<32x32xf32>, vector<4x32xf32> -> vector<4x32xf32>
    %521 = arith.addf %518, %520 : vector<4x32xf32>
    %522 = vector.broadcast %3 : vector<1x32xf32> to vector<4x32xf32>
    %523 = arith.addf %521, %522 : vector<4x32xf32>
    %524 = math.tanh %523 : vector<4x32xf32>
    %c0_170 = arith.constant 0 : index
    %c0_171 = arith.constant 0 : index
    %525 = vector.load %arg9[%c0_170, %c0_171] : memref<32x32xf32, #tpu.memory_space<vmem>>, vector<32x32xf32>
    %cst_172 = arith.constant dense<0.000000e+00> : vector<4x32xf32>
    %526 = tpu.matmul %524, %525, %cst_172 {dimension_numbers = #tpu.dot_dimension_numbers<[1], [0], [0], [1], [0, 0, 1, 1], [], []>} : vector<4x32xf32>, vector<32x32xf32>, vector<4x32xf32> -> vector<4x32xf32>
    %527 = vector.broadcast %4 : vector<1x32xf32> to vector<4x32xf32>
    %528 = arith.addf %526, %527 : vector<4x32xf32>
    %cst_173 = arith.constant dense<0xFF800000> : vector<4xf32>
    %529 = vector.multi_reduction <maximumf>, %528, %cst_173 [1] : vector<4x32xf32> to vector<4xf32>
    %530 = vector.shape_cast %529 : vector<4xf32> to vector<4x1xf32>
    %531 = vector.broadcast %530 : vector<4x1xf32> to vector<4x32xf32>
    %532 = arith.subf %528, %531 : vector<4x32xf32>
    %533 = math.exp %532 : vector<4x32xf32>
    %cst_174 = arith.constant dense<0.000000e+00> : vector<4xf32>
    %534 = vector.multi_reduction <add>, %533, %cst_174 [1] : vector<4x32xf32> to vector<4xf32>
    %535 = vector.shape_cast %534 : vector<4xf32> to vector<4x1xf32>
    %536 = math.log %535 : vector<4x1xf32>
    %537 = arith.addf %536, %530 : vector<4x1xf32>
    %538 = vector.broadcast %537 : vector<4x1xf32> to vector<4x32xf32>
    %539 = arith.subf %528, %538 : vector<4x32xf32>
    %540 = arith.index_cast %c5_i32 : i32 to index
    %c0_175 = arith.constant 0 : index
    %c0_176 = arith.constant 0 : index
    %541 = vector.load %arg11[%540, %c0_175, %c0_176] : memref<6x4x32xf32, #tpu.memory_space<vmem>>, vector<1x4x32xf32>
    %542 = vector.shape_cast %541 : vector<1x4x32xf32> to vector<4x32xf32>
    %543 = vector.shape_cast %539 : vector<4x32xf32> to vector<1x4x32xf32>
    tpu.vector_store %arg11[%540, %c0_175, %c0_176], %543 {strides = array<i32>} : memref<6x4x32xf32, #tpu.memory_space<vmem>>, vector<1x4x32xf32>,
    %544 = vector.broadcast %530 : vector<4x1xf32> to vector<4x32xf32>
    %545 = arith.cmpf oeq, %528, %544 : vector<4x32xf32>
    %c32_i32_177 = arith.constant 32 : i32
    %546 = vector.broadcast %c32_i32_177 : i32 to vector<4x32xi32>
    %547 = arith.select %545, %5, %546 : vector<4x32xi1>, vector<4x32xi32>
    %cst_178 = arith.constant dense<2147483647> : vector<4xi32>
    %548 = vector.multi_reduction <minsi>, %547, %cst_178 [1] : vector<4x32xi32> to vector<4xi32>
    %549 = vector.shape_cast %548 : vector<4xi32> to vector<4x1xi32>
    %550 = vector.broadcast %549 : vector<4x1xi32> to vector<4x32xi32>
    %551 = arith.cmpi eq, %5, %550 : vector<4x32xi32>
    %552 = arith.extui %551 : vector<4x32xi1> to vector<4x32xi32>
    %553 = arith.sitofp %552 : vector<4x32xi32> to vector<4x32xf32>
    %c6_i32 = arith.constant 6 : i32
    return
  }
}

</mosaic_0001>

<bundles_post_ra>
// kernel: tpu_custom_call.1
= control target key start
LH: loop header
LB: loop body
LE: loop exit
PB: predicated region body
PF: predicated region fallthrough
CT: control target
= control target key end

     0   :  { %16 = vsyncpa [#allocation3], 0  ;;  %s7715_s0 = inlined_call_operand.hbm [shape: f32[4,32], index: 0, kind: input, shape index: {}]   ;;  %s7716_s1 = inlined_call_operand.hbm [shape: f32[4,8,32], index: 1, kind: input, shape index: {}]   ;;  %s7717_s2 = inlined_call_operand.hbm [shape: f32[32,384], index: 2, kind: input, shape index: {}]   ;;  %s7718_s3 = inlined_call_operand.hbm [shape: f32[32,384], index: 3, kind: input, shape index: {}]   ;;  %s7719_s4 = inlined_call_operand.hbm [shape: f32[1,384], index: 4, kind: input, shape index: {}]   ;;  %s7720_s5 = inlined_call_operand.hbm [shape: f32[1,384], index: 5, kind: input, shape index: {}]   ;;  %s7721_s6 = inlined_call_operand.hbm [shape: f32[32,32], index: 6, kind: input, shape index: {}]   ;;  %s7722_s7 = inlined_call_operand.hbm [shape: f32[32,32], index: 7, kind: input, shape index: {}]   ;;  %s7723_s8 = inlined_call_operand.vmem [shape: f32[1,32], index: 8, kind: input, shape index: {}]   ;;  %s7724_s9 = inlined_call_operand.vmem [shape: f32[32,32], index: 9, kind: input, shape index: {}]   ;;  %s7725_s10 = inlined_call_operand.vmem [shape: f32[1,32], index: 10, kind: input, shape index: {}]   ;;  %s7726_s11 = inlined_call_operand.hbm [shape: f32[6,4,32], index: 11, kind: output, shape index: {}]  }
   0x1   :  { %17 = vsyncpa [#allocation6], 0 }
   0x2   :  { %18 = vsyncpa [#allocation9], 0 }
   0x3   :  { %19 = vsyncpa [#allocation12], 0 }
   0x4   :  { %20 = vsyncpa [#allocation15], 0 }
   0x5   :  { %21 = vsyncpa [#allocation4], 0  ;;  %s6503_s17 = smov [#allocation5]   ;;  %s6293_s21 = scalar_lea.hbm %s7716_s1, 512 }
   0x6   :  { %s37_s18 = sshll.u32 %s6503_s17, 4  ;;  %p6294_p0 = scmp.ne.s32.totalorder %s7716_s1, %s6293_s21  ;;  %s38_s18 = int_to_ptr.vmem [resolvable:$true] %s37_s18 }
   0x7   :  { %p6297_p1 = scmp.lt.u32.totalorder %s6293_s21, %s7716_s1 }
   0x9   :  { %p6299_p2 = pnand %p6297_p1, %p6294_p0 }
   0xb   :  { %6302 = shalt.err (!%p6299_p2)
}
   0xc   :  { %s6303_s26 = scalar_lea.vmem %s38_s18, 512  ;;  %p6308_p4 = scmp.lt.s32.totalorder %s38_s18, %s38_s18 }
   0xd   :  { %p6304_p3 = scmp.ne.s32.totalorder %s38_s18, %s6303_s26  ;;  %p6309_p5 = scmp.lt.s32.totalorder %s6303_s26, %s6303_s26 }
   0xf   :  { %p6310_p6 = por %p6309_p5, %p6308_p4 }
  0x11   :  { %p6311_p7 = pnand %p6310_p6, %p6304_p3 }
  0x13   :  { %6314 = shalt.err (!%p6311_p7)
}
  0x14   :  { %s6504_s27 = smov 128   ;;  %s6505_s28 = smov 8  }
  0x15   :  { %43 = dma.hbm_to_vmem [thread:$0]  %s7716_s1, 512, %s38_s18, [#allocation6], %s6504_s27, %s6504_s27, %s6505_s28  }
  0x16   :  { %s6506_s12 = smov [#allocation8]   ;;  %s6507_s14 = smov [#allocation11]  }
  0x17   :  { %s61_s13 = sshll.u32 %s6506_s12, 4  ;;  %s84_s15 = sshll.u32 %s6507_s14, 4  ;;  %s62_s13 = int_to_ptr.vmem [resolvable:$true] %s61_s13  ;;  %s85_s15 = int_to_ptr.vmem [resolvable:$true] %s84_s15 }
  0x18   :  { %s6315_s19 = scalar_lea.hbm %s7718_s3, 1536 }
  0x19   :  { %p6316_p8 = scmp.ne.s32.totalorder %s7718_s3, %s6315_s19  ;;  %p6319_p9 = scmp.lt.u32.totalorder %s6315_s19, %s7718_s3 }
  0x1b   :  { %p6321_p10 = pnand %p6319_p9, %p6316_p8 }
  0x1d   :  { %6324 = shalt.err (!%p6321_p10)
}
  0x1e   :  { %s6325_s1 = scalar_lea.vmem %s62_s13, 1536  ;;  %p6330_p12 = scmp.lt.s32.totalorder %s62_s13, %s62_s13 }
  0x1f   :  { %p6326_p11 = scmp.ne.s32.totalorder %s62_s13, %s6325_s1  ;;  %p6331_p13 = scmp.lt.s32.totalorder %s6325_s1, %s6325_s1 }
  0x21   :  { %p6332_p0 = por %p6331_p13, %p6330_p12 }
  0x23   :  { %p6333_p1 = pnand %p6332_p0, %p6326_p11 }
  0x25   :  { %6336 = shalt.err (!%p6333_p1)
}
  0x26   :  { %s6508_s18 = smov 384   ;;  %s6509_s24 = smov 24  }
  0x27   :  { %67 = dma.hbm_to_vmem [thread:$0]  %s7718_s3, 1536, %s62_s13, [#allocation9], %s6508_s18, %s6508_s18, %s6509_s24  }
  0x28   :  { %s6337_s12 = scalar_lea.hbm %s7720_s5, 48 }
  0x29   :  { %p6338_p2 = scmp.ne.s32.totalorder %s7720_s5, %s6337_s12  ;;  %p6341_p3 = scmp.lt.u32.totalorder %s6337_s12, %s7720_s5 }
  0x2b   :  { %p6343_p4 = pnand %p6341_p3, %p6338_p2 }
  0x2d   :  { %6346 = shalt.err (!%p6343_p4)
}
  0x2e   :  { %s6347_s20 = scalar_lea.vmem %s85_s15, 48  ;;  %s6351_s21 = scalar_lea.vmem %s85_s15, 64 }
  0x2f   :  { %p6348_p5 = scmp.ne.s32.totalorder %s85_s15, %s6347_s20  ;;  %p6352_p6 = scmp.lt.s32.totalorder %s85_s15, %s85_s15 }
  0x30   :  { %p6353_p7 = scmp.lt.s32.totalorder %s6351_s21, %s6347_s20 }
  0x32   :  { %p6354_p8 = por %p6353_p7, %p6352_p6 }
  0x34   :  { %p6355_p9 = pnand %p6354_p8, %p6348_p5 }
  0x36   :  { %6358 = shalt.err (!%p6355_p9)
}
  0x37   :  { %87 = dma.hbm_to_vmem [thread:$0]  %s7720_s5, 48, %s85_s15, [#allocation12]  }
  0x38   :  { %s6510_s22 = smov [#allocation2]   ;;  %s6511_s1 = smov [#allocation7]  }
  0x39   :  { %s28_s23 = sshll.u32 %s6510_s22, 4  ;;  %s49_s25 = sshll.u32 %s6511_s1, 4  ;;  %s29_s23 = int_to_ptr.vmem [resolvable:$true] %s28_s23  ;;  %s50_s25 = int_to_ptr.vmem [resolvable:$true] %s49_s25 }
  0x3a   :  { %s6359_s30 = scalar_lea.hbm %s7715_s0, 64 }
  0x3b   :  { %p6360_p10 = scmp.ne.s32.totalorder %s7715_s0, %s6359_s30  ;;  %p6363_p11 = scmp.lt.u32.totalorder %s6359_s30, %s7715_s0 }
  0x3d   :  { %p6365_p12 = pnand %p6363_p11, %p6360_p10 }
  0x3f   :  { %6368 = shalt.err (!%p6365_p12)
}
  0x40   :  { %s6369_s5 = scalar_lea.vmem %s29_s23, 64  ;;  %p6374_p0 = scmp.lt.s32.totalorder %s29_s23, %s29_s23 }
  0x41   :  { %p6370_p13 = scmp.ne.s32.totalorder %s29_s23, %s6369_s5  ;;  %p6375_p1 = scmp.lt.s32.totalorder %s6369_s5, %s6369_s5 }
  0x43   :  { %p6376_p2 = por %p6375_p1, %p6374_p0 }
  0x45   :  { %p6377_p3 = pnand %p6376_p2, %p6370_p13 }
  0x47   :  { %6380 = shalt.err (!%p6377_p3)
}
  0x48   :  { %31 = dma.hbm_to_vmem [thread:$0]  %s7715_s0, 64, %s29_s23, [#allocation3]  }
  0x49   :  { %s6381_s3 = scalar_lea.hbm %s7717_s2, 1536 }
  0x4a   :  { %p6382_p4 = scmp.ne.s32.totalorder %s7717_s2, %s6381_s3  ;;  %p6385_p5 = scmp.lt.u32.totalorder %s6381_s3, %s7717_s2 }
  0x4c   :  { %p6387_p6 = pnand %p6385_p5, %p6382_p4 }
  0x4e   :  { %6390 = shalt.err (!%p6387_p6)
}
  0x4f   :  { %s6391_s29 = scalar_lea.vmem %s50_s25, 1536  ;;  %p6396_p8 = scmp.lt.s32.totalorder %s50_s25, %s50_s25 }
  0x50   :  { %p6392_p7 = scmp.ne.s32.totalorder %s50_s25, %s6391_s29  ;;  %p6397_p9 = scmp.lt.s32.totalorder %s6391_s29, %s6391_s29 }
  0x52   :  { %p6398_p10 = por %p6397_p9, %p6396_p8 }
  0x54   :  { %p6399_p11 = pnand %p6398_p10, %p6392_p7 }
  0x56   :  { %6402 = shalt.err (!%p6399_p11)
}
  0x57   :  { %55 = dma.hbm_to_vmem [thread:$0]  %s7717_s2, 1536, %s50_s25, [#allocation6], %s6508_s18, %s6508_s18, %s6509_s24  }
  0x58   :  { %s6512_s30 = smov [#allocation10]   ;;  %s6513_s14 = smov [#allocation13]  }
  0x59   :  { %s74_s12 = sshll.u32 %s6512_s30, 4  ;;  %s93_s16 = sshll.u32 %s6513_s14, 4  ;;  %s75_s12 = int_to_ptr.vmem [resolvable:$true] %s74_s12  ;;  %s94_s16 = int_to_ptr.vmem [resolvable:$true] %s93_s16 }
  0x5a   :  { %s6403_s15 = scalar_lea.hbm %s7719_s4, 48 }
  0x5b   :  { %p6404_p12 = scmp.ne.s32.totalorder %s7719_s4, %s6403_s15  ;;  %p6407_p13 = scmp.lt.u32.totalorder %s6403_s15, %s7719_s4 }
  0x5d   :  { %p6409_p0 = pnand %p6407_p13, %p6404_p12 }
  0x5f   :  { %6412 = shalt.err (!%p6409_p0)
}
  0x60   :  { %s6413_s2 = scalar_lea.vmem %s75_s12, 48  ;;  %s6417_s18 = scalar_lea.vmem %s75_s12, 64 }
  0x61   :  { %p6414_p1 = scmp.ne.s32.totalorder %s75_s12, %s6413_s2  ;;  %p6418_p2 = scmp.lt.s32.totalorder %s75_s12, %s75_s12 }
  0x62   :  { %p6419_p3 = scmp.lt.s32.totalorder %s6417_s18, %s6413_s2 }
  0x64   :  { %p6420_p4 = por %p6419_p3, %p6418_p2 }
  0x66   :  { %p6421_p5 = pnand %p6420_p4, %p6414_p1 }
  0x68   :  { %6424 = shalt.err (!%p6421_p5)
}
  0x69   :  { %77 = dma.hbm_to_vmem [thread:$0]  %s7719_s4, 48, %s75_s12, [#allocation9]  }
  0x6a   :  { %s6425_s1 = scalar_lea.hbm %s7721_s6, 512 }
  0x6b   :  { %p6426_p6 = scmp.ne.s32.totalorder %s7721_s6, %s6425_s1  ;;  %p6429_p7 = scmp.lt.u32.totalorder %s6425_s1, %s7721_s6 }
  0x6d   :  { %p6431_p8 = pnand %p6429_p7, %p6426_p6 }
  0x6f   :  { %6434 = shalt.err (!%p6431_p8)
}
  0x70   :  { %s6435_s30 = scalar_lea.vmem %s94_s16, 512  ;;  %p6440_p10 = scmp.lt.s32.totalorder %s94_s16, %s94_s16 }
  0x71   :  { %p6436_p9 = scmp.ne.s32.totalorder %s94_s16, %s6435_s30  ;;  %p6441_p11 = scmp.lt.s32.totalorder %s6435_s30, %s6435_s30 }
  0x73   :  { %p6442_p12 = por %p6441_p11, %p6440_p10 }
  0x75   :  { %p6443_p13 = pnand %p6442_p12, %p6436_p9 }
  0x77   :  { %6446 = shalt.err (!%p6443_p13)
}
  0x78   :  { %99 = dma.hbm_to_vmem [thread:$0]  %s7721_s6, 512, %s94_s16, [#allocation12], %s6504_s27, %s6504_s27, %s6505_s28  }
  0x79   :  { %s6514_s14 = smov [#allocation14]   ;;  %s6447_s19 = scalar_lea.hbm %s7722_s7, 512 }
  0x7a   :  { %s105_s17 = sshll.u32 %s6514_s14, 4  ;;  %p6448_p0 = scmp.ne.s32.totalorder %s7722_s7, %s6447_s19  ;;  %s106_s17 = int_to_ptr.vmem [resolvable:$true] %s105_s17 }
  0x7b   :  { %p6451_p1 = scmp.lt.u32.totalorder %s6447_s19, %s7722_s7 }
  0x7d   :  { %p6453_p2 = pnand %p6451_p1, %p6448_p0 }
  0x7f   :  { %6456 = shalt.err (!%p6453_p2)
}
  0x80   :  { %s6457_s18 = scalar_lea.vmem %s106_s17, 512  ;;  %p6462_p4 = scmp.lt.s32.totalorder %s106_s17, %s106_s17 }
  0x81   :  { %p6458_p3 = scmp.ne.s32.totalorder %s106_s17, %s6457_s18  ;;  %p6463_p5 = scmp.lt.s32.totalorder %s6457_s18, %s6457_s18 }
  0x83   :  { %p6464_p6 = por %p6463_p5, %p6462_p4 }
  0x85   :  { %p6465_p7 = pnand %p6464_p6, %p6458_p3 }
  0x87   :  { %6468 = shalt.err (!%p6465_p7)
}
  0x88   :  { %111 = dma.hbm_to_vmem [thread:$0]  %s7722_s7, 512, %s106_s17, [#allocation15], %s6504_s27, %s6504_s27, %s6505_s28  }
  0x89   :  { %6491 = dma.done.wait [#allocation3], 64  }
  0x8a   :  { %6492 = vsyncadd [#allocation3], 4294967232 }
  0x8b   :  { %6493 = dma.done.wait [#allocation6], 2048  }
  0x8c   :  { %6494 = vsyncadd [#allocation6], 4294965248 }
  0x8d   :  { %6495 = dma.done.wait [#allocation9], 1584  }
  0x8e   :  { %6496 = vsyncadd [#allocation9], 4294965712 }
  0x8f   :  { %6497 = dma.done.wait [#allocation12], 560  }
  0x90   :  { %6498 = vsyncadd [#allocation12], 4294966736 }
  0x91   :  { %6499 = dma.done.wait [#allocation15], 512  }
  0x92   :  { %6500 = vsyncadd [#allocation15], 4294966784  ;;  %v7729_v0 = vmov 0.0   ;;  %v7727_v1 = vmov 0.0|0.0   ;;  %vm6517_vm0 = vmmov 0   ;;  %v154_v2 = vld [vmem:[#allocation7 + $0x8] sm:$0xff]  ;;  %v150_v45 = vlaneseq }
  0x93   :  { %249 = vmatprep.mubr.f32.mxu0 %v7729_v0  ;;  %5799 = vmatprep.subr.bf16.mxu1 %v7727_v1  ;;  %v157_v3 = vld [vmem:[#allocation7 + $0x20] sm:$0xff]  ;;  %v156_v6 = vld [vmem:[#allocation7 + $0x18] sm:$0xff]  ;;  %v163_v8 = vld [vmem:[#allocation7 + $0x50] sm:$0xff]  ;;  %vm181_vm1 = vcmask 261120   ;;  %vm600_vm2 = vcmask 1041409   ;;  %vm602_vm3 = vcmask 1042434  }
  0x94   :  { %5469 = vmatprep.mubr.msk.f32.mxu1 %vm6517_vm0, %v7729_v0  ;;  %v153_v4 = vld [vmem:[#allocation7] sm:$0xff]  ;;  %v6698_v5 = vpack.c.bf16 %v157_v3, %v154_v2  ;;  %v160_v7 = vld [vmem:[#allocation7 + $0x38] sm:$0xff]  ;;  %v159_v11 = vld [vmem:[#allocation7 + $0x30] sm:$0xff]  ;;  %v6759_v46 = vshrl.u32 %v150_v45, 7  ;;  %vm604_vm4 = vcmask 1043459   ;;  %vm607_vm5 = vcmask 60416  }
  0x95   :  { %v6700_v9 = vpack.c.bf16 %v156_v6, %v153_v4  ;;  %v6702_v10 = vpack.c.bf16 %v163_v8, %v160_v7  ;;  %v162_v12 = vld [vmem:[#allocation7 + $0x48] sm:$0xff]  ;;  %v330_v14 = vld [vmem:[#allocation8 + $0x20] sm:$0xff]  ;;  %v329_v17 = vld [vmem:[#allocation8 + $0x18] sm:$0xff]  ;;  %vm1011_vm6 = vcmask 257024  }
  0x96   :  { %5792 = vmatprep.subr.bf16.mxu0 %v6698_v5  ;;  %v327_v13 = vld [vmem:[#allocation8 + $0x8] sm:$0xff]  ;;  %v6706_v15 = vpack.c.bf16 %v162_v12, %v159_v11  ;;  %v326_v16 = vld [vmem:[#allocation8] sm:$0xff]  ;;  %v333_v19 = vld [vmem:[#allocation8 + $0x38] sm:$0xff]  ;;  %v6762_v47 = vsub.s32 0, %v6759_v46  ;;  %v6765_v50 = vsub.s32 1, %v6759_v46  ;;  %v6778_v8 = vsub.s32 2, %v6759_v46 }
  0x97   :  { %5794 = vmatpush1.bf16.msra.mxu0 %v6700_v9  ;;  %v6709_v18 = vpack.c.bf16 %v330_v14, %v327_v13  ;;  %v336_v20 = vld [vmem:[#allocation8 + $0x50] sm:$0xff]  ;;  %v158_v22 = vld [vmem:[#allocation7 + $0x28] sm:$0xff]  ;;  %v161_v23 = vld [vmem:[#allocation7 + $0x40] sm:$0xff]  ;;  %v6714_v27 = vpack.c.bf16 %v329_v17, %v326_v16 }
  0x98   :  { %5796 = vmatprep.subr.bf16.mxu0 %v6702_v10  ;;  %v155_v21 = vld [vmem:[#allocation7 + $0x10] sm:$0xff]  ;;  %v164_v24 = vld [vmem:[#allocation7 + $0x58] sm:$0xff]  ;;  %v6717_v28 = vpack.c.bf16 %v336_v20, %v333_v19  ;;  %v335_v30 = vld [vmem:[#allocation8 + $0x48] sm:$0xff] }
  0x99   :  { %v6711_v25 = vpack.c.bf16 %v158_v22, %v155_v21  ;;  %v152_v26 = vld [vmem:[#allocation2] sm:$0xf]  ;;  %v332_v29 = vld [vmem:[#allocation8 + $0x30] sm:$0xff]  ;;  %v6720_v31 = vpack.c.bf16 %v164_v24, %v161_v23  ;;  %v331_v33 = vld [vmem:[#allocation8 + $0x28] sm:$0xff]  ;;  %v6518_v22 = vmov 1966171168  }
  0x9a   :  { %v328_v32 = vld [vmem:[#allocation8 + $0x10] sm:$0xff]  ;;  %v6725_v34 = vpack.c.bf16 %v335_v30, %v332_v29  ;;  %v334_v36 = vld [vmem:[#allocation8 + $0x40] sm:$0xff]  ;;  %v337_v37 = vld [vmem:[#allocation8 + $0x58] sm:$0xff]  ;;  %v521_v23 = vunpack.c.l.s4 %v6518_v22 }
  0x9b   :  { %5798 = vmatpush1.bf16.msra.mxu0 %v6706_v15  ;;  %5801 = vmatpush3.bf16.msra.mxu1 %v6711_v25  ;;  %v6730_v35 = vpack.c.bf16 %v331_v33, %v328_v32  ;;  %v6736_v38 = vpack.c.bf16 %v337_v37, %v334_v36  ;;  %v765_v39 = vld [vmem:[#allocation14] sm:$0xff]  ;;  %v766_v40 = vld [vmem:[#allocation14 + $0x8] sm:$0xff]  ;;  %v767_v41 = vld [vmem:[#allocation14 + $0x10] sm:$0xff] }
  0x9c   :  { %5806 = vmatprep.subr.bf16.mxu0 %v6709_v18  ;;  %5802 = vmatprep.subr.bf16.mxu1 %v7727_v1  ;;  %v6750_v42 = vpack.c.bf16 %v766_v40, %v765_v39  ;;  %v768_v43 = vld [vmem:[#allocation14 + $0x18] sm:$0xff] }
  0x9d   :  { %v6753_v44 = vpack.c.bf16 %v768_v43, %v767_v41  ;;  %v146_v48 = vld [vmem:[#allocation10] sm:$0x7]  ;;  %v147_v49 = vld [vmem:[#allocation11] sm:$0x7] }
  0x9e   :  { %5252 = vmatmul.mubr.msk.f32.vlgmr.msra.gmra.mrb[0].mxu0 %vm181_vm1, %v152_v26  ;;  %v169_v51 = vrot.slane %v146_v48, %v6762_v47  ;;  %v342_v52 = vrot.slane %v147_v49, %v6762_v47  ;;  %v173_v53 = vrot.slane %v146_v48, %v6765_v50  ;;  %v346_v54 = vrot.slane %v147_v49, %v6765_v50  ;;  %v6800_v43 = vld [vmem:[#allocation5] sm:$0xff] }
  0x9f   :  { %5808 = vmatpush1.bf16.msra.mxu0 %v6714_v27  ;;  %421 = vmatprep.mubr.f32.mxu0 %v7729_v0  ;;  %v6781_v11 = vrot.slane %v147_v49, %v6778_v8  ;;  %v6784_v14 = vrot.slane %v146_v48, %v6778_v8 }
  0xa0   :  { %5810 = vmatprep.subr.bf16.mxu0 %v6717_v28  ;;  %5804 = vmatpush3.bf16.msra.mxu1 %v6720_v31  ;;  %v6771_v55 = vadd.f32 %v342_v52, %v169_v51  ;;  %v6773_v59 = vadd.f32 %v346_v54, %v173_v53  ;;  %v6804_v52 = vld [vmem:[#allocation5 + $0x10] sm:$0xff]  ;;  %v6806_v53 = vld [vmem:[#allocation5 + $0x8] sm:$0xff] }
  0xa1   :  { %5813 = vmatprep.subr.bf16.mxu1 %v7727_v1 }
  0xa3   :  { %5812 = vmatpush1.bf16.msra.mxu0 %v6725_v34  ;;  %5470 = vmatmul.mubr.msk.f32.vlgmr.msra.gmra.mrb[0].mxu1 %vm181_vm1, %v152_v26  ;;  %v522_v26 = vunpack.c.0.s8 %v521_v23 }
  0xa4   :  { %5815 = vmatpush3.bf16.msra.mxu1 %v6730_v35  ;;  %5480 = vmatprep.mubr.msk.f32.mxu1 %vm6517_vm0, %v7729_v0 }
  0xa5   :  { %5816 = vmatprep.subr.bf16.mxu1 %v7727_v1  ;;  %5819 = vmatprep.subr.bf16.mxu0 %v7727_v1  ;;  %v6789_v32 = vsub.s32 %v522_v26, %v6759_v46 }
  0xa6   :  { %422 = vmatmul.mubr.f32.vlgmr.msra.gmra.mrb[0].mxu0 %v7729_v0 }
  0xa7   :  { %5491 = vmatprep.mubr.msk.f32.mxu0 %vm6517_vm0, %v7729_v0  ;;  %5821 = vmatpush3.bf16.msra.mxu0 %v6750_v42 }
  0xa8   :  { %5818 = vmatpush3.bf16.msra.mxu1 %v6736_v38  ;;  %5822 = vmatprep.subr.bf16.mxu0 %v7727_v1 }
  0xa9   :  { %5825 = vmatprep.subr.bf16.mxu1 %v7727_v1 }
  0xab   :  { %5481 = vmatmul.mubr.f32.vlgmr.msra.gmra.mrb[2].mxu1 %v7729_v0  ;;  %5824 = vmatpush3.bf16.msra.mxu0 %v6753_v44 }
  0xac   :  { %5502 = vmatprep.mubr.msk.f32.mxu1 %vm6517_vm0, %v7729_v0  ;;  %5831 = vmatprep.subr.bf16.mxu0 %v7727_v1 }
 0x176   :  { %v322_v56 = vpop.f32.mrb[0].mxu1 }
 0x177   :  { %v5471_v57 = vpop.f32.mrb[1].mxu1  ;;  %v323_v19 = vadd.f32 %v322_v56, %v6784_v14 }
 0x179   :  { %v423_v58 = vpop.f32.mrb[0].mxu0 }
 0x17a   :  { %v6068_v60 = vadd.f32 %v6771_v55, %v423_v58  ;;  %v425_v61 = vpop.f32.mrb[1].mxu0 }
 0x17b   :  { %v6070_v63 = vadd.f32 %v6773_v59, %v425_v61 }
 0x17c   :  { %v5254_v62 = vmul.f32 -1.442695, %v6068_v60  ;;  %v6811_v60 = vld [vmem:[#allocation5 + $0x18] sm:$0xff] }
 0x17d   :  { %v5255_v4 = vmul.f32 -1.442695, %v6070_v63 }
 0x17e   :  { %6125 = vpow2.f32 %v5254_v62  ;;  %v494_v2 = vpop.f32.mrb[2].mxu1 }
 0x17f   :  { %v5482_v3 = vpop.f32.mrb[3].mxu1  ;;  %6127 = vpow2.f32 %v5255_v4  ;;  %v495_v16 = vadd.f32 %v494_v2, %v6781_v11 }
 0x188   :  { %v6126_v6 = vpop.eup %6125 }
 0x189   :  { %v502_v7 = vadd.f32 1.0, %v6126_v6  ;;  %v6128_v12 = vpop.eup %6127 }
 0x18a   :  { %v509_v13 = vadd.f32 1.0, %v6128_v12  ;;  %v6822_v12 = vand.u32 127, %v150_v45 }
 0x18b   :  { %6129 = vrcp.f32 %v502_v7 }
 0x18c   :  { %6131 = vrcp.f32 %v509_v13 }
 0x195   :  { %v6130_v17 = vpop.eup %6129 }
 0x196   :  { %v512_v20 = vmul.f32 %v6130_v17, %v495_v16  ;;  %v6132_v24 = vpop.eup %6131  ;;  %v6826_v16 = vsub.s32 %v6822_v12, %v6759_v46 }
 0x197   :  { %v515_v29 = vsub.f32 1.0, %v6132_v24  ;;  %v517_v36 = vmul.f32 0.0, %v6132_v24 }
 0x198   :  { %v513_v21 = vadd.f32 %v512_v20, %v323_v19 }
 0x19a   :  { %6133 = vtanh.f32 %v513_v21 }
 0x1a4   :  { %v6134_v30 = vpop.eup %6133 }
 0x1a5   :  { %v516_v33 = vmul.f32 %v6134_v30, %v515_v29 }
 0x1a7   :  { %v6791_v37 = vadd.f32 %v517_v36, %v516_v33  ;;  %v6519_v33 = vmov 0  }
 0x1a8   :  { %6124 = vset.pattern.permute.xlu0 %v6519_v33  ;;  %6123 = vset.pattern.permute.xlu1 %v6519_v33 }
 0x1a9   :  { %5492 = vmatmul.mubr.msk.f32.vlgmr.msra.gmra.mrb[2].mxu0 %vm181_vm1, %v6791_v37  ;;  %v526_v39 = vrot.slane %v6791_v37, %v6789_v32 }
 0x1aa   :  { %5513 = vmatprep.mubr.msk.f32.mxu0 %vm6517_vm0, %v7729_v0 }
 0x1ab   :  { %v534_v40 = vrot.slane %v526_v39, %v6789_v32  ;;  %v527_v41 = vcombine.high %v526_v39, %v526_v39 }
 0x1ad   :  { %v547_v48 = vrot.slane %v534_v40, %v6762_v47  ;;  %v542_v49 = vcombine.high %v534_v40, %v534_v40  ;;  %v541_v51 = vrot.slane %v527_v41, %v6789_v32  ;;  %v6839_v40 = vsub.s32 3, %v6759_v46 }
 0x1af   :  { %v564_v54 = vmul.f32 %v547_v48, %v6800_v43  ;;  %v555_v56 = vrot.slane %v542_v49, %v6762_v47  ;;  %v551_v57 = vrot.slane %v541_v51, %v6762_v47  ;;  %v543_v58 = vcombine.high %v541_v51, %v541_v51 }
 0x1b1   :  { %v568_v61 = vsel %vm181_vm1, %v564_v54, 0.0  ;;  %v566_v62 = vmul.f32 %v555_v56, %v6804_v52  ;;  %v565_v63 = vmul.f32 %v551_v57, %v6806_v53  ;;  %v559_v2 = vrot.slane %v543_v58, %v6762_v47 }
 0x1b2   :  { %569 = vadd.xlane.f32.xlu0 %v568_v61 }
 0x1b3   :  { %v574_v3 = vsel %vm181_vm1, %v566_v62, 0.0  ;;  %v567_v4 = vmul.f32 %v559_v2, %v6811_v60  ;;  %v571_v6 = vsel %vm181_vm1, %v565_v63, 0.0 }
 0x1b4   :  { %575 = vadd.xlane.f32.xlu1 %v574_v3 }
 0x1b5   :  { %v577_v7 = vsel %vm181_vm1, %v567_v4, 0.0 }
 0x1b6   :  { %572 = vadd.xlane.f32.xlu0 %v571_v6 }
 0x1b8   :  { %578 = vadd.xlane.f32.xlu1 %v577_v7 }
 0x23f   :  { %v570_v13 = vpop.xlane.xlu0 %569 }
 0x240   :  { %v587_v20 = vrot.slane %v570_v13, %v6826_v16 }
 0x241   :  { %v576_v17 = vpop.xlane.xlu1 %575 }
 0x242   :  { %v595_v22 = vrot.slane %v576_v17, %v6826_v16 }
 0x243   :  { %v573_v19 = vpop.xlane.xlu0 %572 }
 0x244   :  { %v591_v21 = vrot.slane %v573_v19, %v6826_v16 }
 0x245   :  { %v579_v23 = vpop.xlane.xlu1 %578 }
 0x246   :  { %v599_v45 = vrot.slane %v579_v23, %v6826_v16  ;;  %v601_v24 = vsel %vm600_vm2, %v591_v21, %v587_v20 }
 0x247   :  { %v603_v26 = vsel %vm602_vm3, %v595_v22, %v601_v24 }
 0x248   :  { %v605_v29 = vsel %vm604_vm4, %v599_v45, %v603_v26 }
 0x249   :  { %v608_v30 = vsel %vm607_vm5, %v605_v29, -inf }
 0x24a   :  { %609 = vmax.xlane.f32.xlu0 %v608_v30 }
 0x27c   :  { %v6836_v36 = vpop.f32.mrb[2].mxu0 }
 0x27d   :  { %v5493_v39 = vpop.f32.mrb[3].mxu0 }
 0x2d7   :  { %v610_v41 = vpop.xlane.xlu0 %609 }
 0x2d8   :  { %v615_v48 = vrot.slane %v610_v41, %v6762_v47  ;;  %v619_v49 = vrot.slane %v610_v41, %v6765_v50  ;;  %v623_v51 = vrot.slane %v610_v41, %v6778_v8  ;;  %v627_v54 = vrot.slane %v610_v41, %v6839_v40 }
 0x2da   :  { %v632_v56 = vsub.f32 %v570_v13, %v615_v48  ;;  %v633_v57 = vsub.f32 %v573_v19, %v619_v49  ;;  %v634_v58 = vsub.f32 %v576_v17, %v623_v51  ;;  %v635_v63 = vsub.f32 %v579_v23, %v627_v54 }
 0x2dc   :  { %v636_v61 = vmul.f32 1.442695, %v632_v56  ;;  %v638_v62 = vmul.f32 1.442695, %v633_v57  ;;  %v640_v2 = vmul.f32 1.442695, %v634_v58 }
 0x2dd   :  { %v642_v46 = vmul.f32 1.442695, %v635_v63 }
 0x2de   :  { %6135 = vpow2.f32 %v636_v61  ;;  %v761_v61 = vld [vmem:[#allocation13] sm:$0xff] }
 0x2df   :  { %6137 = vpow2.f32 %v638_v62  ;;  %v762_v62 = vld [vmem:[#allocation13 + $0x8] sm:$0xff] }
 0x2e0   :  { %6139 = vpow2.f32 %v640_v2  ;;  %v6857_v63 = vpack.c.bf16 %v762_v62, %v761_v61  ;;  %v763_v2 = vld [vmem:[#allocation13 + $0x10] sm:$0xff] }
 0x2e1   :  { %6141 = vpow2.f32 %v642_v46  ;;  %v764_v46 = vld [vmem:[#allocation13 + $0x18] sm:$0xff] }
 0x2e2   :  { %5827 = vmatpush3.bf16.msra.mxu1 %v6857_v63 }
 0x2e3   :  { %5828 = vmatprep.subr.bf16.mxu1 %v7727_v1 }
 0x2e8   :  { %v6136_v3 = vpop.eup %6135 }
 0x2e9   :  { %v6138_v4 = vpop.eup %6137  ;;  %649 = vperm.xlu1 %6123, %v6136_v3  }
 0x2ea   :  { %652 = vperm.xlu0 %6124, %v6138_v4   ;;  %v6140_v6 = vpop.eup %6139 }
 0x2eb   :  { %v6142_v7 = vpop.eup %6141 }
 0x2ed   :  { %655 = vperm.xlu1 %6123, %v6140_v6  }
 0x2f1   :  { %658 = vperm.xlu1 %6123, %v6142_v7  }
 0x368   :  { %v650_v13 = vpop.permute.xlu1 %649 }
 0x369   :  { %v653_v19 = vpop.permute.xlu0 %652  ;;  %v663_v21 = vrot.slane %v650_v13, %v6826_v16 }
 0x36a   :  { %v667_v20 = vrot.slane %v653_v19, %v6826_v16 }
 0x36c   :  { %v656_v17 = vpop.permute.xlu1 %655  ;;  %v676_v24 = vsel %vm600_vm2, %v667_v20, %v663_v21 }
 0x36d   :  { %v671_v22 = vrot.slane %v656_v17, %v6826_v16 }
 0x36f   :  { %v677_v26 = vsel %vm602_vm3, %v671_v22, %v676_v24 }
 0x370   :  { %v659_v23 = vpop.permute.xlu1 %658 }
 0x371   :  { %v675_v45 = vrot.slane %v659_v23, %v6826_v16 }
 0x373   :  { %v678_v29 = vsel %vm604_vm4, %v675_v45, %v677_v26 }
 0x374   :  { %v680_v30 = vsel %vm607_vm5, %v678_v29, 0.0 }
 0x375   :  { %681 = vadd.xlane.f32.xlu1 %v680_v30 }
 0x402   :  { %v682_v33 = vpop.xlane.xlu1 %681 }
 0x403   :  { %6143 = vrcp.f32 %v682_v33 }
 0x40d   :  { %v6144_v39 = vpop.eup %6143 }
 0x40e   :  { %v688_v41 = vrot.slane %v6144_v39, %v6762_v47  ;;  %v692_v49 = vrot.slane %v6144_v39, %v6765_v50  ;;  %v696_v54 = vrot.slane %v6144_v39, %v6778_v8  ;;  %v700_v57 = vrot.slane %v6144_v39, %v6839_v40 }
 0x410   :  { %v705_v48 = vmul.f32 %v6136_v3, %v688_v41  ;;  %v706_v51 = vmul.f32 %v6138_v4, %v692_v49  ;;  %v707_v56 = vmul.f32 %v6140_v6, %v696_v54  ;;  %v708_v58 = vmul.f32 %v6142_v7, %v700_v57 }
 0x411   :  { %v6861_v3 = vpack.c.bf16 %v764_v46, %v763_v2 }
 0x412   :  { %711 = vperm.xlu0 %6124, %v705_v48  }
 0x413   :  { %5830 = vmatpush3.bf16.msra.mxu1 %v6861_v3 }
 0x414   :  { %5838 = vmatprep.subr.bf16.mxu1 %v6698_v5 }
 0x416   :  { %716 = vperm.xlu0 %6124, %v706_v51  }
 0x41a   :  { %721 = vperm.xlu0 %6124, %v707_v56  }
 0x41e   :  { %726 = vperm.xlu0 %6124, %v708_v58  }
 0x491   :  { %v712_v4 = vpop.permute.xlu0 %711 }
 0x492   :  { %v729_v6 = vmul.f32 %v712_v4, %v6800_v43 }
 0x494   :  { %v733_v7 = vsel %vm181_vm1, %v729_v6, 0.0 }
 0x495   :  { %v734_v13 = vrot.slane %v733_v7, 4  ;;  %v717_v19 = vpop.permute.xlu0 %716 }
 0x496   :  { %v730_v17 = vmul.f32 %v717_v19, %v6806_v53 }
 0x497   :  { %v735_v21 = vadd.f32 %v734_v13, %v733_v7 }
 0x498   :  { %v740_v20 = vsel %vm181_vm1, %v730_v17, 0.0 }
 0x499   :  { %v741_v22 = vrot.slane %v740_v20, 4  ;;  %v722_v23 = vpop.permute.xlu0 %721  ;;  %v736_v5 = vrot.slane %v735_v21, 2 }
 0x49a   :  { %v731_v45 = vmul.f32 %v722_v23, %v6804_v52  ;;  %v928_v23 = vld [vmem:[%s7724_s9] sm:$0xff] }
 0x49b   :  { %v742_v24 = vadd.f32 %v741_v22, %v740_v20  ;;  %v737_v51 = vadd.f32 %v736_v5, %v735_v21 }
 0x49c   :  { %v747_v26 = vsel %vm181_vm1, %v731_v45, 0.0  ;;  %v929_v45 = vld [vmem:[%s7724_s9 + $0x8] sm:$0xff] }
 0x49d   :  { %v743_v29 = vrot.slane %v742_v24, 2  ;;  %v748_v30 = vrot.slane %v747_v26, 4  ;;  %v727_v33 = vpop.permute.xlu0 %726  ;;  %v738_v62 = vrot.slane %v737_v51, 1 }
 0x49e   :  { %v732_v39 = vmul.f32 %v727_v33, %v6811_v60 }
 0x49f   :  { %v744_v41 = vadd.f32 %v743_v29, %v742_v24  ;;  %v749_v48 = vadd.f32 %v748_v30, %v747_v26  ;;  %v739_v13 = vadd.f32 %v738_v62, %v737_v51  ;;  %v6891_v24 = vpack.c.bf16 %v929_v45, %v928_v23 }
 0x4a0   :  { %v754_v49 = vsel %vm181_vm1, %v732_v39, 0.0 }
 0x4a1   :  { %v750_v54 = vrot.slane %v749_v48, 2  ;;  %v755_v56 = vrot.slane %v754_v49, 4  ;;  %v745_v57 = vrot.slane %v744_v41, 1  ;;  %5833 = vmatpush3.bf16.msra.mxu0 %v6891_v24 }
 0x4a2   :  { %5834 = vmatprep.subr.bf16.mxu0 %v7727_v1 }
 0x4a3   :  { %v751_v58 = vadd.f32 %v750_v54, %v749_v48  ;;  %v756_v61 = vadd.f32 %v755_v56, %v754_v49  ;;  %v746_v4 = vadd.f32 %v745_v57, %v744_v41 }
 0x4a5   :  { %v752_v2 = vrot.slane %v751_v58, 1  ;;  %v757_v46 = vrot.slane %v756_v61, 2  ;;  %v845_v20 = vsel %vm600_vm2, %v746_v4, %v739_v13 }
 0x4a7   :  { %v758_v6 = vadd.f32 %v757_v46, %v756_v61  ;;  %v753_v7 = vadd.f32 %v752_v2, %v751_v58 }
 0x4a9   :  { %v759_v19 = vrot.slane %v758_v6, 1  ;;  %v846_v22 = vsel %vm602_vm3, %v753_v7, %v845_v20 }
 0x4ab   :  { %v760_v17 = vadd.f32 %v759_v19, %v758_v6 }
 0x4ad   :  { %v847_v21 = vsel %vm604_vm4, %v760_v17, %v846_v22 }
 0x4ae   :  { %5503 = vmatmul.mubr.msk.f32.vlgmr.msra.gmra.mrb[4].mxu1 %vm181_vm1, %v847_v21 }
 0x4af   :  { %5840 = vmatpush1.bf16.msra.mxu1 %v6700_v9  ;;  %1125 = vmatprep.mubr.f32.mxu1 %v7729_v0  ;;  %v930_v9 = vld [vmem:[%s7724_s9 + $0x10] sm:$0xff] }
 0x4b0   :  { %5842 = vmatprep.subr.bf16.mxu1 %v6702_v10  ;;  %v931_v10 = vld [vmem:[%s7724_s9 + $0x18] sm:$0xff] }
 0x4b3   :  { %5844 = vmatpush1.bf16.msra.mxu1 %v6706_v15  ;;  %v6897_v15 = vpack.c.bf16 %v931_v10, %v930_v9 }
 0x4b4   :  { %5852 = vmatprep.subr.bf16.mxu1 %v6709_v18  ;;  %v6905_v18 = vld [vmem:[%s7723_s8] ss:$0 sm:$0xff] }
 0x4b5   :  { %5836 = vmatpush3.bf16.msra.mxu0 %v6897_v15 }
 0x4b6   :  { %5845 = vmatprep.subr.bf16.mxu0 %v7727_v1 }
 0x581   :  { %v916_v26 = vpop.f32.mrb[4].mxu1 }
 0x582   :  { %v917_v5 = vadd.f32 %v916_v26, %v6836_v36  ;;  %v5504_v29 = vpop.f32.mrb[5].mxu1  ;;  %v6919_v36 = vld [vmem:[%s7725_s10] ss:$0 sm:$0xff] }
 0x584   :  { %v926_v30 = vadd.f32 %v6905_v18, %v917_v5 }
 0x586   :  { %6145 = vtanh.f32 %v926_v30 }
 0x590   :  { %v6146_v33 = vpop.eup %6145 }
 0x591   :  { %5514 = vmatmul.mubr.msk.f32.vlgmr.msra.gmra.mrb[4].mxu0 %vm181_vm1, %v6146_v33 }
 0x592   :  { %5847 = vmatpush3.bf16.msra.mxu0 %v6711_v25  ;;  %5524 = vmatprep.mubr.msk.f32.mxu0 %vm6517_vm0, %v7729_v0 }
 0x593   :  { %5848 = vmatprep.subr.bf16.mxu0 %v7727_v1 }
 0x596   :  { %5850 = vmatpush3.bf16.msra.mxu0 %v6720_v31 }
 0x597   :  { %5859 = vmatprep.subr.bf16.mxu0 %v7727_v1 }
 0x664   :  { %v1007_v39 = vpop.f32.mrb[4].mxu0 }
 0x665   :  { %v6922_v41 = vadd.f32 %v6919_v36, %v1007_v39  ;;  %v5515_v25 = vpop.f32.mrb[5].mxu0 }
 0x667   :  { %v1012_v48 = vsel %vm1011_vm6, %v6922_v41, -inf }
 0x668   :  { %1013 = vmax.xlane.f32.xlu1 %v1012_v48 }
 0x6f5   :  { %v6926_v49 = vpop.xlane.xlu1 %1013 }
 0x6f6   :  { %vm1026_vm7 = vcmp.eq.f32.partialorder %v6922_v41, %v6926_v49 }
 0x6f7   :  { %v1027_v31 = vsel %vm1026_vm7, %v6822_v12, 32 }
 0x6f8   :  { %v1028_v51 = vsel %vm1011_vm6, %v1027_v31, 2147483647 }
 0x6f9   :  { %v1030_v54 = vshra.s32 %v1028_v51, 16  ;;  %v1029_v57 = vand.u32 65535, %v1028_v51 }
 0x6fb   :  { %v1032_v56 = vcvt.s32.f32 %v1030_v54  ;;  %v1031_v61 = vcvt.s32.f32 %v1029_v57 }
 0x6fd   :  { %1033 = vmin.xlane.f32.xlu0 %v1032_v56 }
 0x78a   :  { %v1034_v58 = vpop.xlane.xlu0 %1033 }
 0x78b   :  { %vm1035_vm8 = vcmp.eq.f32.partialorder %v1032_v56, %v1034_v58  ;;  %v1040_v2 = vcvt.f32.s32 %v1034_v58 }
 0x78c   :  { %v1036_v62 = vsel %vm1035_vm8, %v1031_v61, inf }
 0x78d   :  { %1037 = vmin.xlane.f32.xlu1 %v1036_v62  ;;  %v1041_v4 = vshll.u32 %v1040_v2, 16 }
 0x81a   :  { %v1038_v46 = vpop.xlane.xlu1 %1037 }
 0x81b   :  { %v1039_v6 = vcvt.f32.s32 %v1038_v46 }
 0x81d   :  { %v1042_v7 = vadd.s32 %v1041_v4, %v1039_v6 }
 0x81f   :  { %vm1043_vm9 = vcmp.eq.s32.totalorder %v6822_v12, %v1042_v7 }
 0x820   :  { %v5261_v13 = vsel %vm1043_vm9, 1.0, %v7729_v0 }
 0x821   :  { %5262 = vmatmul.mubr.msk.f32.vlgmr.msra.gmra.mrb[6].mxu1 %vm181_vm1, %v5261_v13  ;;  %5525 = vmatmul.mubr.msk.f32.vlgmr.msra.gmra.mrb[6].mxu0 %vm181_vm1, %v5261_v13 }
 0x822   :  { %5861 = vmatpush3.bf16.msra.mxu0 %v6730_v35  ;;  %5854 = vmatpush1.bf16.msra.mxu1 %v6714_v27 }
 0x823   :  { %5862 = vmatprep.subr.bf16.mxu0 %v7727_v1  ;;  %5856 = vmatprep.subr.bf16.mxu1 %v6717_v28 }
 0x824   :  { %5535 = vmatprep.mubr.msk.f32.mxu0 %vm6517_vm0, %v7729_v0  ;;  %1278 = vmatprep.mubr.f32.mxu1 %v7729_v0 }
 0x826   :  { %5864 = vmatpush3.bf16.msra.mxu0 %v6736_v38  ;;  %5858 = vmatpush1.bf16.msra.mxu1 %v6725_v34 }
 0x827   :  { %5865 = vmatprep.subr.bf16.mxu1 %v7727_v1  ;;  %5871 = vmatprep.subr.bf16.mxu0 %v7727_v1 }
 0x829   :  { %5536 = vmatmul.mubr.msk.f32.vlgmr.msra.gmra.mrb[8].mxu0 %vm181_vm1, %v6791_v37  ;;  %5264 = vmatmul.mubr.msk.f32.vlgmr.msra.gmra.mrb[6].mxu1 %vm181_vm1, %v6791_v37 }
 0x82a   :  { %5867 = vmatpush3.bf16.msra.mxu1 %v6750_v42  ;;  %5546 = vmatprep.mubr.msk.f32.mxu1 %vm6517_vm0, %v7729_v0 }
 0x82b   :  { %5868 = vmatprep.subr.bf16.mxu1 %v7727_v1  ;;  %5873 = vmatpush3.bf16.msra.mxu0 %v6857_v63 }
 0x82c   :  { %5874 = vmatprep.subr.bf16.mxu0 %v7727_v1  ;;  %5557 = vmatprep.mubr.msk.f32.mxu0 %vm6517_vm0, %v7729_v0 }
 0x82e   :  { %5870 = vmatpush3.bf16.msra.mxu1 %v6753_v44 }
 0x82f   :  { %5876 = vmatpush3.bf16.msra.mxu0 %v6861_v3  ;;  %5877 = vmatprep.subr.bf16.mxu1 %v7727_v1 }
 0x8f4   :  { %v1198_v27 = vpop.f32.mrb[6].mxu0 }
 0x8f5   :  { %v5526_v28 = vpop.f32.mrb[7].mxu0  ;;  %v1199_v9 = vadd.f32 %v1198_v27, %v6784_v14 }
 0x8fc   :  { %v1351_v34 = vpop.f32.mrb[8].mxu0  ;;  %v1280_v35 = vpop.f32.mrb[6].mxu1 }
 0x8fd   :  { %v6072_v38 = vadd.f32 %v6771_v55, %v1280_v35  ;;  %v5537_v42 = vpop.f32.mrb[9].mxu0  ;;  %v1282_v19 = vpop.f32.mrb[7].mxu1  ;;  %v1352_v23 = vadd.f32 %v1351_v34, %v6781_v11 }
 0x8fe   :  { %v6074_v17 = vadd.f32 %v6773_v59, %v1282_v19 }
 0x8ff   :  { %v5266_v63 = vmul.f32 -1.442695, %v6072_v38 }
 0x900   :  { %v5267_v20 = vmul.f32 -1.442695, %v6074_v17 }
 0x901   :  { %6147 = vpow2.f32 %v5266_v63 }
 0x902   :  { %6149 = vpow2.f32 %v5267_v20 }
 0x90b   :  { %v6148_v22 = vpop.eup %6147 }
 0x90c   :  { %v1359_v44 = vadd.f32 1.0, %v6148_v22  ;;  %v6150_v3 = vpop.eup %6149 }
 0x90d   :  { %v1366_v21 = vadd.f32 1.0, %v6150_v3 }
 0x90e   :  { %6151 = vrcp.f32 %v1359_v44 }
 0x90f   :  { %6153 = vrcp.f32 %v1366_v21 }
 0x918   :  { %v6152_v45 = vpop.eup %6151 }
 0x919   :  { %v1369_v10 = vmul.f32 %v6152_v45, %v1352_v23  ;;  %v6154_v5 = vpop.eup %6153 }
 0x91a   :  { %v1372_v29 = vsub.f32 1.0, %v6154_v5  ;;  %v1374_v39 = vmul.f32 %v6154_v5, %v6791_v37 }
 0x91b   :  { %v1370_v26 = vadd.f32 %v1369_v10, %v1199_v9 }
 0x91d   :  { %6155 = vtanh.f32 %v1370_v26 }
 0x927   :  { %v6156_v30 = vpop.eup %6155 }
 0x928   :  { %v1373_v33 = vmul.f32 %v6156_v30, %v1372_v29 }
 0x92a   :  { %v6967_v25 = vadd.f32 %v1374_v39, %v1373_v33 }
 0x92c   :  { %5547 = vmatmul.mubr.msk.f32.vlgmr.msra.gmra.mrb[8].mxu1 %vm181_vm1, %v6967_v25  ;;  %v1383_v48 = vrot.slane %v6967_v25, %v6789_v32 }
 0x92d   :  { %5879 = vmatpush3.bf16.msra.mxu1 %v6891_v24  ;;  %5568 = vmatprep.mubr.msk.f32.mxu1 %vm6517_vm0, %v7729_v0 }
 0x92e   :  { %v1391_v31 = vrot.slane %v1383_v48, %v6789_v32  ;;  %v1384_v51 = vcombine.high %v1383_v48, %v1383_v48  ;;  %5880 = vmatprep.subr.bf16.mxu1 %v7727_v1 }
 0x930   :  { %v1404_v37 = vrot.slane %v1391_v31, %v6762_v47  ;;  %v1398_v54 = vrot.slane %v1384_v51, %v6789_v32  ;;  %v1399_v56 = vcombine.high %v1391_v31, %v1391_v31 }
 0x931   :  { %5882 = vmatpush3.bf16.msra.mxu1 %v6897_v15 }
 0x932   :  { %v1421_v57 = vmul.f32 %v1404_v37, %v6800_v43  ;;  %v1408_v58 = vrot.slane %v1398_v54, %v6762_v47  ;;  %5891 = vmatprep.subr.bf16.mxu1 %v7727_v1  ;;  %v1412_v62 = vrot.slane %v1399_v56, %v6762_v47  ;;  %v1400_v2 = vcombine.high %v1398_v54, %v1398_v54 }
 0x934   :  { %v1425_v24 = vsel %vm181_vm1, %v1421_v57, 0.0  ;;  %v1422_v61 = vmul.f32 %v1408_v58, %v6806_v53  ;;  %v1423_v4 = vmul.f32 %v1412_v62, %v6804_v52  ;;  %v1416_v15 = vrot.slane %v1400_v2, %v6762_v47 }
 0x935   :  { %1426 = vadd.xlane.f32.xlu1 %v1425_v24 }
 0x936   :  { %v1428_v46 = vsel %vm181_vm1, %v1422_v61, 0.0  ;;  %v1431_v6 = vsel %vm181_vm1, %v1423_v4, 0.0  ;;  %v1424_v7 = vmul.f32 %v1416_v15, %v6811_v60 }
 0x938   :  { %v1434_v13 = vsel %vm181_vm1, %v1424_v7, 0.0 }
 0x939   :  { %1429 = vadd.xlane.f32.xlu1 %v1428_v46 }
 0x93d   :  { %1432 = vadd.xlane.f32.xlu1 %v1431_v6 }
 0x941   :  { %1435 = vadd.xlane.f32.xlu1 %v1434_v13 }
 0x9c2   :  { %v1427_v27 = vpop.xlane.xlu1 %1426 }
 0x9c3   :  { %v1444_v42 = vrot.slane %v1427_v27, %v6826_v16 }
 0x9c6   :  { %v1430_v28 = vpop.xlane.xlu1 %1429 }
 0x9c7   :  { %v1448_v35 = vrot.slane %v1430_v28, %v6826_v16 }
 0x9c9   :  { %v1457_v17 = vsel %vm600_vm2, %v1448_v35, %v1444_v42 }
 0x9ca   :  { %v1433_v34 = vpop.xlane.xlu1 %1432 }
 0x9cb   :  { %v1452_v38 = vrot.slane %v1433_v34, %v6826_v16 }
 0x9cd   :  { %v1458_v20 = vsel %vm602_vm3, %v1452_v38, %v1457_v17 }
 0x9ce   :  { %v1436_v19 = vpop.xlane.xlu1 %1435 }
 0x9cf   :  { %v1456_v63 = vrot.slane %v1436_v19, %v6826_v16 }
 0x9d1   :  { %v1459_v22 = vsel %vm604_vm4, %v1456_v63, %v1458_v20 }
 0x9d2   :  { %v1461_v44 = vsel %vm607_vm5, %v1459_v22, -inf }
 0x9d3   :  { %1462 = vmax.xlane.f32.xlu1 %v1461_v44 }
 0x9ff   :  { %v7001_v3 = vpop.f32.mrb[8].mxu1 }
 0xa00   :  { %v5548_v21 = vpop.f32.mrb[9].mxu1 }
 0xa60   :  { %v1463_v23 = vpop.xlane.xlu1 %1462 }
 0xa61   :  { %v1468_v45 = vrot.slane %v1463_v23, %v6762_v47  ;;  %v1472_v9 = vrot.slane %v1463_v23, %v6765_v50  ;;  %v1476_v10 = vrot.slane %v1463_v23, %v6778_v8  ;;  %v1480_v26 = vrot.slane %v1463_v23, %v6839_v40 }
 0xa63   :  { %v1485_v5 = vsub.f32 %v1427_v27, %v1468_v45  ;;  %v1486_v29 = vsub.f32 %v1430_v28, %v1472_v9  ;;  %v1487_v30 = vsub.f32 %v1433_v34, %v1476_v10  ;;  %v1488_v48 = vsub.f32 %v1436_v19, %v1480_v26 }
 0xa65   :  { %v1489_v33 = vmul.f32 1.442695, %v1485_v5  ;;  %v1491_v39 = vmul.f32 1.442695, %v1486_v29  ;;  %v1493_v31 = vmul.f32 1.442695, %v1487_v30 }
 0xa66   :  { %v1495_v51 = vmul.f32 1.442695, %v1488_v48 }
 0xa67   :  { %6157 = vpow2.f32 %v1489_v33 }
 0xa68   :  { %6159 = vpow2.f32 %v1491_v39 }
 0xa69   :  { %6161 = vpow2.f32 %v1493_v31 }
 0xa6a   :  { %6163 = vpow2.f32 %v1495_v51 }
 0xa71   :  { %v6158_v37 = vpop.eup %6157 }
 0xa72   :  { %v6160_v54 = vpop.eup %6159  ;;  %1502 = vperm.xlu1 %6123, %v6158_v37  }
 0xa73   :  { %1505 = vperm.xlu0 %6124, %v6160_v54   ;;  %v6162_v56 = vpop.eup %6161 }
 0xa74   :  { %v6164_v57 = vpop.eup %6163 }
 0xa76   :  { %1508 = vperm.xlu1 %6123, %v6162_v56  }
 0xa7a   :  { %1511 = vperm.xlu1 %6123, %v6164_v57  }
 0xaf1   :  { %v1503_v58 = vpop.permute.xlu1 %1502 }
 0xaf2   :  { %v1506_v24 = vpop.permute.xlu0 %1505  ;;  %v1516_v2 = vrot.slane %v1503_v58, %v6826_v16 }
 0xaf3   :  { %v1520_v62 = vrot.slane %v1506_v24, %v6826_v16 }
 0xaf5   :  { %v1509_v61 = vpop.permute.xlu1 %1508  ;;  %v1529_v15 = vsel %vm600_vm2, %v1520_v62, %v1516_v2 }
 0xaf6   :  { %v1524_v46 = vrot.slane %v1509_v61, %v6826_v16 }
 0xaf8   :  { %v1530_v7 = vsel %vm602_vm3, %v1524_v46, %v1529_v15 }
 0xaf9   :  { %v1512_v4 = vpop.permute.xlu1 %1511 }
 0xafa   :  { %v1528_v6 = vrot.slane %v1512_v4, %v6826_v16 }
 0xafc   :  { %v1531_v13 = vsel %vm604_vm4, %v1528_v6, %v1530_v7 }
 0xafd   :  { %v1533_v27 = vsel %vm607_vm5, %v1531_v13, 0.0 }
 0xafe   :  { %1534 = vadd.xlane.f32.xlu1 %v1533_v27 }
 0xb8b   :  { %v1535_v28 = vpop.xlane.xlu1 %1534 }
 0xb8c   :  { %6165 = vrcp.f32 %v1535_v28 }
 0xb96   :  { %v6166_v34 = vpop.eup %6165 }
 0xb97   :  { %v1541_v35 = vrot.slane %v6166_v34, %v6762_v47  ;;  %v1545_v42 = vrot.slane %v6166_v34, %v6765_v50  ;;  %v1549_v63 = vrot.slane %v6166_v34, %v6778_v8  ;;  %v1553_v20 = vrot.slane %v6166_v34, %v6839_v40 }
 0xb99   :  { %v1558_v38 = vmul.f32 %v6158_v37, %v1541_v35  ;;  %v1559_v19 = vmul.f32 %v6160_v54, %v1545_v42  ;;  %v1560_v17 = vmul.f32 %v6162_v56, %v1549_v63  ;;  %v1561_v22 = vmul.f32 %v6164_v57, %v1553_v20 }
 0xb9b   :  { %1564 = vperm.xlu0 %6124, %v1558_v38  }
 0xb9f   :  { %1569 = vperm.xlu0 %6124, %v1559_v19  }
 0xba3   :  { %1574 = vperm.xlu0 %6124, %v1560_v17  }
 0xba7   :  { %1579 = vperm.xlu0 %6124, %v1561_v22  }
 0xc1a   :  { %v1565_v44 = vpop.permute.xlu0 %1564 }
 0xc1b   :  { %v1582_v21 = vmul.f32 %v1565_v44, %v6800_v43 }
 0xc1d   :  { %v1586_v23 = vsel %vm181_vm1, %v1582_v21, 0.0 }
 0xc1e   :  { %v1587_v45 = vrot.slane %v1586_v23, 4  ;;  %v1570_v9 = vpop.permute.xlu0 %1569 }
 0xc1f   :  { %v1583_v10 = vmul.f32 %v1570_v9, %v6806_v53 }
 0xc20   :  { %v1588_v5 = vadd.f32 %v1587_v45, %v1586_v23 }
 0xc21   :  { %v1593_v26 = vsel %vm181_vm1, %v1583_v10, 0.0 }
 0xc22   :  { %v1594_v29 = vrot.slane %v1593_v26, 4  ;;  %v1575_v30 = vpop.permute.xlu0 %1574  ;;  %v1589_v31 = vrot.slane %v1588_v5, 2 }
 0xc23   :  { %v1584_v33 = vmul.f32 %v1575_v30, %v6804_v52  ;;  %v1892_v30 = vld [vmem:[#allocation7 + $0x28] sm:$0xff] }
 0xc24   :  { %v1595_v39 = vadd.f32 %v1594_v29, %v1593_v26  ;;  %v1590_v58 = vadd.f32 %v1589_v31, %v1588_v5  ;;  %v1888_v26 = vld [vmem:[#allocation7 + $0x8] sm:$0xff]  ;;  %v1889_v5 = vld [vmem:[#allocation7 + $0x10] sm:$0xff] }
 0xc25   :  { %v1600_v48 = vsel %vm181_vm1, %v1584_v33, 0.0  ;;  %v1887_v33 = vld [vmem:[#allocation7] sm:$0xff] }
 0xc26   :  { %v1596_v51 = vrot.slane %v1595_v39, 2  ;;  %v1601_v37 = vrot.slane %v1600_v48, 4  ;;  %v1580_v43 = vpop.permute.xlu0 %1579  ;;  %v1591_v52 = vrot.slane %v1590_v58, 1 }
 0xc27   :  { %v1585_v54 = vmul.f32 %v1580_v43, %v6811_v60 }
 0xc28   :  { %v1597_v56 = vadd.f32 %v1596_v51, %v1595_v39  ;;  %v1602_v57 = vadd.f32 %v1601_v37, %v1600_v48  ;;  %v1592_v27 = vadd.f32 %v1591_v52, %v1590_v58  ;;  %v1890_v39 = vld [vmem:[#allocation7 + $0x18] sm:$0xff]  ;;  %v7050_v48 = vpack.c.bf16 %v1892_v30, %v1889_v5  ;;  %v2044_v52 = vld [vmem:[#allocation8 + $0x8] sm:$0xff] }
 0xc29   :  { %v1607_v53 = vsel %vm181_vm1, %v1585_v54, 0.0  ;;  %v7052_v31 = vpack.c.bf16 %v1890_v39, %v1887_v33  ;;  %v2461_v5 = vld [vmem:[#allocation14 + $0x10] sm:$0xff]  ;;  %v2462_v33 = vld [vmem:[#allocation14 + $0x18] sm:$0xff] }
 0xc2a   :  { %v1603_v24 = vrot.slane %v1602_v57, 2  ;;  %v1608_v61 = vrot.slane %v1607_v53, 4  ;;  %v1598_v62 = vrot.slane %v1597_v56, 1  ;;  %v7107_v39 = vpack.c.bf16 %v2462_v33, %v2461_v5 }
 0xc2c   :  { %v1604_v2 = vadd.f32 %v1603_v24, %v1602_v57  ;;  %v1609_v46 = vadd.f32 %v1608_v61, %v1607_v53  ;;  %v1599_v6 = vadd.f32 %v1598_v62, %v1597_v56  ;;  %v1894_v56 = vld [vmem:[#allocation7 + $0x38] sm:$0xff]  ;;  %v1897_v57 = vld [vmem:[#allocation7 + $0x50] sm:$0xff]  ;;  %v1895_v53 = vld [vmem:[#allocation7 + $0x40] sm:$0xff] }
 0xc2d   :  { %v7058_v58 = vpack.c.bf16 %v1897_v57, %v1894_v56  ;;  %v1898_v24 = vld [vmem:[#allocation7 + $0x58] sm:$0xff]  ;;  %v1893_v61 = vld [vmem:[#allocation7 + $0x30] sm:$0xff]  ;;  %v1896_v62 = vld [vmem:[#allocation7 + $0x48] sm:$0xff] }
 0xc2e   :  { %v1605_v4 = vrot.slane %v1604_v2, 1  ;;  %v1610_v15 = vrot.slane %v1609_v46, 2  ;;  %v1698_v60 = vsel %vm600_vm2, %v1599_v6, %v1592_v27 }
 0xc30   :  { %v1611_v7 = vadd.f32 %v1610_v15, %v1609_v46  ;;  %v1606_v13 = vadd.f32 %v1605_v4, %v1604_v2  ;;  %v7060_v2 = vpack.c.bf16 %v1898_v24, %v1895_v53  ;;  %v7062_v46 = vpack.c.bf16 %v1896_v62, %v1893_v61  ;;  %v2047_v4 = vld [vmem:[#allocation8 + $0x20] sm:$0xff] }
 0xc31   :  { %v7068_v15 = vpack.c.bf16 %v2047_v4, %v2044_v52 }
 0xc32   :  { %v1612_v28 = vrot.slane %v1611_v7, 1  ;;  %v1699_v35 = vsel %vm602_vm3, %v1606_v13, %v1698_v60  ;;  %v2045_v13 = vld [vmem:[#allocation8 + $0x10] sm:$0xff]  ;;  %v2043_v60 = vld [vmem:[#allocation8] sm:$0xff] }
 0xc34   :  { %v1613_v34 = vadd.f32 %v1612_v28, %v1611_v7 }
 0xc36   :  { %v1700_v38 = vsel %vm604_vm4, %v1613_v34, %v1699_v35  ;;  %v2048_v34 = vld [vmem:[#allocation8 + $0x28] sm:$0xff]  ;;  %v2046_v35 = vld [vmem:[#allocation8 + $0x18] sm:$0xff] }
 0xc37   :  { %5558 = vmatmul.mubr.msk.f32.vlgmr.msra.gmra.mrb[10].mxu0 %vm181_vm1, %v1700_v38  ;;  %v2050_v38 = vld [vmem:[#allocation8 + $0x38] sm:$0xff] }
 0xc38   :  { %1966 = vmatprep.mubr.f32.mxu0 %v7729_v0 }
 0xd0a   :  { %v1769_v42 = vpop.f32.mrb[10].mxu0 }
 0xd0b   :  { %v1770_v19 = vadd.f32 %v1769_v42, %v7001_v3  ;;  %v5559_v63 = vpop.f32.mrb[11].mxu0  ;;  %v2053_v42 = vld [vmem:[#allocation8 + $0x50] sm:$0xff] }
 0xd0c   :  { %v7071_v63 = vpack.c.bf16 %v2048_v34, %v2045_v13 }
 0xd0d   :  { %v1773_v17 = vadd.f32 %v6905_v18, %v1770_v19 }
 0xd0f   :  { %6167 = vtanh.f32 %v1773_v17  ;;  %v7073_v17 = vpack.c.bf16 %v2046_v35, %v2043_v60 }
 0xd19   :  { %v6168_v20 = vpop.eup %6167 }
 0xd1a   :  { %5569 = vmatmul.mubr.msk.f32.vlgmr.msra.gmra.mrb[10].mxu1 %vm181_vm1, %v6168_v20  ;;  %v2051_v20 = vld [vmem:[#allocation8 + $0x40] sm:$0xff] }
 0xd1b   :  { %5579 = vmatprep.mubr.msk.f32.mxu1 %vm6517_vm0, %v7729_v0  ;;  %5893 = vmatpush3.bf16.msra.mxu1 %v7050_v48 }
 0xd1c   :  { %5894 = vmatprep.subr.bf16.mxu1 %v7727_v1 }
 0xd1f   :  { %5896 = vmatpush3.bf16.msra.mxu1 %v7060_v2 }
 0xd20   :  { %5905 = vmatprep.subr.bf16.mxu1 %v7727_v1 }
 0xded   :  { %v1848_v22 = vpop.f32.mrb[10].mxu1 }
 0xdee   :  { %v7038_v44 = vadd.f32 %v6919_v36, %v1848_v22  ;;  %v5570_v21 = vpop.f32.mrb[11].mxu1  ;;  %v1891_v36 = vld [vmem:[#allocation7 + $0x20] sm:$0xff]  ;;  %v7076_v22 = vpack.c.bf16 %v2053_v42, %v2050_v38 }
 0xdef   :  { %v7048_v29 = vpack.c.bf16 %v1891_v36, %v1888_v26  ;;  %v2054_v21 = vld [vmem:[#allocation8 + $0x58] sm:$0xff]  ;;  %v2459_v26 = vld [vmem:[#allocation14] sm:$0xff]  ;;  %v2460_v36 = vld [vmem:[#allocation14 + $0x8] sm:$0xff] }
 0xdf0   :  { %v1852_v23 = vsel %vm1011_vm6, %v7038_v44, -inf  ;;  %v7104_v30 = vpack.c.bf16 %v2460_v36, %v2459_v26 }
 0xdf1   :  { %1853 = vmax.xlane.f32.xlu0 %v1852_v23  ;;  %5884 = vmatprep.subr.bf16.mxu0 %v7048_v29  ;;  %v2049_v23 = vld [vmem:[#allocation8 + $0x30] sm:$0xff] }
 0xdf2   :  { %5886 = vmatpush1.bf16.msra.mxu0 %v7052_v31 }
 0xdf3   :  { %5888 = vmatprep.subr.bf16.mxu0 %v7058_v58 }
 0xdf6   :  { %5890 = vmatpush1.bf16.msra.mxu0 %v7062_v46 }
 0xdf7   :  { %5898 = vmatprep.subr.bf16.mxu0 %v7068_v15 }
 0xe7e   :  { %v7042_v3 = vpop.xlane.xlu0 %1853 }
 0xe7f   :  { %vm1867_vm10 = vcmp.eq.f32.partialorder %v7038_v44, %v7042_v3 }
 0xe80   :  { %v1868_v18 = vsel %vm1867_vm10, %v6822_v12, 32 }
 0xe81   :  { %v1869_v45 = vsel %vm1011_vm6, %v1868_v18, 2147483647  ;;  %v2052_v18 = vld [vmem:[#allocation8 + $0x48] sm:$0xff] }
 0xe82   :  { %v1871_v9 = vshra.s32 %v1869_v45, 16  ;;  %v1870_v51 = vand.u32 65535, %v1869_v45 }
 0xe84   :  { %v1873_v10 = vcvt.s32.f32 %v1871_v9  ;;  %v1872_v43 = vcvt.s32.f32 %v1870_v51  ;;  %v7083_v9 = vpack.c.bf16 %v2054_v21, %v2051_v20 }
 0xe86   :  { %1874 = vmin.xlane.f32.xlu1 %v1873_v10 }
 0xf13   :  { %v1875_v37 = vpop.xlane.xlu1 %1874 }
 0xf14   :  { %vm1876_vm11 = vcmp.eq.f32.partialorder %v1873_v10, %v1875_v37  ;;  %v1881_v6 = vcvt.f32.s32 %v1875_v37  ;;  %v7085_v10 = vpack.c.bf16 %v2052_v18, %v2049_v23 }
 0xf15   :  { %v1877_v54 = vsel %vm1876_vm11, %v1872_v43, inf }
 0xf16   :  { %1878 = vmin.xlane.f32.xlu1 %v1877_v54  ;;  %v1882_v27 = vshll.u32 %v1881_v6, 16 }
 0xfa3   :  { %v1879_v7 = vpop.xlane.xlu1 %1878 }
 0xfa4   :  { %v1880_v28 = vcvt.f32.s32 %v1879_v7 }
 0xfa6   :  { %v1883_v19 = vadd.s32 %v1882_v27, %v1880_v28 }
 0xfa8   :  { %vm1884_vm12 = vcmp.eq.s32.totalorder %v6822_v12, %v1883_v19 }
 0xfa9   :  { %v5271_v45 = vsel %vm1884_vm12, 1.0, %v7729_v0 }
 0xfaa   :  { %5272 = vmatmul.mubr.msk.f32.vlgmr.msra.gmra.mrb[12].mxu0 %vm181_vm1, %v5271_v45  ;;  %5580 = vmatmul.mubr.msk.f32.vlgmr.msra.gmra.mrb[12].mxu1 %vm181_vm1, %v5271_v45 }
 0xfab   :  { %5907 = vmatpush3.bf16.msra.mxu1 %v7071_v63  ;;  %5900 = vmatpush1.bf16.msra.mxu0 %v7073_v17 }
 0xfac   :  { %5908 = vmatprep.subr.bf16.mxu1 %v7727_v1  ;;  %5902 = vmatprep.subr.bf16.mxu0 %v7076_v22 }
 0xfad   :  { %5590 = vmatprep.mubr.msk.f32.mxu1 %vm6517_vm0, %v7729_v0  ;;  %2119 = vmatprep.mubr.f32.mxu0 %v7729_v0 }
 0xfaf   :  { %5910 = vmatpush3.bf16.msra.mxu1 %v7083_v9  ;;  %5904 = vmatpush1.bf16.msra.mxu0 %v7085_v10 }
 0xfb0   :  { %5911 = vmatprep.subr.bf16.mxu0 %v7727_v1  ;;  %5917 = vmatprep.subr.bf16.mxu1 %v7727_v1 }
 0xfb2   :  { %5591 = vmatmul.mubr.msk.f32.vlgmr.msra.gmra.mrb[14].mxu1 %vm181_vm1, %v6967_v25  ;;  %5274 = vmatmul.mubr.msk.f32.vlgmr.msra.gmra.mrb[12].mxu0 %vm181_vm1, %v6967_v25 }
 0xfb3   :  { %5601 = vmatprep.mubr.msk.f32.mxu0 %vm6517_vm0, %v7729_v0  ;;  %5612 = vmatprep.mubr.msk.f32.mxu1 %vm6517_vm0, %v7729_v0 }
 0xfb4   :  { %5913 = vmatpush3.bf16.msra.mxu0 %v7104_v30 }
 0xfb5   :  { %5914 = vmatprep.subr.bf16.mxu0 %v7727_v1 }
 0xfb8   :  { %5916 = vmatpush3.bf16.msra.mxu0 %v7107_v39 }
 0xfb9   :  { %5923 = vmatprep.subr.bf16.mxu0 %v7727_v1 }
0x107d   :  { %v2039_v51 = vpop.f32.mrb[12].mxu1 }
0x107e   :  { %v5581_v37 = vpop.f32.mrb[13].mxu1  ;;  %v2040_v28 = vadd.f32 %v2039_v51, %v6784_v14 }
0x1085   :  { %v2192_v43 = vpop.f32.mrb[14].mxu1  ;;  %v2121_v54 = vpop.f32.mrb[12].mxu0 }
0x1086   :  { %v6076_v56 = vadd.f32 %v6771_v55, %v2121_v54  ;;  %v5592_v57 = vpop.f32.mrb[15].mxu1  ;;  %v2123_v53 = vpop.f32.mrb[13].mxu0  ;;  %v2193_v13 = vadd.f32 %v2192_v43, %v6781_v11 }
0x1087   :  { %v6078_v61 = vadd.f32 %v6773_v59, %v2123_v53  ;;  %v7137_v53 = vld [vmem:[#allocation5 + $0x8] sm:$0xff] }
0x1088   :  { %v5276_v24 = vmul.f32 -1.442695, %v6076_v56  ;;  %v7134_v56 = vld [vmem:[#allocation5 + $0x10] sm:$0xff] }
0x1089   :  { %v5277_v62 = vmul.f32 -1.442695, %v6078_v61 }
0x108a   :  { %6169 = vpow2.f32 %v5276_v24 }
0x108b   :  { %6171 = vpow2.f32 %v5277_v62 }
0x1094   :  { %v6170_v52 = vpop.eup %6169 }
0x1095   :  { %v2200_v4 = vadd.f32 1.0, %v6170_v52  ;;  %v6172_v6 = vpop.eup %6171 }
0x1096   :  { %v2207_v7 = vadd.f32 1.0, %v6172_v6 }
0x1097   :  { %6173 = vrcp.f32 %v2200_v4  ;;  %v7143_v4 = vld [vmem:[#allocation5 + $0x18] sm:$0xff] }
0x1098   :  { %6175 = vrcp.f32 %v2207_v7 }
0x10a1   :  { %v6174_v27 = vpop.eup %6173 }
0x10a2   :  { %v2210_v34 = vmul.f32 %v6174_v27, %v2193_v13  ;;  %v6176_v35 = vpop.eup %6175 }
0x10a3   :  { %v2213_v38 = vsub.f32 1.0, %v6176_v35  ;;  %v2215_v20 = vmul.f32 %v6176_v35, %v6967_v25  ;;  %v7128_v25 = vld [vmem:[#allocation5] sm:$0xff] }
0x10a4   :  { %v2211_v60 = vadd.f32 %v2210_v34, %v2040_v28 }
0x10a6   :  { %6177 = vtanh.f32 %v2211_v60 }
0x10b0   :  { %v6178_v42 = vpop.eup %6177 }
0x10b1   :  { %v2214_v19 = vmul.f32 %v6178_v42, %v2213_v38 }
0x10b3   :  { %v7117_v21 = vadd.f32 %v2215_v20, %v2214_v19 }
0x10b5   :  { %5602 = vmatmul.mubr.msk.f32.vlgmr.msra.gmra.mrb[14].mxu0 %vm181_vm1, %v7117_v21  ;;  %v2224_v23 = vrot.slane %v7117_v21, %v6789_v32 }
0x10b6   :  { %5623 = vmatprep.mubr.msk.f32.mxu0 %vm6517_vm0, %v7729_v0 }
0x10b7   :  { %v2232_v18 = vrot.slane %v2224_v23, %v6789_v32  ;;  %v2225_v45 = vcombine.high %v2224_v23, %v2224_v23 }
0x10b9   :  { %v2245_v26 = vrot.slane %v2232_v18, %v6762_v47  ;;  %v2240_v36 = vcombine.high %v2232_v18, %v2232_v18  ;;  %v2239_v5 = vrot.slane %v2225_v45, %v6789_v32 }
0x10bb   :  { %v2262_v33 = vmul.f32 %v7128_v25, %v2245_v26  ;;  %v2253_v51 = vrot.slane %v2240_v36, %v6762_v47  ;;  %v2249_v37 = vrot.slane %v2239_v5, %v6762_v47  ;;  %v2241_v43 = vcombine.high %v2239_v5, %v2239_v5 }
0x10bd   :  { %v2266_v54 = vsel %vm181_vm1, %v2262_v33, 0.0  ;;  %v2264_v57 = vmul.f32 %v7134_v56, %v2253_v51  ;;  %v2263_v24 = vmul.f32 %v7137_v53, %v2249_v37  ;;  %v2257_v61 = vrot.slane %v2241_v43, %v6762_v47 }
0x10be   :  { %2267 = vadd.xlane.f32.xlu1 %v2266_v54 }
0x10bf   :  { %v2272_v62 = vsel %vm181_vm1, %v2264_v57, 0.0  ;;  %v2269_v52 = vsel %vm181_vm1, %v2263_v24, 0.0  ;;  %v2265_v6 = vmul.f32 %v7143_v4, %v2257_v61 }
0x10c0   :  { %2273 = vadd.xlane.f32.xlu0 %v2272_v62 }
0x10c1   :  { %v2275_v7 = vsel %vm181_vm1, %v2265_v6, 0.0 }
0x10c2   :  { %2270 = vadd.xlane.f32.xlu1 %v2269_v52 }
0x10c6   :  { %2276 = vadd.xlane.f32.xlu1 %v2275_v7 }
0x114b   :  { %v2268_v13 = vpop.xlane.xlu1 %2267 }
0x114c   :  { %v2285_v28 = vrot.slane %v2268_v13, %v6826_v16 }
0x114d   :  { %v2274_v34 = vpop.xlane.xlu0 %2273 }
0x114e   :  { %v2293_v38 = vrot.slane %v2274_v34, %v6826_v16 }
0x114f   :  { %v2271_v27 = vpop.xlane.xlu1 %2270 }
0x1150   :  { %v2289_v60 = vrot.slane %v2271_v27, %v6826_v16 }
0x1152   :  { %v2298_v35 = vsel %vm600_vm2, %v2289_v60, %v2285_v28 }
0x1153   :  { %v2277_v42 = vpop.xlane.xlu1 %2276  ;;  %v2299_v20 = vsel %vm602_vm3, %v2293_v38, %v2298_v35 }
0x1154   :  { %v2297_v19 = vrot.slane %v2277_v42, %v6826_v16 }
0x1156   :  { %v2300_v23 = vsel %vm604_vm4, %v2297_v19, %v2299_v20 }
0x1157   :  { %v2302_v18 = vsel %vm607_vm5, %v2300_v23, -inf }
0x1158   :  { %2303 = vmax.xlane.f32.xlu0 %v2302_v18 }
0x1188   :  { %v7155_v45 = vpop.f32.mrb[14].mxu0 }
0x1189   :  { %v5603_v26 = vpop.f32.mrb[15].mxu0 }
0x11e5   :  { %v2304_v36 = vpop.xlane.xlu0 %2303 }
0x11e6   :  { %v2309_v5 = vrot.slane %v2304_v36, %v6762_v47  ;;  %v2313_v33 = vrot.slane %v2304_v36, %v6765_v50  ;;  %v2317_v51 = vrot.slane %v2304_v36, %v6778_v8  ;;  %v2321_v37 = vrot.slane %v2304_v36, %v6839_v40 }
0x11e8   :  { %v2326_v43 = vsub.f32 %v2268_v13, %v2309_v5  ;;  %v2327_v54 = vsub.f32 %v2271_v27, %v2313_v33  ;;  %v2328_v57 = vsub.f32 %v2274_v34, %v2317_v51  ;;  %v2329_v62 = vsub.f32 %v2277_v42, %v2321_v37 }
0x11ea   :  { %v2330_v24 = vmul.f32 1.442695, %v2326_v43  ;;  %v2332_v61 = vmul.f32 1.442695, %v2327_v54  ;;  %v2334_v52 = vmul.f32 1.442695, %v2328_v57 }
0x11eb   :  { %v2336_v6 = vmul.f32 1.442695, %v2329_v62 }
0x11ec   :  { %6179 = vpow2.f32 %v2330_v24 }
0x11ed   :  { %6181 = vpow2.f32 %v2332_v61 }
0x11ee   :  { %6183 = vpow2.f32 %v2334_v52 }
0x11ef   :  { %6185 = vpow2.f32 %v2336_v6  ;;  %v2455_v6 = vld [vmem:[#allocation13] sm:$0xff] }
0x11f6   :  { %v6180_v7 = vpop.eup %6179 }
0x11f7   :  { %v6182_v28 = vpop.eup %6181  ;;  %2343 = vperm.xlu1 %6123, %v6180_v7  }
0x11f8   :  { %2346 = vperm.xlu0 %6124, %v6182_v28   ;;  %v6184_v60 = vpop.eup %6183 }
0x11f9   :  { %v6186_v35 = vpop.eup %6185 }
0x11fb   :  { %2349 = vperm.xlu1 %6123, %v6184_v60  }
0x11ff   :  { %2352 = vperm.xlu1 %6123, %v6186_v35  }
0x1276   :  { %v2344_v13 = vpop.permute.xlu1 %2343 }
0x1277   :  { %v2347_v27 = vpop.permute.xlu0 %2346  ;;  %v2357_v42 = vrot.slane %v2344_v13, %v6826_v16  ;;  %v2456_v13 = vld [vmem:[#allocation13 + $0x8] sm:$0xff] }
0x1278   :  { %v2361_v38 = vrot.slane %v2347_v27, %v6826_v16  ;;  %v7173_v27 = vpack.c.bf16 %v2456_v13, %v2455_v6 }
0x127a   :  { %v2350_v34 = vpop.permute.xlu1 %2349  ;;  %v2370_v23 = vsel %vm600_vm2, %v2361_v38, %v2357_v42  ;;  %5919 = vmatpush3.bf16.msra.mxu1 %v7173_v27 }
0x127b   :  { %v2365_v19 = vrot.slane %v2350_v34, %v6826_v16  ;;  %5920 = vmatprep.subr.bf16.mxu1 %v7727_v1  ;;  %v2458_v34 = vld [vmem:[#allocation13 + $0x18] sm:$0xff] }
0x127d   :  { %v2371_v26 = vsel %vm602_vm3, %v2365_v19, %v2370_v23 }
0x127e   :  { %v2353_v20 = vpop.permute.xlu1 %2352 }
0x127f   :  { %v2369_v18 = vrot.slane %v2353_v20, %v6826_v16 }
0x1281   :  { %v2372_v36 = vsel %vm604_vm4, %v2369_v18, %v2371_v26 }
0x1282   :  { %v2374_v5 = vsel %vm607_vm5, %v2372_v36, 0.0 }
0x1283   :  { %2375 = vadd.xlane.f32.xlu0 %v2374_v5 }
0x1310   :  { %v2376_v33 = vpop.xlane.xlu0 %2375 }
0x1311   :  { %6187 = vrcp.f32 %v2376_v33 }
0x131b   :  { %v6188_v51 = vpop.eup %6187 }
0x131c   :  { %v2382_v37 = vrot.slane %v6188_v51, %v6762_v47  ;;  %v2386_v54 = vrot.slane %v6188_v51, %v6765_v50  ;;  %v2390_v24 = vrot.slane %v6188_v51, %v6778_v8  ;;  %v2394_v62 = vrot.slane %v6188_v51, %v6839_v40 }
0x131e   :  { %v2399_v43 = vmul.f32 %v6180_v7, %v2382_v37  ;;  %v2400_v57 = vmul.f32 %v6182_v28, %v2386_v54  ;;  %v2401_v61 = vmul.f32 %v6184_v60, %v2390_v24  ;;  %v2402_v52 = vmul.f32 %v6186_v35, %v2394_v62  ;;  %v2457_v7 = vld [vmem:[#allocation13 + $0x10] sm:$0xff] }
0x131f   :  { %v7177_v28 = vpack.c.bf16 %v2458_v34, %v2457_v7 }
0x1320   :  { %2405 = vperm.xlu1 %6123, %v2399_v43  }
0x1321   :  { %5922 = vmatpush3.bf16.msra.mxu1 %v7177_v28 }
0x1322   :  { %5930 = vmatprep.subr.bf16.mxu1 %v7048_v29 }
0x1324   :  { %2410 = vperm.xlu1 %6123, %v2400_v57  }
0x1328   :  { %2415 = vperm.xlu1 %6123, %v2401_v61  }
0x132c   :  { %2420 = vperm.xlu1 %6123, %v2402_v52  }
0x139f   :  { %v2406_v60 = vpop.permute.xlu1 %2405 }
0x13a0   :  { %v2423_v35 = vmul.f32 %v7128_v25, %v2406_v60 }
0x13a2   :  { %v2427_v38 = vsel %vm181_vm1, %v2423_v35, 0.0 }
0x13a3   :  { %v2428_v42 = vrot.slane %v2427_v38, 4  ;;  %v2411_v19 = vpop.permute.xlu1 %2410 }
0x13a4   :  { %v2424_v20 = vmul.f32 %v7137_v53, %v2411_v19 }
0x13a5   :  { %v2429_v18 = vadd.f32 %v2428_v42, %v2427_v38 }
0x13a6   :  { %v2434_v23 = vsel %vm181_vm1, %v2424_v20, 0.0 }
0x13a7   :  { %v2435_v26 = vrot.slane %v2434_v23, 4  ;;  %v2416_v36 = vpop.permute.xlu1 %2415  ;;  %v2430_v29 = vrot.slane %v2429_v18, 2 }
0x13a8   :  { %v2425_v5 = vmul.f32 %v7134_v56, %v2416_v36 }
0x13a9   :  { %v2436_v33 = vadd.f32 %v2435_v26, %v2434_v23  ;;  %v2431_v52 = vadd.f32 %v2430_v29, %v2429_v18  ;;  %v2616_v29 = vld [vmem:[%s7724_s9] sm:$0xff] }
0x13aa   :  { %v2441_v51 = vsel %vm181_vm1, %v2425_v5, 0.0 }
0x13ab   :  { %v2437_v37 = vrot.slane %v2436_v33, 2  ;;  %v2442_v43 = vrot.slane %v2441_v51, 4  ;;  %v2421_v54 = vpop.permute.xlu1 %2420  ;;  %v2432_v35 = vrot.slane %v2431_v52, 1 }
0x13ac   :  { %v2426_v57 = vmul.f32 %v7143_v4, %v2421_v54 }
0x13ad   :  { %v2438_v24 = vadd.f32 %v2437_v37, %v2436_v33  ;;  %v2443_v61 = vadd.f32 %v2442_v43, %v2441_v51  ;;  %v2433_v26 = vadd.f32 %v2432_v35, %v2431_v52  ;;  %v2617_v37 = vld [vmem:[%s7724_s9 + $0x8] sm:$0xff]  ;;  %v7235_v52 = vld [vmem:[%s7725_s10] ss:$0 sm:$0xff] }
0x13ae   :  { %v2448_v62 = vsel %vm181_vm1, %v2426_v57, 0.0  ;;  %v7207_v43 = vpack.c.bf16 %v2617_v37, %v2616_v29 }
0x13af   :  { %v2444_v6 = vrot.slane %v2443_v61, 2  ;;  %v2449_v13 = vrot.slane %v2448_v62, 4  ;;  %v2439_v7 = vrot.slane %v2438_v24, 1 }
0x13b0   :  { %5925 = vmatpush3.bf16.msra.mxu0 %v7207_v43 }
0x13b1   :  { %v2445_v34 = vadd.f32 %v2444_v6, %v2443_v61  ;;  %v2450_v60 = vadd.f32 %v2449_v13, %v2448_v62  ;;  %v2440_v19 = vadd.f32 %v2439_v7, %v2438_v24  ;;  %5926 = vmatprep.subr.bf16.mxu0 %v7727_v1  ;;  %v7222_v24 = vld [vmem:[%s7723_s8] ss:$0 sm:$0xff] }
0x13b3   :  { %v2446_v38 = vrot.slane %v2445_v34, 1  ;;  %v2451_v42 = vrot.slane %v2450_v60, 2  ;;  %v2539_v33 = vsel %vm600_vm2, %v2440_v19, %v2433_v26 }
0x13b5   :  { %v2452_v20 = vadd.f32 %v2451_v42, %v2450_v60  ;;  %v2447_v23 = vadd.f32 %v2446_v38, %v2445_v34 }
0x13b7   :  { %v2453_v36 = vrot.slane %v2452_v20, 1  ;;  %v2540_v51 = vsel %vm602_vm3, %v2447_v23, %v2539_v33 }
0x13b9   :  { %v2454_v5 = vadd.f32 %v2453_v36, %v2452_v20 }
0x13bb   :  { %v2541_v18 = vsel %vm604_vm4, %v2454_v5, %v2540_v51 }
0x13bc   :  { %5613 = vmatmul.mubr.msk.f32.vlgmr.msra.gmra.mrb[16].mxu1 %vm181_vm1, %v2541_v18 }
0x13bd   :  { %5932 = vmatpush1.bf16.msra.mxu1 %v7052_v31  ;;  %2807 = vmatprep.mubr.f32.mxu1 %v7729_v0  ;;  %v2618_v31 = vld [vmem:[%s7724_s9 + $0x10] sm:$0xff] }
0x13be   :  { %5934 = vmatprep.subr.bf16.mxu1 %v7058_v58  ;;  %v2619_v58 = vld [vmem:[%s7724_s9 + $0x18] sm:$0xff] }
0x13c1   :  { %5936 = vmatpush1.bf16.msra.mxu1 %v7062_v46  ;;  %v7213_v46 = vpack.c.bf16 %v2619_v58, %v2618_v31 }
0x13c2   :  { %5944 = vmatprep.subr.bf16.mxu1 %v7068_v15 }
0x13c3   :  { %5928 = vmatpush3.bf16.msra.mxu0 %v7213_v46 }
0x13c4   :  { %5937 = vmatprep.subr.bf16.mxu0 %v7727_v1 }
0x148f   :  { %v2610_v15 = vpop.f32.mrb[16].mxu1 }
0x1490   :  { %v2611_v54 = vadd.f32 %v2610_v15, %v7155_v45  ;;  %v5614_v57 = vpop.f32.mrb[17].mxu1 }
0x1492   :  { %v2614_v61 = vadd.f32 %v7222_v24, %v2611_v54 }
0x1494   :  { %6189 = vtanh.f32 %v2614_v61 }
0x149e   :  { %v6190_v62 = vpop.eup %6189 }
0x149f   :  { %5624 = vmatmul.mubr.msk.f32.vlgmr.msra.gmra.mrb[16].mxu0 %vm181_vm1, %v6190_v62 }
0x14a0   :  { %5939 = vmatpush3.bf16.msra.mxu0 %v7050_v48  ;;  %5634 = vmatprep.mubr.msk.f32.mxu0 %vm6517_vm0, %v7729_v0 }
0x14a1   :  { %5940 = vmatprep.subr.bf16.mxu0 %v7727_v1 }
0x14a4   :  { %5942 = vmatpush3.bf16.msra.mxu0 %v7060_v2 }
0x14a5   :  { %5951 = vmatprep.subr.bf16.mxu0 %v7727_v1 }
0x1572   :  { %v2689_v45 = vpop.f32.mrb[16].mxu0 }
0x1573   :  { %v7238_v6 = vadd.f32 %v7235_v52, %v2689_v45  ;;  %v5625_v13 = vpop.f32.mrb[17].mxu0 }
0x1575   :  { %v2693_v48 = vsel %vm1011_vm6, %v7238_v6, -inf }
0x1576   :  { %2694 = vmax.xlane.f32.xlu1 %v2693_v48 }
0x1603   :  { %v7242_v7 = vpop.xlane.xlu1 %2694 }
0x1604   :  { %vm2708_vm13 = vcmp.eq.f32.partialorder %v7238_v6, %v7242_v7 }
0x1605   :  { %v2709_v2 = vsel %vm2708_vm13, %v6822_v12, 32 }
0x1606   :  { %v2710_v34 = vsel %vm1011_vm6, %v2709_v2, 2147483647 }
0x1607   :  { %v2712_v60 = vshra.s32 %v2710_v34, 16  ;;  %v2711_v38 = vand.u32 65535, %v2710_v34 }
0x1609   :  { %v2714_v35 = vcvt.s32.f32 %v2712_v60  ;;  %v2713_v19 = vcvt.s32.f32 %v2711_v38 }
0x160b   :  { %2715 = vmin.xlane.f32.xlu0 %v2714_v35 }
0x1698   :  { %v2716_v42 = vpop.xlane.xlu0 %2715 }
0x1699   :  { %vm2717_vm14 = vcmp.eq.f32.partialorder %v2714_v35, %v2716_v42  ;;  %v2722_v23 = vcvt.f32.s32 %v2716_v42 }
0x169a   :  { %v2718_v20 = vsel %vm2717_vm14, %v2713_v19, inf }
0x169b   :  { %2719 = vmin.xlane.f32.xlu0 %v2718_v20  ;;  %v2723_v36 = vshll.u32 %v2722_v23, 16 }
0x1728   :  { %v2720_v26 = vpop.xlane.xlu0 %2719 }
0x1729   :  { %v2721_v5 = vcvt.f32.s32 %v2720_v26 }
0x172b   :  { %v2724_v33 = vadd.s32 %v2723_v36, %v2721_v5 }
0x172d   :  { %vm2725_vm15 = vcmp.eq.s32.totalorder %v6822_v12, %v2724_v33 }
0x172e   :  { %v5281_v51 = vsel %vm2725_vm15, 1.0, %v7729_v0 }
0x172f   :  { %5282 = vmatmul.mubr.msk.f32.vlgmr.msra.gmra.mrb[18].mxu1 %vm181_vm1, %v5281_v51  ;;  %5635 = vmatmul.mubr.msk.f32.vlgmr.msra.gmra.mrb[18].mxu0 %vm181_vm1, %v5281_v51 }
0x1730   :  { %5953 = vmatpush3.bf16.msra.mxu0 %v7071_v63  ;;  %5946 = vmatpush1.bf16.msra.mxu1 %v7073_v17 }
0x1731   :  { %5954 = vmatprep.subr.bf16.mxu0 %v7727_v1  ;;  %5948 = vmatprep.subr.bf16.mxu1 %v7076_v22 }
0x1732   :  { %5645 = vmatprep.mubr.msk.f32.mxu0 %vm6517_vm0, %v7729_v0  ;;  %2960 = vmatprep.mubr.f32.mxu1 %v7729_v0 }
0x1734   :  { %5956 = vmatpush3.bf16.msra.mxu0 %v7083_v9  ;;  %5950 = vmatpush1.bf16.msra.mxu1 %v7085_v10 }
0x1735   :  { %5957 = vmatprep.subr.bf16.mxu1 %v7727_v1  ;;  %5963 = vmatprep.subr.bf16.mxu0 %v7727_v1 }
0x1737   :  { %5646 = vmatmul.mubr.msk.f32.vlgmr.msra.gmra.mrb[20].mxu0 %vm181_vm1, %v7117_v21  ;;  %5284 = vmatmul.mubr.msk.f32.vlgmr.msra.gmra.mrb[18].mxu1 %vm181_vm1, %v7117_v21 }
0x1738   :  { %5959 = vmatpush3.bf16.msra.mxu1 %v7104_v30  ;;  %5656 = vmatprep.mubr.msk.f32.mxu1 %vm6517_vm0, %v7729_v0 }
0x1739   :  { %5960 = vmatprep.subr.bf16.mxu1 %v7727_v1  ;;  %5965 = vmatpush3.bf16.msra.mxu0 %v7173_v27 }
0x173a   :  { %5966 = vmatprep.subr.bf16.mxu0 %v7727_v1  ;;  %5667 = vmatprep.mubr.msk.f32.mxu0 %vm6517_vm0, %v7729_v0 }
0x173c   :  { %5962 = vmatpush3.bf16.msra.mxu1 %v7107_v39 }
0x173d   :  { %5968 = vmatpush3.bf16.msra.mxu0 %v7177_v28  ;;  %5969 = vmatprep.subr.bf16.mxu1 %v7727_v1 }
0x1802   :  { %v2880_v63 = vpop.f32.mrb[18].mxu0 }
0x1803   :  { %v5636_v17 = vpop.f32.mrb[19].mxu0  ;;  %v2881_v57 = vadd.f32 %v2880_v63, %v6784_v14 }
0x180a   :  { %v3033_v22 = vpop.f32.mrb[20].mxu0  ;;  %v2962_v9 = vpop.f32.mrb[18].mxu1 }
0x180b   :  { %v6080_v10 = vadd.f32 %v6771_v55, %v2962_v9  ;;  %v5647_v30 = vpop.f32.mrb[21].mxu0  ;;  %v2964_v18 = vpop.f32.mrb[19].mxu1  ;;  %v3034_v15 = vadd.f32 %v3033_v22, %v6781_v11 }
0x180c   :  { %v6082_v29 = vadd.f32 %v6773_v59, %v2964_v18 }
0x180d   :  { %v5286_v27 = vmul.f32 -1.442695, %v6080_v10 }
0x180e   :  { %v5287_v37 = vmul.f32 -1.442695, %v6082_v29 }
0x180f   :  { %6191 = vpow2.f32 %v5286_v27 }
0x1810   :  { %6193 = vpow2.f32 %v5287_v37 }
0x1819   :  { %v6192_v31 = vpop.eup %6191 }
0x181a   :  { %v3041_v39 = vadd.f32 1.0, %v6192_v31  ;;  %v6194_v28 = vpop.eup %6193 }
0x181b   :  { %v3048_v58 = vadd.f32 1.0, %v6194_v28 }
0x181c   :  { %6195 = vrcp.f32 %v3041_v39 }
0x181d   :  { %6197 = vrcp.f32 %v3048_v58 }
0x1826   :  { %v6196_v54 = vpop.eup %6195 }
0x1827   :  { %v3051_v61 = vmul.f32 %v6196_v54, %v3034_v15  ;;  %v6198_v45 = vpop.eup %6197 }
0x1828   :  { %v3054_v13 = vsub.f32 1.0, %v6198_v45  ;;  %v3056_v34 = vmul.f32 %v6198_v45, %v7117_v21 }
0x1829   :  { %v3052_v62 = vadd.f32 %v3051_v61, %v2881_v57 }
0x182b   :  { %6199 = vtanh.f32 %v3052_v62 }
0x1835   :  { %v6200_v48 = vpop.eup %6199 }
0x1836   :  { %v3055_v2 = vmul.f32 %v6200_v48, %v3054_v13 }
0x1838   :  { %v7283_v60 = vadd.f32 %v3056_v34, %v3055_v2 }
0x183a   :  { %5657 = vmatmul.mubr.msk.f32.vlgmr.msra.gmra.mrb[20].mxu1 %vm181_vm1, %v7283_v60  ;;  %v3065_v35 = vrot.slane %v7283_v60, %v6789_v32 }
0x183b   :  { %5971 = vmatpush3.bf16.msra.mxu1 %v7207_v43  ;;  %5678 = vmatprep.mubr.msk.f32.mxu1 %vm6517_vm0, %v7729_v0 }
0x183c   :  { %v3073_v38 = vrot.slane %v3065_v35, %v6789_v32  ;;  %v3066_v42 = vcombine.high %v3065_v35, %v3065_v35  ;;  %5972 = vmatprep.subr.bf16.mxu1 %v7727_v1 }
0x183e   :  { %v3086_v21 = vrot.slane %v3073_v38, %v6762_v47  ;;  %v3080_v19 = vrot.slane %v3066_v42, %v6789_v32  ;;  %v3081_v20 = vcombine.high %v3073_v38, %v3073_v38 }
0x183f   :  { %5974 = vmatpush3.bf16.msra.mxu1 %v7213_v46 }
0x1840   :  { %v3103_v23 = vmul.f32 %v7128_v25, %v3086_v21  ;;  %v3090_v26 = vrot.slane %v3080_v19, %v6762_v47  ;;  %5983 = vmatprep.subr.bf16.mxu1 %v7727_v1  ;;  %v3094_v5 = vrot.slane %v3081_v20, %v6762_v47  ;;  %v3082_v33 = vcombine.high %v3080_v19, %v3080_v19 }
0x1842   :  { %v3107_v43 = vsel %vm181_vm1, %v3103_v23, 0.0  ;;  %v3104_v36 = vmul.f32 %v7137_v53, %v3090_v26  ;;  %v3105_v63 = vmul.f32 %v7134_v56, %v3094_v5  ;;  %v3098_v46 = vrot.slane %v3082_v33, %v6762_v47 }
0x1843   :  { %3108 = vadd.xlane.f32.xlu0 %v3107_v43 }
0x1844   :  { %v3110_v51 = vsel %vm181_vm1, %v3104_v36, 0.0  ;;  %v3113_v17 = vsel %vm181_vm1, %v3105_v63, 0.0  ;;  %v3106_v22 = vmul.f32 %v7143_v4, %v3098_v46 }
0x1846   :  { %v3116_v9 = vsel %vm181_vm1, %v3106_v22, 0.0 }
0x1847   :  { %3111 = vadd.xlane.f32.xlu0 %v3110_v51 }
0x184b   :  { %3114 = vadd.xlane.f32.xlu0 %v3113_v17 }
0x184f   :  { %3117 = vadd.xlane.f32.xlu0 %v3116_v9 }
0x18d0   :  { %v3109_v10 = vpop.xlane.xlu0 %3108 }
0x18d1   :  { %v3126_v37 = vrot.slane %v3109_v10, %v6826_v16 }
0x18d4   :  { %v3112_v30 = vpop.xlane.xlu0 %3111 }
0x18d5   :  { %v3130_v27 = vrot.slane %v3112_v30, %v6826_v16 }
0x18d7   :  { %v3139_v28 = vsel %vm600_vm2, %v3130_v27, %v3126_v37 }
0x18d8   :  { %v3115_v18 = vpop.xlane.xlu0 %3114 }
0x18d9   :  { %v3134_v29 = vrot.slane %v3115_v18, %v6826_v16 }
0x18db   :  { %v3140_v58 = vsel %vm602_vm3, %v3134_v29, %v3139_v28 }
0x18dc   :  { %v3118_v31 = vpop.xlane.xlu0 %3117 }
0x18dd   :  { %v3138_v39 = vrot.slane %v3118_v31, %v6826_v16 }
0x18df   :  { %v3141_v15 = vsel %vm604_vm4, %v3138_v39, %v3140_v58 }
0x18e0   :  { %v3143_v54 = vsel %vm607_vm5, %v3141_v15, -inf }
0x18e1   :  { %3144 = vmax.xlane.f32.xlu1 %v3143_v54 }
0x190d   :  { %v7317_v57 = vpop.f32.mrb[20].mxu1 }
0x190e   :  { %v5658_v61 = vpop.f32.mrb[21].mxu1 }
0x196e   :  { %v3145_v62 = vpop.xlane.xlu1 %3144 }
0x196f   :  { %v3150_v45 = vrot.slane %v3145_v62, %v6762_v47  ;;  %v3154_v13 = vrot.slane %v3145_v62, %v6765_v50  ;;  %v3158_v48 = vrot.slane %v3145_v62, %v6778_v8  ;;  %v3162_v2 = vrot.slane %v3145_v62, %v6839_v40 }
0x1971   :  { %v3167_v34 = vsub.f32 %v3109_v10, %v3150_v45  ;;  %v3168_v35 = vsub.f32 %v3112_v30, %v3154_v13  ;;  %v3170_v38 = vsub.f32 %v3118_v31, %v3162_v2  ;;  %v3169_v42 = vsub.f32 %v3115_v18, %v3158_v48 }
0x1973   :  { %v3171_v21 = vmul.f32 1.442695, %v3167_v34  ;;  %v3173_v19 = vmul.f32 1.442695, %v3168_v35  ;;  %v3177_v20 = vmul.f32 1.442695, %v3170_v38 }
0x1974   :  { %v3175_v23 = vmul.f32 1.442695, %v3169_v42 }
0x1975   :  { %6201 = vpow2.f32 %v3171_v21 }
0x1976   :  { %6203 = vpow2.f32 %v3173_v19 }
0x1977   :  { %6205 = vpow2.f32 %v3177_v20 }
0x1978   :  { %6207 = vpow2.f32 %v3175_v23 }
0x197f   :  { %v6202_v26 = vpop.eup %6201 }
0x1980   :  { %v6204_v43 = vpop.eup %6203  ;;  %3184 = vperm.xlu0 %6124, %v6202_v26  }
0x1981   :  { %3187 = vperm.xlu1 %6123, %v6204_v43   ;;  %v6206_v36 = vpop.eup %6205 }
0x1982   :  { %v6208_v5 = vpop.eup %6207 }
0x1984   :  { %3193 = vperm.xlu0 %6124, %v6206_v36  }
0x1985   :  { %3190 = vperm.xlu1 %6123, %v6208_v5  }
0x19ff   :  { %v3185_v33 = vpop.permute.xlu0 %3184 }
0x1a00   :  { %v3188_v51 = vpop.permute.xlu1 %3187  ;;  %v3198_v46 = vrot.slane %v3185_v33, %v6826_v16 }
0x1a01   :  { %v3202_v63 = vrot.slane %v3188_v51, %v6826_v16 }
0x1a03   :  { %v3194_v17 = vpop.permute.xlu0 %3193  ;;  %v3211_v30 = vsel %vm600_vm2, %v3202_v63, %v3198_v46 }
0x1a04   :  { %v3191_v22 = vpop.permute.xlu1 %3190  ;;  %v3210_v9 = vrot.slane %v3194_v17, %v6826_v16 }
0x1a05   :  { %v3206_v10 = vrot.slane %v3191_v22, %v6826_v16 }
0x1a07   :  { %v3212_v18 = vsel %vm602_vm3, %v3206_v10, %v3211_v30 }
0x1a08   :  { %v3213_v27 = vsel %vm604_vm4, %v3210_v9, %v3212_v18 }
0x1a09   :  { %v3215_v29 = vsel %vm607_vm5, %v3213_v27, 0.0 }
0x1a0a   :  { %3216 = vadd.xlane.f32.xlu1 %v3215_v29 }
0x1a97   :  { %v3217_v37 = vpop.xlane.xlu1 %3216 }
0x1a98   :  { %6209 = vrcp.f32 %v3217_v37 }
0x1aa2   :  { %v6210_v31 = vpop.eup %6209 }
0x1aa3   :  { %v3223_v39 = vrot.slane %v6210_v31, %v6762_v47  ;;  %v3227_v58 = vrot.slane %v6210_v31, %v6765_v50  ;;  %v3231_v54 = vrot.slane %v6210_v31, %v6778_v8  ;;  %v3235_v62 = vrot.slane %v6210_v31, %v6839_v40 }
0x1aa5   :  { %v3240_v28 = vmul.f32 %v6202_v26, %v3223_v39  ;;  %v3241_v15 = vmul.f32 %v6204_v43, %v3227_v58  ;;  %v3242_v61 = vmul.f32 %v6208_v5, %v3231_v54  ;;  %v3243_v45 = vmul.f32 %v6206_v36, %v3235_v62 }
0x1aa7   :  { %3246 = vperm.xlu0 %6124, %v3240_v28  }
0x1aab   :  { %3251 = vperm.xlu0 %6124, %v3241_v15  }
0x1aaf   :  { %3256 = vperm.xlu0 %6124, %v3242_v61  }
0x1ab3   :  { %3261 = vperm.xlu0 %6124, %v3243_v45  }
0x1b26   :  { %v3247_v13 = vpop.permute.xlu0 %3246 }
0x1b27   :  { %v3264_v48 = vmul.f32 %v7128_v25, %v3247_v13 }
0x1b29   :  { %v3268_v2 = vsel %vm181_vm1, %v3264_v48, 0.0 }
0x1b2a   :  { %v3269_v34 = vrot.slane %v3268_v2, 4  ;;  %v3252_v35 = vpop.permute.xlu0 %3251 }
0x1b2b   :  { %v3265_v38 = vmul.f32 %v7137_v53, %v3252_v35 }
0x1b2c   :  { %v3270_v21 = vadd.f32 %v3269_v34, %v3268_v2 }
0x1b2d   :  { %v3275_v42 = vsel %vm181_vm1, %v3265_v38, 0.0 }
0x1b2e   :  { %v3276_v19 = vrot.slane %v3275_v42, 4  ;;  %v3257_v20 = vpop.permute.xlu0 %3256  ;;  %v3271_v36 = vrot.slane %v3270_v21, 2 }
0x1b2f   :  { %v3266_v23 = vmul.f32 %v7134_v56, %v3257_v20 }
0x1b30   :  { %v3277_v26 = vadd.f32 %v3276_v19, %v3275_v42  ;;  %v3272_v17 = vadd.f32 %v3271_v36, %v3270_v21  ;;  %v3574_v36 = vld [vmem:[#allocation7 + $0x28] sm:$0xff] }
0x1b31   :  { %v3282_v43 = vsel %vm181_vm1, %v3266_v23, 0.0  ;;  %v3570_v23 = vld [vmem:[#allocation7 + $0x8] sm:$0xff] }
0x1b32   :  { %v3278_v5 = vrot.slane %v3277_v26, 2  ;;  %v3283_v33 = vrot.slane %v3282_v43, 4  ;;  %v3262_v25 = vpop.permute.xlu0 %3261  ;;  %v3273_v56 = vrot.slane %v3272_v17, 1 }
0x1b33   :  { %v3267_v51 = vmul.f32 %v7143_v4, %v3262_v25 }
0x1b34   :  { %v3279_v63 = vadd.f32 %v3278_v5, %v3277_v26  ;;  %v3284_v46 = vadd.f32 %v3283_v33, %v3282_v43  ;;  %v3274_v28 = vadd.f32 %v3273_v56, %v3272_v17  ;;  %v3571_v26 = vld [vmem:[#allocation7 + $0x10] sm:$0xff]  ;;  %v3569_v5 = vld [vmem:[#allocation7] sm:$0xff]  ;;  %v3572_v33 = vld [vmem:[#allocation7 + $0x18] sm:$0xff] }
0x1b35   :  { %v3289_v53 = vsel %vm181_vm1, %v3267_v51, 0.0  ;;  %v7366_v25 = vpack.c.bf16 %v3574_v36, %v3571_v26  ;;  %v7368_v51 = vpack.c.bf16 %v3572_v33, %v3569_v5  ;;  %v3575_v56 = vld [vmem:[#allocation7 + $0x30] sm:$0xff]  ;;  %v4141_v5 = vld [vmem:[#allocation14] sm:$0xff] }
0x1b36   :  { %v3285_v22 = vrot.slane %v3284_v46, 2  ;;  %v3290_v9 = vrot.slane %v3289_v53, 4  ;;  %v3280_v10 = vrot.slane %v3279_v63, 1  ;;  %v4142_v33 = vld [vmem:[#allocation14 + $0x8] sm:$0xff] }
0x1b38   :  { %v3286_v30 = vadd.f32 %v3285_v22, %v3284_v46  ;;  %v3291_v18 = vadd.f32 %v3290_v9, %v3289_v53  ;;  %v3281_v37 = vadd.f32 %v3280_v10, %v3279_v63  ;;  %v3576_v22 = vld [vmem:[#allocation7 + $0x38] sm:$0xff]  ;;  %v3579_v9 = vld [vmem:[#allocation7 + $0x50] sm:$0xff]  ;;  %v3577_v10 = vld [vmem:[#allocation7 + $0x40] sm:$0xff] }
0x1b3a   :  { %v3287_v27 = vrot.slane %v3286_v30, 1  ;;  %v3292_v29 = vrot.slane %v3291_v18, 2  ;;  %v3380_v4 = vsel %vm600_vm2, %v3281_v37, %v3274_v28 }
0x1b3c   :  { %v3293_v31 = vadd.f32 %v3292_v29, %v3291_v18  ;;  %v3288_v39 = vadd.f32 %v3287_v27, %v3286_v30  ;;  %v7374_v30 = vpack.c.bf16 %v3579_v9, %v3576_v22  ;;  %v3580_v18 = vld [vmem:[#allocation7 + $0x58] sm:$0xff]  ;;  %v3578_v27 = vld [vmem:[#allocation7 + $0x48] sm:$0xff] }
0x1b3d   :  { %v7376_v29 = vpack.c.bf16 %v3580_v18, %v3577_v10  ;;  %v7378_v37 = vpack.c.bf16 %v3578_v27, %v3575_v56 }
0x1b3e   :  { %v3294_v58 = vrot.slane %v3293_v31, 1  ;;  %v3381_v54 = vsel %vm602_vm3, %v3288_v39, %v3380_v4  ;;  %v3729_v39 = vld [vmem:[#allocation8 + $0x20] sm:$0xff]  ;;  %v3727_v4 = vld [vmem:[#allocation8 + $0x10] sm:$0xff] }
0x1b40   :  { %v3295_v15 = vadd.f32 %v3294_v58, %v3293_v31  ;;  %v3726_v31 = vld [vmem:[#allocation8 + $0x8] sm:$0xff] }
0x1b41   :  { %v7384_v28 = vpack.c.bf16 %v3729_v39, %v3726_v31 }
0x1b42   :  { %v3382_v61 = vsel %vm604_vm4, %v3295_v15, %v3381_v54 }
0x1b43   :  { %5668 = vmatmul.mubr.msk.f32.vlgmr.msra.gmra.mrb[22].mxu0 %vm181_vm1, %v3382_v61 }
0x1b44   :  { %3648 = vmatprep.mubr.f32.mxu0 %v7729_v0 }
0x1c16   :  { %v3451_v62 = vpop.f32.mrb[22].mxu0 }
0x1c17   :  { %v3452_v45 = vadd.f32 %v3451_v62, %v7317_v57  ;;  %v5669_v13 = vpop.f32.mrb[23].mxu0  ;;  %v3730_v62 = vld [vmem:[#allocation8 + $0x28] sm:$0xff] }
0x1c18   :  { %v3728_v13 = vld [vmem:[#allocation8 + $0x18] sm:$0xff] }
0x1c19   :  { %v3455_v48 = vadd.f32 %v7222_v24, %v3452_v45  ;;  %v3725_v45 = vld [vmem:[#allocation8] sm:$0xff] }
0x1c1b   :  { %6211 = vtanh.f32 %v3455_v48  ;;  %v3732_v48 = vld [vmem:[#allocation8 + $0x38] sm:$0xff] }
0x1c25   :  { %v6212_v2 = vpop.eup %6211 }
0x1c26   :  { %5679 = vmatmul.mubr.msk.f32.vlgmr.msra.gmra.mrb[22].mxu1 %vm181_vm1, %v6212_v2  ;;  %v3735_v2 = vld [vmem:[#allocation8 + $0x50] sm:$0xff] }
0x1c27   :  { %5689 = vmatprep.mubr.msk.f32.mxu1 %vm6517_vm0, %v7729_v0  ;;  %5985 = vmatpush3.bf16.msra.mxu1 %v7366_v25 }
0x1c28   :  { %5986 = vmatprep.subr.bf16.mxu1 %v7727_v1 }
0x1c2b   :  { %5988 = vmatpush3.bf16.msra.mxu1 %v7376_v29 }
0x1c2c   :  { %5997 = vmatprep.subr.bf16.mxu1 %v7727_v1 }
0x1cf9   :  { %v3530_v34 = vpop.f32.mrb[22].mxu1 }
0x1cfa   :  { %v7354_v35 = vadd.f32 %v7235_v52, %v3530_v34  ;;  %v5680_v38 = vpop.f32.mrb[23].mxu1  ;;  %v3573_v52 = vld [vmem:[#allocation7 + $0x20] sm:$0xff] }
0x1cfb   :  { %v7364_v43 = vpack.c.bf16 %v3573_v52, %v3570_v23  ;;  %v7387_v38 = vpack.c.bf16 %v3730_v62, %v3727_v4  ;;  %v3734_v23 = vld [vmem:[#allocation8 + $0x48] sm:$0xff] }
0x1cfc   :  { %7735 = vst [vmem:[#allocation23_spill] sm:$0xff] %v7354_v35  ;;  %v3534_v42 = vsel %vm1011_vm6, %v7354_v35, -inf }
0x1cfd   :  { %3535 = vmax.xlane.f32.xlu0 %v3534_v42  ;;  %5976 = vmatprep.subr.bf16.mxu0 %v7364_v43  ;;  %v7389_v42 = vpack.c.bf16 %v3728_v13, %v3725_v45 }
0x1cfe   :  { %5978 = vmatpush1.bf16.msra.mxu0 %v7368_v51 }
0x1cff   :  { %5980 = vmatprep.subr.bf16.mxu0 %v7374_v30 }
0x1d02   :  { %5982 = vmatpush1.bf16.msra.mxu0 %v7378_v37 }
0x1d03   :  { %5990 = vmatprep.subr.bf16.mxu0 %v7384_v28 }
0x1d8a   :  { %v7358_v57 = vpop.xlane.xlu0 %3535 }
0x1d8b   :  { %7736 = vst [vmem:[#allocation24_spill] sm:$0xff] %v7358_v57  ;;  %vm3549_vm7 = vcmp.eq.f32.partialorder %v7354_v35, %v7358_v57 }
0x1d8c   :  { %v3550_v24 = vsel %vm3549_vm7, %v6822_v12, 32 }
0x1d8d   :  { %v3551_v21 = vsel %vm1011_vm6, %v3550_v24, 2147483647  ;;  %v3733_v24 = vld [vmem:[#allocation8 + $0x40] sm:$0xff] }
0x1d8e   :  { %v3553_v19 = vshra.s32 %v3551_v21, 16  ;;  %v3552_v63 = vand.u32 65535, %v3551_v21  ;;  %v7392_v21 = vpack.c.bf16 %v3735_v2, %v3732_v48 }
0x1d90   :  { %v3555_v20 = vcvt.s32.f32 %v3553_v19  ;;  %v3554_v53 = vcvt.s32.f32 %v3552_v63  ;;  %v3736_v19 = vld [vmem:[#allocation8 + $0x58] sm:$0xff] }
0x1d91   :  { %v7399_v26 = vpack.c.bf16 %v3736_v19, %v3733_v24  ;;  %v4143_v63 = vld [vmem:[#allocation14 + $0x10] sm:$0xff] }
0x1d92   :  { %3556 = vmin.xlane.f32.xlu1 %v3555_v20 }
0x1e1f   :  { %v3557_v46 = vpop.xlane.xlu1 %3556 }
0x1e20   :  { %vm3558_vm8 = vcmp.eq.f32.partialorder %v3555_v20, %v3557_v46  ;;  %v3563_v58 = vcvt.f32.s32 %v3557_v46  ;;  %v3731_v20 = vld [vmem:[#allocation8 + $0x30] sm:$0xff]  ;;  %v7420_v46 = vpack.c.bf16 %v4142_v33, %v4141_v5 }
0x1e21   :  { %v3559_v17 = vsel %vm3558_vm8, %v3554_v53, inf  ;;  %v7401_v36 = vpack.c.bf16 %v3734_v23, %v3731_v20  ;;  %v4144_v53 = vld [vmem:[#allocation14 + $0x18] sm:$0xff] }
0x1e22   :  { %3560 = vmin.xlane.f32.xlu1 %v3559_v17  ;;  %v3564_v54 = vshll.u32 %v3563_v58, 16  ;;  %v7423_v17 = vpack.c.bf16 %v4144_v53, %v4143_v63 }
0x1eaf   :  { %v3561_v15 = vpop.xlane.xlu1 %3560 }
0x1eb0   :  { %v3562_v61 = vcvt.f32.s32 %v3561_v15 }
0x1eb2   :  { %v3565_v34 = vadd.s32 %v3564_v54, %v3562_v61 }
0x1eb4   :  { %vm3566_vm9 = vcmp.eq.s32.totalorder %v6822_v12, %v3565_v34 }
0x1eb5   :  { %v5291_v52 = vsel %vm3566_vm9, 1.0, %v7729_v0 }
0x1eb6   :  { %5292 = vmatmul.mubr.msk.f32.vlgmr.msra.gmra.mrb[24].mxu0 %vm181_vm1, %v5291_v52  ;;  %5690 = vmatmul.mubr.msk.f32.vlgmr.msra.gmra.mrb[24].mxu1 %vm181_vm1, %v5291_v52 }
0x1eb7   :  { %5999 = vmatpush3.bf16.msra.mxu1 %v7387_v38  ;;  %5992 = vmatpush1.bf16.msra.mxu0 %v7389_v42 }
0x1eb8   :  { %6000 = vmatprep.subr.bf16.mxu1 %v7727_v1  ;;  %5994 = vmatprep.subr.bf16.mxu0 %v7392_v21 }
0x1eb9   :  { %5700 = vmatprep.mubr.msk.f32.mxu1 %vm6517_vm0, %v7729_v0  ;;  %3801 = vmatprep.mubr.f32.mxu0 %v7729_v0 }
0x1ebb   :  { %6002 = vmatpush3.bf16.msra.mxu1 %v7399_v26  ;;  %5996 = vmatpush1.bf16.msra.mxu0 %v7401_v36 }
0x1ebc   :  { %6003 = vmatprep.subr.bf16.mxu0 %v7727_v1  ;;  %6009 = vmatprep.subr.bf16.mxu1 %v7727_v1 }
0x1ebe   :  { %5701 = vmatmul.mubr.msk.f32.vlgmr.msra.gmra.mrb[26].mxu1 %vm181_vm1, %v7283_v60  ;;  %5294 = vmatmul.mubr.msk.f32.vlgmr.msra.gmra.mrb[24].mxu0 %vm181_vm1, %v7283_v60 }
0x1ebf   :  { %5711 = vmatprep.mubr.msk.f32.mxu0 %vm6517_vm0, %v7729_v0  ;;  %5722 = vmatprep.mubr.msk.f32.mxu1 %vm6517_vm0, %v7729_v0 }
0x1ec0   :  { %6005 = vmatpush3.bf16.msra.mxu0 %v7420_v46 }
0x1ec1   :  { %6006 = vmatprep.subr.bf16.mxu0 %v7727_v1 }
0x1ec4   :  { %6008 = vmatpush3.bf16.msra.mxu0 %v7423_v17 }
0x1ec5   :  { %6015 = vmatprep.subr.bf16.mxu0 %v7727_v1 }
0x1f89   :  { %v3721_v22 = vpop.f32.mrb[24].mxu1 }
0x1f8a   :  { %v5691_v9 = vpop.f32.mrb[25].mxu1  ;;  %v3722_v48 = vadd.f32 %v3721_v22, %v6784_v14 }
0x1f91   :  { %v3874_v10 = vpop.f32.mrb[26].mxu1  ;;  %v3803_v18 = vpop.f32.mrb[24].mxu0 }
0x1f92   :  { %v6084_v56 = vadd.f32 %v6771_v55, %v3803_v18  ;;  %v5702_v27 = vpop.f32.mrb[27].mxu1  ;;  %v3805_v31 = vpop.f32.mrb[25].mxu0  ;;  %v3875_v45 = vadd.f32 %v3874_v10, %v6781_v11 }
0x1f93   :  { %v6086_v58 = vadd.f32 %v6773_v59, %v3805_v31 }
0x1f94   :  { %v5296_v39 = vmul.f32 -1.442695, %v6084_v56 }
0x1f95   :  { %v5297_v15 = vmul.f32 -1.442695, %v6086_v58  ;;  %v7450_v58 = vld [vmem:[#allocation5 + $0x10] sm:$0xff] }
0x1f96   :  { %6213 = vpow2.f32 %v5296_v39 }
0x1f97   :  { %6215 = vpow2.f32 %v5297_v15 }
0x1fa0   :  { %v6214_v4 = vpop.eup %6213 }
0x1fa1   :  { %v3882_v54 = vadd.f32 1.0, %v6214_v4  ;;  %v6216_v61 = vpop.eup %6215  ;;  %v7453_v4 = vld [vmem:[#allocation5 + $0x8] sm:$0xff] }
0x1fa2   :  { %v3889_v62 = vadd.f32 1.0, %v6216_v61 }
0x1fa3   :  { %6217 = vrcp.f32 %v3882_v54 }
0x1fa4   :  { %6219 = vrcp.f32 %v3889_v62 }
0x1fad   :  { %v6218_v13 = vpop.eup %6217 }
0x1fae   :  { %v3892_v2 = vmul.f32 %v6218_v13, %v3875_v45  ;;  %v6220_v24 = vpop.eup %6219  ;;  %v7459_v13 = vld [vmem:[#allocation5 + $0x18] sm:$0xff] }
0x1faf   :  { %v3895_v19 = vsub.f32 1.0, %v6220_v24  ;;  %v3897_v52 = vmul.f32 %v6220_v24, %v7283_v60  ;;  %v7444_v60 = vld [vmem:[#allocation5] sm:$0xff] }
0x1fb0   :  { %v3893_v34 = vadd.f32 %v3892_v2, %v3722_v48 }
0x1fb2   :  { %6221 = vtanh.f32 %v3893_v34 }
0x1fbc   :  { %v6222_v20 = vpop.eup %6221 }
0x1fbd   :  { %v3896_v23 = vmul.f32 %v6222_v20, %v3895_v19 }
0x1fbf   :  { %v7433_v5 = vadd.f32 %v3897_v52, %v3896_v23 }
0x1fc1   :  { %5712 = vmatmul.mubr.msk.f32.vlgmr.msra.gmra.mrb[26].mxu0 %vm181_vm1, %v7433_v5  ;;  %v3906_v33 = vrot.slane %v7433_v5, %v6789_v32 }
0x1fc2   :  { %5733 = vmatprep.mubr.msk.f32.mxu0 %vm6517_vm0, %v7729_v0 }
0x1fc3   :  { %v3914_v63 = vrot.slane %v3906_v33, %v6789_v32  ;;  %v3907_v53 = vcombine.high %v3906_v33, %v3906_v33 }
0x1fc5   :  { %v3927_v22 = vrot.slane %v3914_v63, %v6762_v47  ;;  %v3922_v9 = vcombine.high %v3914_v63, %v3914_v63  ;;  %v3921_v10 = vrot.slane %v3907_v53, %v6789_v32 }
0x1fc7   :  { %v3944_v18 = vmul.f32 %v7444_v60, %v3927_v22  ;;  %v3935_v56 = vrot.slane %v3922_v9, %v6762_v47  ;;  %v3931_v27 = vrot.slane %v3921_v10, %v6762_v47  ;;  %v3923_v31 = vcombine.high %v3921_v10, %v3921_v10 }
0x1fc9   :  { %v3948_v39 = vsel %vm181_vm1, %v3944_v18, 0.0  ;;  %v3946_v15 = vmul.f32 %v7450_v58, %v3935_v56  ;;  %v3945_v54 = vmul.f32 %v7453_v4, %v3931_v27  ;;  %v3939_v61 = vrot.slane %v3923_v31, %v6762_v47 }
0x1fca   :  { %3949 = vadd.xlane.f32.xlu1 %v3948_v39 }
0x1fcb   :  { %v3954_v62 = vsel %vm181_vm1, %v3946_v15, 0.0  ;;  %v3951_v45 = vsel %vm181_vm1, %v3945_v54, 0.0  ;;  %v3947_v48 = vmul.f32 %v7459_v13, %v3939_v61 }
0x1fcc   :  { %3955 = vadd.xlane.f32.xlu0 %v3954_v62 }
0x1fcd   :  { %v3957_v2 = vsel %vm181_vm1, %v3947_v48, 0.0 }
0x1fce   :  { %3952 = vadd.xlane.f32.xlu1 %v3951_v45 }
0x1fd2   :  { %3958 = vadd.xlane.f32.xlu1 %v3957_v2 }
0x2057   :  { %v3950_v34 = vpop.xlane.xlu1 %3949 }
0x2058   :  { %v3967_v19 = vrot.slane %v3950_v34, %v6826_v16 }
0x2059   :  { %v3956_v20 = vpop.xlane.xlu0 %3955 }
0x205a   :  { %v3975_v33 = vrot.slane %v3956_v20, %v6826_v16 }
0x205b   :  { %v3953_v24 = vpop.xlane.xlu1 %3952 }
0x205c   :  { %v3971_v23 = vrot.slane %v3953_v24, %v6826_v16 }
0x205e   :  { %v3980_v52 = vsel %vm600_vm2, %v3971_v23, %v3967_v19 }
0x205f   :  { %v3959_v63 = vpop.xlane.xlu1 %3958  ;;  %v3981_v22 = vsel %vm602_vm3, %v3975_v33, %v3980_v52 }
0x2060   :  { %v3979_v53 = vrot.slane %v3959_v63, %v6826_v16 }
0x2062   :  { %v3982_v9 = vsel %vm604_vm4, %v3979_v53, %v3981_v22 }
0x2063   :  { %v3984_v10 = vsel %vm607_vm5, %v3982_v9, -inf }
0x2064   :  { %3985 = vmax.xlane.f32.xlu0 %v3984_v10 }
0x2094   :  { %v7471_v18 = vpop.f32.mrb[26].mxu0 }
0x2095   :  { %v5713_v56 = vpop.f32.mrb[27].mxu0 }
0x20f1   :  { %v3986_v27 = vpop.xlane.xlu0 %3985 }
0x20f2   :  { %v3991_v31 = vrot.slane %v3986_v27, %v6762_v47  ;;  %v3995_v39 = vrot.slane %v3986_v27, %v6765_v50  ;;  %v3999_v15 = vrot.slane %v3986_v27, %v6778_v8  ;;  %v4003_v54 = vrot.slane %v3986_v27, %v6839_v40 }
0x20f4   :  { %v4008_v61 = vsub.f32 %v3950_v34, %v3991_v31  ;;  %v4009_v62 = vsub.f32 %v3953_v24, %v3995_v39  ;;  %v4010_v45 = vsub.f32 %v3956_v20, %v3999_v15  ;;  %v4011_v19 = vsub.f32 %v3959_v63, %v4003_v54 }
0x20f6   :  { %v4012_v48 = vmul.f32 1.442695, %v4008_v61  ;;  %v4014_v2 = vmul.f32 1.442695, %v4009_v62  ;;  %v4016_v23 = vmul.f32 1.442695, %v4010_v45 }
0x20f7   :  { %v4018_v52 = vmul.f32 1.442695, %v4011_v19 }
0x20f8   :  { %6223 = vpow2.f32 %v4012_v48 }
0x20f9   :  { %6225 = vpow2.f32 %v4014_v2 }
0x20fa   :  { %6227 = vpow2.f32 %v4016_v23 }
0x20fb   :  { %6229 = vpow2.f32 %v4018_v52 }
0x2102   :  { %v6224_v33 = vpop.eup %6223 }
0x2103   :  { %v6226_v53 = vpop.eup %6225  ;;  %4025 = vperm.xlu1 %6123, %v6224_v33  }
0x2104   :  { %4028 = vperm.xlu0 %6124, %v6226_v53   ;;  %v6228_v22 = vpop.eup %6227 }
0x2105   :  { %v6230_v9 = vpop.eup %6229 }
0x2107   :  { %4031 = vperm.xlu1 %6123, %v6228_v22  }
0x210b   :  { %4034 = vperm.xlu1 %6123, %v6230_v9  }
0x2182   :  { %v4026_v34 = vpop.permute.xlu1 %4025 }
0x2183   :  { %v4029_v24 = vpop.permute.xlu0 %4028  ;;  %v4039_v63 = vrot.slane %v4026_v34, %v6826_v16 }
0x2184   :  { %v4043_v10 = vrot.slane %v4029_v24, %v6826_v16 }
0x2186   :  { %v4032_v20 = vpop.permute.xlu1 %4031  ;;  %v4052_v31 = vsel %vm600_vm2, %v4043_v10, %v4039_v63  ;;  %v4137_v10 = vld [vmem:[#allocation13] sm:$0xff]  ;;  %v4138_v63 = vld [vmem:[#allocation13 + $0x8] sm:$0xff] }
0x2187   :  { %v4047_v56 = vrot.slane %v4032_v20, %v6826_v16 }
0x2189   :  { %v4053_v15 = vsel %vm602_vm3, %v4047_v56, %v4052_v31  ;;  %v7489_v56 = vpack.c.bf16 %v4138_v63, %v4137_v10 }
0x218a   :  { %v4035_v27 = vpop.permute.xlu1 %4034 }
0x218b   :  { %v4051_v39 = vrot.slane %v4035_v27, %v6826_v16  ;;  %6011 = vmatpush3.bf16.msra.mxu1 %v7489_v56  ;;  %v4140_v27 = vld [vmem:[#allocation13 + $0x18] sm:$0xff] }
0x218c   :  { %6012 = vmatprep.subr.bf16.mxu1 %v7727_v1 }
0x218d   :  { %v4054_v54 = vsel %vm604_vm4, %v4051_v39, %v4053_v15 }
0x218e   :  { %v4056_v61 = vsel %vm607_vm5, %v4054_v54, 0.0 }
0x218f   :  { %4057 = vadd.xlane.f32.xlu0 %v4056_v61 }
0x221c   :  { %v4058_v62 = vpop.xlane.xlu0 %4057 }
0x221d   :  { %6231 = vrcp.f32 %v4058_v62 }
0x2227   :  { %v6232_v45 = vpop.eup %6231 }
0x2228   :  { %v4064_v48 = vrot.slane %v6232_v45, %v6762_v47  ;;  %v4068_v19 = vrot.slane %v6232_v45, %v6765_v50  ;;  %v4072_v52 = vrot.slane %v6232_v45, %v6778_v8  ;;  %v4076_v24 = vrot.slane %v6232_v45, %v6839_v40 }
0x222a   :  { %v4081_v2 = vmul.f32 %v6224_v33, %v4064_v48  ;;  %v4082_v23 = vmul.f32 %v6226_v53, %v4068_v19  ;;  %v4083_v34 = vmul.f32 %v6228_v22, %v4072_v52  ;;  %v4084_v20 = vmul.f32 %v6230_v9, %v4076_v24  ;;  %v4139_v33 = vld [vmem:[#allocation13 + $0x10] sm:$0xff] }
0x222b   :  { %v7493_v53 = vpack.c.bf16 %v4140_v27, %v4139_v33 }
0x222c   :  { %4087 = vperm.xlu1 %6123, %v4081_v2  }
0x222d   :  { %6014 = vmatpush3.bf16.msra.mxu1 %v7493_v53 }
0x222e   :  { %6022 = vmatprep.subr.bf16.mxu1 %v7364_v43 }
0x2230   :  { %4092 = vperm.xlu1 %6123, %v4082_v23  }
0x2234   :  { %4097 = vperm.xlu1 %6123, %v4083_v34  }
0x2238   :  { %4102 = vperm.xlu1 %6123, %v4084_v20  }
0x22ab   :  { %v4088_v22 = vpop.permute.xlu1 %4087 }
0x22ac   :  { %v4105_v9 = vmul.f32 %v7444_v60, %v4088_v22 }
0x22ae   :  { %v4109_v31 = vsel %vm181_vm1, %v4105_v9, 0.0 }
0x22af   :  { %v4110_v39 = vrot.slane %v4109_v31, 4  ;;  %v4093_v15 = vpop.permute.xlu1 %4092 }
0x22b0   :  { %v4106_v54 = vmul.f32 %v7453_v4, %v4093_v15 }
0x22b1   :  { %v4111_v62 = vadd.f32 %v4110_v39, %v4109_v31 }
0x22b2   :  { %v4116_v61 = vsel %vm181_vm1, %v4106_v54, 0.0 }
0x22b3   :  { %v4117_v45 = vrot.slane %v4116_v61, 4  ;;  %v4098_v48 = vpop.permute.xlu1 %4097  ;;  %v4112_v43 = vrot.slane %v4111_v62, 2 }
0x22b4   :  { %v4107_v2 = vmul.f32 %v7450_v58, %v4098_v48 }
0x22b5   :  { %v4118_v19 = vadd.f32 %v4117_v45, %v4116_v61  ;;  %v4113_v27 = vadd.f32 %v4112_v43, %v4111_v62  ;;  %v7737_v43 = vmov 0.0  }
0x22b6   :  { %v4123_v23 = vsel %vm181_vm1, %v4107_v2, 0.0 }
0x22b7   :  { %v4119_v52 = vrot.slane %v4118_v19, 2  ;;  %v4124_v34 = vrot.slane %v4123_v23, 4  ;;  %v4103_v24 = vpop.permute.xlu1 %4102  ;;  %v4114_v54 = vrot.slane %v4113_v27, 1 }
0x22b8   :  { %v4108_v20 = vmul.f32 %v7459_v13, %v4103_v24  ;;  %v7538_v24 = vld [vmem:[%s7723_s8] ss:$0 sm:$0xff] }
0x22b9   :  { %v4120_v10 = vadd.f32 %v4119_v52, %v4118_v19  ;;  %v4125_v63 = vadd.f32 %v4124_v34, %v4123_v23  ;;  %v4115_v0 = vadd.f32 %v4114_v54, %v4113_v27 }
0x22ba   :  { %v4130_v33 = vsel %vm181_vm1, %v4108_v20, 0.0 }
0x22bb   :  { %v4126_v22 = vrot.slane %v4125_v63, 2  ;;  %v4131_v9 = vrot.slane %v4130_v33, 4  ;;  %v4121_v31 = vrot.slane %v4120_v10, 1 }
0x22bd   :  { %v4127_v39 = vadd.f32 %v4126_v22, %v4125_v63  ;;  %v4132_v15 = vadd.f32 %v4131_v9, %v4130_v33  ;;  %v4122_v48 = vadd.f32 %v4121_v31, %v4120_v10  ;;  %v7551_v63 = vld [vmem:[%s7725_s10] ss:$0 sm:$0xff]  ;;  %s6520_s10 = smov [#allocation16]  }
0x22be   :  { %s5236_s1 = sshll.u32 %s6520_s10, 4  ;;  %s5237_s1 = int_to_ptr.vmem [resolvable:$true] %s5236_s1 }
0x22bf   :  { %v4128_v61 = vrot.slane %v4127_v39, 1  ;;  %v4133_v45 = vrot.slane %v4132_v15, 2  ;;  %v4221_v19 = vsel %vm600_vm2, %v4122_v48, %v4115_v0  ;;  %v4298_v0 = vld [vmem:[%s7724_s9] sm:$0xff]  ;;  %s6469_s26 = scalar_lea.vmem %s5237_s1, 384  ;;  %p6474_p9 = scmp.lt.s32.totalorder %s5237_s1, %s5237_s1 }
0x22c0   :  { %p6470_p8 = scmp.ne.s32.totalorder %s5237_s1, %s6469_s26  ;;  %p6475_p10 = scmp.lt.s32.totalorder %s6469_s26, %s6469_s26 }
0x22c1   :  { %v4134_v2 = vadd.f32 %v4133_v45, %v4132_v15  ;;  %v4129_v1 = vadd.f32 %v4128_v61, %v4127_v39 }
0x22c2   :  { %p6476_p11 = por %p6475_p10, %p6474_p9 }
0x22c3   :  { %v4135_v35 = vrot.slane %v4134_v2, 1  ;;  %v4222_v23 = vsel %vm602_vm3, %v4129_v1, %v4221_v19  ;;  %v4299_v1 = vld [vmem:[%s7724_s9 + $0x8] sm:$0xff] }
0x22c4   :  { %p6477_p12 = pnand %p6476_p11, %p6470_p8 }
0x22c5   :  { %v4136_v57 = vadd.f32 %v4135_v35, %v4134_v2  ;;  %v4300_v35 = vld [vmem:[%s7724_s9 + $0x10] sm:$0xff] }
0x22c7   :  { %v4223_v62 = vsel %vm604_vm4, %v4136_v57, %v4222_v23  ;;  %v7523_v57 = vpack.c.bf16 %v4299_v1, %v4298_v0 }
0x22c8   :  { %5723 = vmatmul.mubr.msk.f32.vlgmr.msra.gmra.mrb[28].mxu1 %vm181_vm1, %v4223_v62 }
0x22c9   :  { %6024 = vmatpush1.bf16.msra.mxu1 %v7368_v51  ;;  %4489 = vmatprep.mubr.f32.mxu1 %v7737_v43  ;;  %v4301_v51 = vld [vmem:[%s7724_s9 + $0x18] sm:$0xff] }
0x22ca   :  { %6026 = vmatprep.subr.bf16.mxu1 %v7374_v30  ;;  %6017 = vmatpush3.bf16.msra.mxu0 %v7523_v57  ;;  %v7529_v30 = vpack.c.bf16 %v4301_v51, %v4300_v35 }
0x22cd   :  { %6028 = vmatpush1.bf16.msra.mxu1 %v7378_v37  ;;  %v7738_v37 = vmov 0.0|0.0  }
0x22ce   :  { %6036 = vmatprep.subr.bf16.mxu1 %v7384_v28  ;;  %6018 = vmatprep.subr.bf16.mxu0 %v7738_v37 }
0x22cf   :  { %6020 = vmatpush3.bf16.msra.mxu0 %v7529_v30 }
0x22d0   :  { %6029 = vmatprep.subr.bf16.mxu0 %v7738_v37 }
0x239b   :  { %v4292_v28 = vpop.f32.mrb[28].mxu1 }
0x239c   :  { %v4293_v52 = vadd.f32 %v4292_v28, %v7471_v18  ;;  %v5724_v34 = vpop.f32.mrb[29].mxu1 }
0x239e   :  { %v4296_v20 = vadd.f32 %v7538_v24, %v4293_v52 }
0x23a0   :  { %6233 = vtanh.f32 %v4296_v20 }
0x23aa   :  { %v6234_v10 = vpop.eup %6233 }
0x23ab   :  { %5734 = vmatmul.mubr.msk.f32.vlgmr.msra.gmra.mrb[28].mxu0 %vm181_vm1, %v6234_v10 }
0x23ac   :  { %6031 = vmatpush3.bf16.msra.mxu0 %v7366_v25  ;;  %5744 = vmatprep.mubr.msk.f32.mxu0 %vm6517_vm0, %v7737_v43 }
0x23ad   :  { %6032 = vmatprep.subr.bf16.mxu0 %v7738_v37 }
0x23b0   :  { %6034 = vmatpush3.bf16.msra.mxu0 %v7376_v29 }
0x23b1   :  { %6043 = vmatprep.subr.bf16.mxu0 %v7738_v37 }
0x247e   :  { %v4371_v18 = vpop.f32.mrb[28].mxu0 }
0x247f   :  { %v7554_v33 = vadd.f32 %v7551_v63, %v4371_v18  ;;  %v5735_v27 = vpop.f32.mrb[29].mxu0 }
0x2481   :  { %v4375_v25 = vsel %vm1011_vm6, %v7554_v33, -inf }
0x2482   :  { %4376 = vmax.xlane.f32.xlu1 %v4375_v25 }
0x250f   :  { %v7558_v22 = vpop.xlane.xlu1 %4376 }
0x2510   :  { %vm4390_vm10 = vcmp.eq.f32.partialorder %v7554_v33, %v7558_v22 }
0x2511   :  { %v4391_v29 = vsel %vm4390_vm10, %v6822_v12, 32 }
0x2512   :  { %v4392_v9 = vsel %vm1011_vm6, %v4391_v29, 2147483647 }
0x2513   :  { %v4394_v31 = vshra.s32 %v4392_v9, 16  ;;  %v4393_v15 = vand.u32 65535, %v4392_v9 }
0x2515   :  { %v4396_v39 = vcvt.s32.f32 %v4394_v31  ;;  %v4395_v61 = vcvt.s32.f32 %v4393_v15 }
0x2517   :  { %4397 = vmin.xlane.f32.xlu0 %v4396_v39 }
0x25a4   :  { %v4398_v54 = vpop.xlane.xlu0 %4397 }
0x25a5   :  { %vm4399_vm11 = vcmp.eq.f32.partialorder %v4396_v39, %v4398_v54  ;;  %v4404_v48 = vcvt.f32.s32 %v4398_v54 }
0x25a6   :  { %v4400_v45 = vsel %vm4399_vm11, %v4395_v61, inf }
0x25a7   :  { %4401 = vmin.xlane.f32.xlu0 %v4400_v45  ;;  %v4405_v19 = vshll.u32 %v4404_v48, 16 }
0x2634   :  { %v4402_v2 = vpop.xlane.xlu0 %4401 }
0x2635   :  { %v4403_v23 = vcvt.f32.s32 %v4402_v2 }
0x2637   :  { %v4406_v62 = vadd.s32 %v4405_v19, %v4403_v23 }
0x2639   :  { %vm4407_vm12 = vcmp.eq.s32.totalorder %v6822_v12, %v4406_v62 }
0x263a   :  { %v5301_v0 = vsel %vm4407_vm12, 1.0, %v7737_v43 }
0x263b   :  { %5302 = vmatmul.mubr.msk.f32.vlgmr.msra.gmra.mrb[30].mxu1 %vm181_vm1, %v5301_v0  ;;  %5745 = vmatmul.mubr.msk.f32.vlgmr.msra.gmra.mrb[30].mxu0 %vm181_vm1, %v5301_v0 }
0x263c   :  { %6045 = vmatpush3.bf16.msra.mxu0 %v7387_v38  ;;  %6038 = vmatpush1.bf16.msra.mxu1 %v7389_v42 }
0x263d   :  { %6046 = vmatprep.subr.bf16.mxu0 %v7738_v37  ;;  %6040 = vmatprep.subr.bf16.mxu1 %v7392_v21 }
0x263e   :  { %5755 = vmatprep.mubr.msk.f32.mxu0 %vm6517_vm0, %v7737_v43  ;;  %4642 = vmatprep.mubr.f32.mxu1 %v7737_v43 }
0x2640   :  { %6048 = vmatpush3.bf16.msra.mxu0 %v7399_v26  ;;  %6042 = vmatpush1.bf16.msra.mxu1 %v7401_v36 }
0x2641   :  { %6049 = vmatprep.subr.bf16.mxu1 %v7738_v37  ;;  %6055 = vmatprep.subr.bf16.mxu0 %v7738_v37 }
0x2643   :  { %5756 = vmatmul.mubr.msk.f32.vlgmr.msra.gmra.mrb[32].mxu0 %vm181_vm1, %v7433_v5  ;;  %5304 = vmatmul.mubr.msk.f32.vlgmr.msra.gmra.mrb[30].mxu1 %vm181_vm1, %v7433_v5 }
0x2644   :  { %6051 = vmatpush3.bf16.msra.mxu1 %v7420_v46  ;;  %5766 = vmatprep.mubr.msk.f32.mxu1 %vm6517_vm0, %v7737_v43 }
0x2645   :  { %6052 = vmatprep.subr.bf16.mxu1 %v7738_v37  ;;  %6057 = vmatpush3.bf16.msra.mxu0 %v7489_v56 }
0x2646   :  { %6058 = vmatprep.subr.bf16.mxu0 %v7738_v37  ;;  %5777 = vmatprep.mubr.msk.f32.mxu0 %vm6517_vm0, %v7737_v43 }
0x2648   :  { %6054 = vmatpush3.bf16.msra.mxu1 %v7423_v17 }
0x2649   :  { %6060 = vmatpush3.bf16.msra.mxu0 %v7493_v53  ;;  %6061 = vmatprep.subr.bf16.mxu1 %v7738_v37 }
0x270e   :  { %v4562_v12 = vpop.f32.mrb[30].mxu0 }
0x270f   :  { %v5746_v38 = vpop.f32.mrb[31].mxu0  ;;  %v4563_v20 = vadd.f32 %v4562_v12, %v6784_v14 }
0x2716   :  { %v4715_v42 = vpop.f32.mrb[32].mxu0  ;;  %v4644_v21 = vpop.f32.mrb[30].mxu1 }
0x2717   :  { %v6088_v26 = vadd.f32 %v6771_v55, %v4644_v21  ;;  %v5757_v36 = vpop.f32.mrb[33].mxu0  ;;  %v4646_v46 = vpop.f32.mrb[31].mxu1  ;;  %v4716_v52 = vadd.f32 %v4715_v42, %v6781_v11 }
0x2718   :  { %v6090_v1 = vadd.f32 %v6773_v59, %v4646_v46 }
0x2719   :  { %v5306_v56 = vmul.f32 -1.442695, %v6088_v26 }
0x271a   :  { %v5307_v35 = vmul.f32 -1.442695, %v6090_v1 }
0x271b   :  { %6235 = vpow2.f32 %v5306_v56 }
0x271c   :  { %6237 = vpow2.f32 %v5307_v35 }
0x2725   :  { %v6236_v51 = vpop.eup %6235 }
0x2726   :  { %v4723_v17 = vadd.f32 1.0, %v6236_v51  ;;  %v6238_v53 = vpop.eup %6237 }
0x2727   :  { %v4730_v28 = vadd.f32 1.0, %v6238_v53 }
0x2728   :  { %6239 = vrcp.f32 %v4723_v17 }
0x2729   :  { %6241 = vrcp.f32 %v4730_v28 }
0x2732   :  { %v6240_v34 = vpop.eup %6239 }
0x2733   :  { %v4733_v10 = vmul.f32 %v6240_v34, %v4716_v52  ;;  %v6242_v18 = vpop.eup %6241 }
0x2734   :  { %v4736_v27 = vsub.f32 1.0, %v6242_v18  ;;  %v4738_v29 = vmul.f32 %v6242_v18, %v7433_v5 }
0x2735   :  { %v4734_v55 = vadd.f32 %v4733_v10, %v4563_v20 }
0x2737   :  { %6243 = vtanh.f32 %v4734_v55 }
0x2741   :  { %v6244_v59 = vpop.eup %6243 }
0x2742   :  { %v4737_v25 = vmul.f32 %v6244_v59, %v4736_v27 }
0x2744   :  { %v4739_v9 = vadd.f32 %v4738_v29, %v4737_v25 }
0x2746   :  { %5767 = vmatmul.mubr.msk.f32.vlgmr.msra.gmra.mrb[32].mxu1 %vm181_vm1, %v4739_v9  ;;  %v4747_v31 = vrot.slane %v4739_v9, %v6789_v32 }
0x2747   :  { %6063 = vmatpush3.bf16.msra.mxu1 %v7523_v57  ;;  %5788 = vmatprep.mubr.msk.f32.mxu1 %vm6517_vm0, %v7737_v43 }
0x2748   :  { %v4755_v11 = vrot.slane %v4747_v31, %v6789_v32  ;;  %v4748_v14 = vcombine.high %v4747_v31, %v4747_v31  ;;  %6064 = vmatprep.subr.bf16.mxu1 %v7738_v37 }
0x274a   :  { %v4768_v39 = vrot.slane %v4755_v11, %v6762_v47  ;;  %v4762_v15 = vrot.slane %v4748_v14, %v6789_v32  ;;  %v4763_v5 = vcombine.high %v4755_v11, %v4755_v11 }
0x274b   :  { %6066 = vmatpush3.bf16.msra.mxu1 %v7529_v30 }
0x274c   :  { %v4785_v54 = vmul.f32 %v7444_v60, %v4768_v39  ;;  %v4772_v61 = vrot.slane %v4762_v15, %v6762_v47  ;;  %v4776_v45 = vrot.slane %v4763_v5, %v6762_v47  ;;  %v4764_v48 = vcombine.high %v4762_v15, %v4762_v15 }
0x274d   :  { %v1015_v15 = vsub.f32 %v6922_v41, %v6926_v49 }
0x274e   :  { %v4789_v57 = vsel %vm181_vm1, %v4785_v54, 0.0  ;;  %v4786_v43 = vmul.f32 %v7453_v4, %v4772_v61  ;;  %v4787_v2 = vmul.f32 %v7450_v58, %v4776_v45  ;;  %v4780_v32 = vrot.slane %v4764_v48, %v6762_v47 }
0x274f   :  { %4790 = vadd.xlane.f32.xlu0 %v4789_v57  ;;  %v1016_v5 = vmul.f32 1.442695, %v1015_v15  ;;  %v1855_v54 = vsub.f32 %v7038_v44, %v7042_v3 }
0x2750   :  { %v4792_v37 = vsel %vm181_vm1, %v4786_v43, 0.0  ;;  %v4795_v30 = vsel %vm181_vm1, %v4787_v2, 0.0  ;;  %v4788_v19 = vmul.f32 %v7459_v13, %v4780_v32  ;;  %v2696_v43 = vsub.f32 %v7238_v6, %v7242_v7 }
0x2751   :  { %v1856_v57 = vmul.f32 1.442695, %v1855_v54 }
0x2752   :  { %v4798_v23 = vsel %vm181_vm1, %v4788_v19, 0.0  ;;  %v2697_v32 = vmul.f32 1.442695, %v2696_v43  ;;  %v7740_v19 = vld [vmem:[#allocation23_spill] sm:$0xff] }
0x2753   :  { %4793 = vadd.xlane.f32.xlu0 %v4792_v37 }
0x2757   :  { %4796 = vadd.xlane.f32.xlu0 %v4795_v30  ;;  %v7739_v30 = vld [vmem:[#allocation24_spill] sm:$0xff] }
0x275b   :  { %4799 = vadd.xlane.f32.xlu0 %v4798_v23  ;;  %v3537_v23 = vsub.f32 %v7740_v19, %v7739_v30 }
0x27dc   :  { %v4791_v62 = vpop.xlane.xlu0 %4790 }
0x27dd   :  { %v4808_v21 = vrot.slane %v4791_v62, %v6826_v16 }
0x27e0   :  { %v4794_v0 = vpop.xlane.xlu0 %4793 }
0x27e1   :  { %v4812_v38 = vrot.slane %v4794_v0, %v6826_v16 }
0x27e3   :  { %v4821_v46 = vsel %vm600_vm2, %v4812_v38, %v4808_v21  ;;  %v3538_v21 = vmul.f32 1.442695, %v3537_v23 }
0x27e4   :  { %v4797_v12 = vpop.xlane.xlu0 %4796 }
0x27e5   :  { %v4816_v42 = vrot.slane %v4797_v12, %v6826_v16 }
0x27e7   :  { %v4822_v56 = vsel %vm602_vm3, %v4816_v42, %v4821_v46 }
0x27e8   :  { %v4800_v26 = vpop.xlane.xlu0 %4799 }
0x27e9   :  { %v4820_v36 = vrot.slane %v4800_v26, %v6826_v16 }
0x27eb   :  { %v4823_v1 = vsel %vm604_vm4, %v4820_v36, %v4822_v56 }
0x27ec   :  { %v4825_v35 = vsel %vm607_vm5, %v4823_v1, -inf }
0x27ed   :  { %4826 = vmax.xlane.f32.xlu1 %v4825_v35 }
0x2819   :  { %v7628_v51 = vpop.f32.mrb[32].mxu1 }
0x281a   :  { %v5768_v17 = vpop.f32.mrb[33].mxu1 }
0x287a   :  { %v4827_v53 = vpop.xlane.xlu1 %4826 }
0x287b   :  { %v4832_v28 = vrot.slane %v4827_v53, %v6762_v47  ;;  %v4836_v52 = vrot.slane %v4827_v53, %v6765_v50  ;;  %v4840_v34 = vrot.slane %v4827_v53, %v6778_v8  ;;  %v4844_v20 = vrot.slane %v4827_v53, %v6839_v40 }
0x287d   :  { %v4849_v10 = vsub.f32 %v4791_v62, %v4832_v28  ;;  %v4850_v55 = vsub.f32 %v4794_v0, %v4836_v52  ;;  %v4852_v18 = vsub.f32 %v4800_v26, %v4844_v20  ;;  %v4851_v27 = vsub.f32 %v4797_v12, %v4840_v34 }
0x287f   :  { %v4853_v59 = vmul.f32 1.442695, %v4849_v10  ;;  %v4855_v25 = vmul.f32 1.442695, %v4850_v55  ;;  %v4859_v29 = vmul.f32 1.442695, %v4852_v18 }
0x2880   :  { %v4857_v9 = vmul.f32 1.442695, %v4851_v27 }
0x2881   :  { %6245 = vpow2.f32 %v4853_v59 }
0x2882   :  { %6247 = vpow2.f32 %v4855_v25 }
0x2883   :  { %6249 = vpow2.f32 %v4859_v29 }
0x2884   :  { %6251 = vpow2.f32 %v4857_v9 }
0x2885   :  { %6253 = vpow2.f32 %v1016_v5 }
0x2886   :  { %6255 = vpow2.f32 %v1856_v57 }
0x2887   :  { %6257 = vpow2.f32 %v2697_v32 }
0x2888   :  { %6259 = vpow2.f32 %v3538_v21 }
0x288b   :  { %v6246_v31 = vpop.eup %6245 }
0x288c   :  { %v6248_v11 = vpop.eup %6247  ;;  %4866 = vperm.xlu0 %6124, %v6246_v31  }
0x288d   :  { %4869 = vperm.xlu1 %6123, %v6248_v11   ;;  %v7634_v14 = vpop.eup %6249 }
0x288e   :  { %v7636_v39 = vpop.eup %6251 }
0x288f   :  { %v6254_v46 = vpop.eup %6253 }
0x2890   :  { %4875 = vperm.xlu0 %6124, %v7634_v14   ;;  %v1018_v56 = vsel %vm1011_vm6, %v6254_v46, 0.0  ;;  %v6256_v1 = vpop.eup %6255 }
0x2891   :  { %4872 = vperm.xlu1 %6123, %v7636_v39   ;;  %v1858_v35 = vsel %vm1011_vm6, %v6256_v1, 0.0 }
0x290b   :  { %v4867_v61 = vpop.permute.xlu0 %4866 }
0x290c   :  { %v4870_v45 = vpop.permute.xlu1 %4869  ;;  %v4880_v37 = vrot.slane %v4867_v61, %v6826_v16 }
0x290d   :  { %v4884_v48 = vrot.slane %v4870_v45, %v6826_v16 }
0x290f   :  { %v4876_v2 = vpop.permute.xlu0 %4875  ;;  %v4893_v38 = vsel %vm600_vm2, %v4884_v48, %v4880_v37 }
0x2910   :  { %v4873_v62 = vpop.permute.xlu1 %4872  ;;  %v4892_v0 = vrot.slane %v4876_v2, %v6826_v16 }
0x2911   :  { %v4888_v12 = vrot.slane %v4873_v62, %v6826_v16  ;;  %v6258_v16 = vpop.eup %6257 }
0x2912   :  { %v2699_v17 = vsel %vm1011_vm6, %v6258_v16, 0.0  ;;  %v6260_v53 = vpop.eup %6259 }
0x2913   :  { %v4894_v42 = vsel %vm602_vm3, %v4888_v12, %v4893_v38  ;;  %v3540_v28 = vsel %vm1011_vm6, %v6260_v53, 0.0 }
0x2914   :  { %v4895_v26 = vsel %vm604_vm4, %v4892_v0, %v4894_v42 }
0x2915   :  { %v4897_v36 = vsel %vm607_vm5, %v4895_v26, 0.0 }
0x2916   :  { %4898 = vadd.xlane.f32.xlu1 %v4897_v36 }
0x291a   :  { %1019 = vadd.xlane.f32.xlu1 %v1018_v56 }
0x291e   :  { %1859 = vadd.xlane.f32.xlu1 %v1858_v35 }
0x2922   :  { %2700 = vadd.xlane.f32.xlu1 %v2699_v17 }
0x2926   :  { %3541 = vadd.xlane.f32.xlu1 %v3540_v28 }
0x29a3   :  { %v4899_v52 = vpop.xlane.xlu1 %4898 }
0x29a4   :  { %6261 = vrcp.f32 %v4899_v52 }
0x29a7   :  { %v1020_v34 = vpop.xlane.xlu1 %1019 }
0x29a8   :  { %6263 = vlog2.f32 %v1020_v34 }
0x29ab   :  { %v1860_v20 = vpop.xlane.xlu1 %1859 }
0x29ac   :  { %6265 = vlog2.f32 %v1860_v20 }
0x29ae   :  { %v6262_v10 = vpop.eup %6261 }
0x29af   :  { %v2701_v55 = vpop.xlane.xlu1 %2700  ;;  %v4905_v18 = vrot.slane %v6262_v10, %v6762_v47  ;;  %v4909_v59 = vrot.slane %v6262_v10, %v6765_v50  ;;  %v4913_v54 = vrot.slane %v6262_v10, %v6778_v8 }
0x29b0   :  { %6267 = vlog2.f32 %v2701_v55 }
0x29b1   :  { %v4922_v27 = vmul.f32 %v6246_v31, %v4905_v18  ;;  %v4923_v5 = vmul.f32 %v6248_v11, %v4909_v59  ;;  %v4924_v50 = vmul.f32 %v7636_v39, %v4913_v54  ;;  %v4917_v31 = vrot.slane %v6262_v10, %v6839_v40 }
0x29b2   :  { %v6264_v25 = vpop.eup %6263 }
0x29b3   :  { %v1022_v29 = vmul.f32 0.6931472, %v6264_v25  ;;  %4928 = vperm.xlu0 %6124, %v4922_v27   ;;  %v3542_v9 = vpop.xlane.xlu1 %3541 }
0x29b4   :  { %6269 = vlog2.f32 %v3542_v9 }
0x29b5   :  { %v1023_v15 = vadd.f32 %v1022_v29, %v6926_v49 }
0x29b6   :  { %v6266_v61 = vpop.eup %6265 }
0x29b7   :  { %v1024_v57 = vsub.f32 %v6922_v41, %v1023_v15  ;;  %v1862_v43 = vmul.f32 0.6931472, %v6266_v61  ;;  %4933 = vperm.xlu0 %6124, %v4923_v5   ;;  %v4925_v41 = vmul.f32 %v7634_v14, %v4917_v31 }
0x29b9   :  { %1025 = vst.msk [vmem:[#allocation16] sm:$0xf] %vm1011_vm6, %v1024_v57  ;;  %v1863_v47 = vadd.f32 %v1862_v43, %v7042_v3  ;;  %v4378_v57 = vsub.f32 %v7554_v33, %v7558_v22 }
0x29ba   :  { %v6268_v45 = vpop.eup %6267 }
0x29bb   :  { %v1864_v48 = vsub.f32 %v7038_v44, %v1863_v47  ;;  %v2703_v49 = vmul.f32 0.6931472, %v6268_v45  ;;  %4938 = vperm.xlu0 %6124, %v4924_v50   ;;  %v4379_v43 = vmul.f32 1.442695, %v4378_v57 }
0x29bd   :  { %1866 = vst.msk [vmem:[#allocation16 + $0x4] sm:$0xf] %vm1011_vm6, %v1864_v48  ;;  %v2704_v8 = vadd.f32 %v2703_v49, %v7242_v7 }
0x29be   :  { %v6270_v11 = vpop.eup %6269 }
0x29bf   :  { %v2705_v37 = vsub.f32 %v7238_v6, %v2704_v8  ;;  %v3544_v2 = vmul.f32 0.6931472, %v6270_v11  ;;  %4943 = vperm.xlu0 %6124, %v4925_v41  }
0x29c1   :  { %2707 = vst.msk [vmem:[#allocation16 + $0x8] sm:$0xf] %vm1011_vm6, %v2705_v37  ;;  %v3545_v40 = vadd.f32 %v3544_v2, %v7739_v30 }
0x29c3   :  { %v3546_v3 = vsub.f32 %v7740_v19, %v3545_v40 }
0x29c5   :  { %3548 = vst.msk [vmem:[#allocation16 + $0xc] sm:$0xf] %vm1011_vm6, %v3546_v3 }
0x2a32   :  { %v4929_v44 = vpop.permute.xlu0 %4928 }
0x2a33   :  { %v4946_v39 = vmul.f32 %v7444_v60, %v4929_v44 }
0x2a35   :  { %v4950_v7 = vsel %vm181_vm1, %v4946_v39, 0.0 }
0x2a36   :  { %v4951_v32 = vrot.slane %v4950_v7, 4  ;;  %v4934_v14 = vpop.permute.xlu0 %4933 }
0x2a37   :  { %v4947_v23 = vmul.f32 %v7453_v4, %v4934_v14 }
0x2a38   :  { %v4952_v62 = vadd.f32 %v4951_v32, %v4950_v7 }
0x2a39   :  { %v4957_v6 = vsel %vm181_vm1, %v4947_v23, 0.0 }
0x2a3a   :  { %v4958_v0 = vrot.slane %v4957_v6, 4  ;;  %v4939_v12 = vpop.permute.xlu0 %4938  ;;  %v4953_v42 = vrot.slane %v4952_v62, 2 }
0x2a3b   :  { %v4948_v30 = vmul.f32 %v7450_v58, %v4939_v12 }
0x2a3c   :  { %v4959_v38 = vadd.f32 %v4958_v0, %v4957_v6  ;;  %v4954_v1 = vadd.f32 %v4953_v42, %v4952_v62 }
0x2a3d   :  { %v4964_v19 = vsel %vm181_vm1, %v4948_v30, 0.0 }
0x2a3e   :  { %v4960_v21 = vrot.slane %v4959_v38, 2  ;;  %v4965_v26 = vrot.slane %v4964_v19, 4  ;;  %v4944_v60 = vpop.permute.xlu0 %4943  ;;  %v4955_v58 = vrot.slane %v4954_v1, 1 }
0x2a3f   :  { %v4949_v36 = vmul.f32 %v7459_v13, %v4944_v60 }
0x2a40   :  { %v4961_v46 = vadd.f32 %v4960_v21, %v4959_v38  ;;  %v4966_v56 = vadd.f32 %v4965_v26, %v4964_v19  ;;  %v4956_v18 = vadd.f32 %v4955_v58, %v4954_v1 }
0x2a41   :  { %v4971_v4 = vsel %vm181_vm1, %v4949_v36, 0.0 }
0x2a42   :  { %v4967_v35 = vrot.slane %v4966_v56, 2  ;;  %v4972_v16 = vrot.slane %v4971_v4, 4  ;;  %v4962_v17 = vrot.slane %v4961_v46, 1 }
0x2a44   :  { %v4968_v53 = vadd.f32 %v4967_v35, %v4966_v56  ;;  %v4973_v28 = vadd.f32 %v4972_v16, %v4971_v4  ;;  %v4963_v20 = vadd.f32 %v4962_v17, %v4961_v46 }
0x2a46   :  { %v4969_v52 = vrot.slane %v4968_v53, 1  ;;  %v4974_v34 = vrot.slane %v4973_v28, 2  ;;  %v5062_v13 = vsel %vm600_vm2, %v4963_v20, %v4956_v18 }
0x2a48   :  { %v4975_v10 = vadd.f32 %v4974_v34, %v4973_v28  ;;  %v4970_v55 = vadd.f32 %v4969_v52, %v4968_v53 }
0x2a4a   :  { %v4976_v27 = vrot.slane %v4975_v10, 1  ;;  %v5063_v25 = vsel %vm602_vm3, %v4970_v55, %v5062_v13 }
0x2a4c   :  { %v4977_v59 = vadd.f32 %v4976_v27, %v4975_v10 }
0x2a4e   :  { %v5064_v29 = vsel %vm604_vm4, %v4977_v59, %v5063_v25 }
0x2a4f   :  { %5778 = vmatmul.mubr.msk.f32.vlgmr.msra.gmra.mrb[34].mxu0 %vm181_vm1, %v5064_v29 }
0x2b22   :  { %v5133_v9 = vpop.f32.mrb[34].mxu0 }
0x2b23   :  { %v5134_v15 = vadd.f32 %v5133_v9, %v7628_v51  ;;  %v5779_v5 = vpop.f32.mrb[35].mxu0 }
0x2b25   :  { %v5137_v54 = vadd.f32 %v7538_v24, %v5134_v15 }
0x2b27   :  { %6271 = vtanh.f32 %v5137_v54 }
0x2b28   :  { %6273 = vpow2.f32 %v4379_v43 }
0x2b31   :  { %v6272_v61 = vpop.eup %6271 }
0x2b32   :  { %5789 = vmatmul.mubr.msk.f32.vlgmr.msra.gmra.mrb[34].mxu1 %vm181_vm1, %v6272_v61  ;;  %v6274_v48 = vpop.eup %6273 }
0x2b33   :  { %v4381_v51 = vsel %vm1011_vm6, %v6274_v48, 0.0 }
0x2c05   :  { %v5212_v47 = vpop.f32.mrb[34].mxu1 }
0x2c06   :  { %v5213_v50 = vadd.f32 %v7551_v63, %v5212_v47  ;;  %v5790_v31 = vpop.f32.mrb[35].mxu1 }
0x2c08   :  { %v5216_v45 = vsel %vm1011_vm6, %v5213_v50, -inf }
0x2c09   :  { %5217 = vmax.xlane.f32.xlu0 %v5216_v45 }
0x2c0d   :  { %4382 = vadd.xlane.f32.xlu0 %v4381_v51 }
0x2c96   :  { %v5218_v24 = vpop.xlane.xlu0 %5217 }
0x2c97   :  { %v5219_v49 = vsub.f32 %v5213_v50, %v5218_v24 }
0x2c99   :  { %v5220_v8 = vmul.f32 1.442695, %v5219_v49 }
0x2c9a   :  { %v4383_v41 = vpop.xlane.xlu0 %4382 }
0x2c9b   :  { %6275 = vpow2.f32 %v5220_v8 }
0x2c9c   :  { %6277 = vlog2.f32 %v4383_v41 }
0x2ca5   :  { %v6276_v11 = vpop.eup %6275 }
0x2ca6   :  { %v6278_v37 = vpop.eup %6277  ;;  %v5222_v2 = vsel %vm1011_vm6, %v6276_v11, 0.0 }
0x2ca7   :  { %v4385_v40 = vmul.f32 0.6931472, %v6278_v37  ;;  %5223 = vadd.xlane.f32.xlu1 %v5222_v2 }
0x2ca9   :  { %v4386_v63 = vadd.f32 %v4385_v40, %v7558_v22 }
0x2cab   :  { %v4387_v3 = vsub.f32 %v7554_v33, %v4386_v63 }
0x2cad   :  { %4389 = vst.msk [vmem:[#allocation16 + $0x10] sm:$0xf] %vm1011_vm6, %v4387_v3 }
0x2d34   :  { %v5224_v44 = vpop.xlane.xlu1 %5223 }
0x2d35   :  { %6279 = vlog2.f32 %v5224_v44 }
0x2d3f   :  { %v6280_v39 = vpop.eup %6279 }
0x2d40   :  { %v5226_v7 = vmul.f32 0.6931472, %v6280_v39 }
0x2d42   :  { %v5227_v32 = vadd.f32 %v5226_v7, %v5218_v24 }
0x2d44   :  { %v5228_v14 = vsub.f32 %v5213_v50, %v5227_v32 }
0x2d46   :  { %5230 = vst.msk [vmem:[#allocation16 + $0x14] sm:$0xf] %vm1011_vm6, %v5228_v14 }
0x2d47   :  { %6480 = shalt.err (!%p6477_p12)
}
0x2d48   :  { %s6481_s23 = scalar_lea.hbm %s7726_s11, 384 }
0x2d49   :  { %p6482_p13 = scmp.ne.s32.totalorder %s7726_s11, %s6481_s23  ;;  %p6485_p0 = scmp.lt.u32.totalorder %s6481_s23, %s7726_s11 }
0x2d4b   :  { %p6487_p1 = pnand %p6485_p0, %p6482_p13 }
0x2d4d   :  { %6490 = shalt.err (!%p6487_p1)
}
0x2d4e   :  { %s6521_s17 = smov 64   ;;  %s6522_s5 = smov 4  }
0x2d4f   :  { %5242 = dma.vmem_to_hbm [thread:$0]  %s5237_s1, 384, %s7726_s11, [#allocation4], %s6521_s17, %s6521_s17, %s6522_s5  }
0x2d50   :  { %6501 = dma.done.wait [#allocation4], 384  }
0x2d51   :  { %6502 = vsyncadd [#allocation4], 4294966912 }
0x2d52   :  { %5246 = vsyncpa [#allocation3], 1 }
0x2d53   :  { %5247 = vsyncpa [#allocation6], 1 }
0x2d54   :  { %5248 = vsyncpa [#allocation9], 1 }
0x2d55   :  { %5249 = vsyncpa [#allocation12], 1 }
0x2d56   :  { %5250 = vsyncpa [#allocation15], 1 }
0x2d57   :  { %5251 = vsyncpa [#allocation4], 1 }

</bundles_post_ra>
